<compile_context>
chip_gen: v6e
topology: v6e:2x2x1
jax: 0.10.0
libtpu: 0.0.40
codegen_flags: <defaults>
</compile_context>

<pallas_src>
import functools

import jax
import jax.numpy as jnp
from jax import lax
from jax.experimental import pallas as pl
from jax.experimental.pallas import tpu as pltpu


_LANE = 128
_K = 3        # spatial kernel size used by the residual block


def _round_up(x, m):
    return (x + m - 1) // m * m


# ----------------------------------------------------------------------------
# Fused stage kernel: for each image, run all residual blocks back-to-back
# with every intermediate activation resident in VMEM.
# ----------------------------------------------------------------------------
def _stage_kernel(*refs, stride, ho, wo, cpad, num_blocks):
    x_ref = refs[0]
    o_ref = refs[1 + 6 * num_blocks]
    ypad_ref = refs[2 + 6 * num_blocks]     # padded previous-block output
    hpad_ref = refs[3 + 6 * num_blocks]     # padded intra-block activation

    s = stride
    m = ho * wo

    # Zero the spatially padded activation scratches.  Their interiors are
    # fully rewritten below; only the one-pixel zero borders are consumed,
    # but a full clear is <<1% of the matmul work and is safe under megacore
    # grid splitting (no reliance on a program_id == 0 init step).
    ypad_ref[...] = jnp.zeros_like(ypad_ref)
    hpad_ref[...] = jnp.zeros_like(hpad_ref)

    def conv3x3(src_ref, w_ref, phase_packed):
        """9-tap MXU accumulation: sum_ij (Ho*Wo, Cin) @ (Cin, Cout)."""
        cin = w_ref.shape[1]
        cout_w = w_ref.shape[2]
        acc = jnp.zeros((m, cout_w), jnp.float32)
        for i in range(_K):
            for j in range(_K):
                if phase_packed:                   # stride-s space-to-depth input
                    ph = (i % s) * s + (j % s)     # phase slot
                    di, dj = i // s, j // s        # offset inside the phase grid
                    win = src_ref[0, pl.ds(di, ho), pl.ds(dj, wo),
                                  pl.ds(ph * cin, cin)]
                else:                              # stride-1, padded VMEM scratch
                    win = src_ref[pl.ds(i, ho), pl.ds(j, wo), :]
                win = win.reshape(m, cin).astype(jnp.bfloat16)
                acc = acc + jnp.dot(win, w_ref[i * _K + j],
                                    preferred_element_type=jnp.float32)
        return acc

    prev = None                         # previous block's output, (m, cpad) f32
    for blk in range(num_blocks):
        w1, s1, b1, w2, s2, b2 = refs[1 + 6 * blk: 7 + 6 * blk]

        if blk == 0:
            # conv1 (3x3, stride s) with the 1x1 projection folded in (center tap)
            y1 = conv3x3(x_ref, w1, True) * s1[...] + b1[...]
            h = jnp.maximum(y1[:, :cpad], 0.0)
            shortcut = y1[:, cpad:]         # projection columns (BN, no ReLU)
        else:
            # conv1 (3x3, stride 1) reads the previous block's padded output
            y1 = conv3x3(ypad_ref, w1, False) * s1[...] + b1[...]
            h = jnp.maximum(y1, 0.0)
            shortcut = prev                 # identity shortcut, still in VMEM

        # h never leaves VMEM: conv2 reads its shifted windows from hpad_ref
        hpad_ref[pl.ds(1, ho), pl.ds(1, wo), :] = h.reshape(ho, wo, cpad)
        y2 = conv3x3(hpad_ref, w2, False) * s2[...] + b2[...]
        out = jnp.maximum(y2 + shortcut, 0.0)

        if blk == num_blocks - 1:
            o_ref[...] = out.reshape(1, ho, wo, cpad).astype(o_ref.dtype)
        else:
            ypad_ref[pl.ds(1, ho), pl.ds(1, wo), :] = out.reshape(ho, wo, cpad)
            prev = out


# ----------------------------------------------------------------------------
# Wrapper-side data preparation (pure layout plumbing, no redundant HBM blowup)
# ----------------------------------------------------------------------------
def _phase_pack(x, stride, pad):
    """(N,H,W,C) f32 -> (N, ceil((H+2p)/s), ceil((W+2p)/s), s*s*Cp) f32,
    Cp = roundup(C, 128).  Spatially pads then space-to-depth packs by the
    stride so every conv tap becomes a contiguous, 128-lane-aligned window
    read inside the kernel.  Total size ~= padded input (no 9x im2col)."""
    n, h, w, c = x.shape
    cp = _round_up(c, _LANE)
    s = stride
    hp, wp = h + 2 * pad, w + 2 * pad
    eh, ew = (-hp) % s, (-wp) % s            # make padded dims divide the stride
    xp = jnp.pad(x, ((0, 0), (pad, pad + eh), (pad, pad + ew), (0, cp - c)))
    hh, wh = (hp + eh) // s, (wp + ew) // s
    xr = xp.reshape(n, hh, s, wh, s, cp).transpose(0, 1, 3, 2, 4, 5)
    return xr.reshape(n, hh, wh, s * s * cp)


def _pack_block_weights(p, cpad, use_projection):
    """Pack conv/BN params into lane-dense, tap-major, bf16 weight matrices."""
    w1 = p["w1"]                                   # (3, 3, cin, cout)
    _, _, cin, cout = w1.shape
    cin_p = _round_up(cin, _LANE)
    c1 = 2 * cpad if use_projection else cpad

    W1 = jnp.zeros((_K * _K, cin_p, c1), jnp.float32)
    W1 = W1.at[:, :cin, :cout].set(w1.reshape(_K * _K, cin, cout))
    S1 = jnp.zeros((1, c1), jnp.float32).at[0, :cout].set(p["s1"])
    B1 = jnp.zeros((1, c1), jnp.float32).at[0, :cout].set(p["b1"])
    if use_projection:
        # 1x1 stride-s projection == center tap of the 3x3 pad-1 stride-s conv
        W1 = W1.at[_K + 1, :cin, cpad:cpad + cout].set(p["wp"][0, 0])
        S1 = S1.at[0, cpad:cpad + cout].set(p["sp"])
        B1 = B1.at[0, cpad:cpad + cout].set(p["bp"])

    w2 = p["w2"]                                   # (3, 3, cout, cout)
    W2 = jnp.zeros((_K * _K, cpad, cpad), jnp.float32)
    W2 = W2.at[:, :cout, :cout].set(w2.reshape(_K * _K, cout, cout))
    S2 = jnp.zeros((1, cpad), jnp.float32).at[0, :cout].set(p["s2"])
    B2 = jnp.zeros((1, cpad), jnp.float32).at[0, :cout].set(p["b2"])

    return (W1.astype(jnp.bfloat16), S1, B1,
            W2.astype(jnp.bfloat16), S2, B2), cin_p, c1


def stage_forward(x, params, stride):
    """x: (N, H, W, C) f32.  Runs the whole stage (all blocks) in one fused
    Pallas kernel.  Returns (N, Ho, Wo, Cpad) f32 (zero padding beyond cout)."""
    n, h, w, _ = x.shape
    num_blocks = len(params)
    cout = params[0]["w1"].shape[3]
    cpad = _round_up(cout, _LANE)
    ho = (h + 2 - _K) // stride + 1
    wo = (w + 2 - _K) // stride + 1
    kk = _K * _K

    x_ph = _phase_pack(x, stride, pad=1)
    _, hh, wh, cph = x_ph.shape

    weight_args = []
    in_specs = [pl.BlockSpec((1, hh, wh, cph), lambda b: (b, 0, 0, 0))]
    for bi, p in enumerate(params):
        use_proj = (bi == 0)
        (w1c, s1c, b1c, w2c, s2c, b2c), cin_p, c1 = _pack_block_weights(
            p, cpad, use_proj)
        if bi == 0:
            assert x_ph.shape[-1] == stride * stride * cin_p
        else:
            assert cin_p == cpad, "identity blocks must keep cin == cout"
        weight_args += [w1c, s1c, b1c, w2c, s2c, b2c]
        in_specs += [
            pl.BlockSpec((kk, cin_p, c1), lambda b: (0, 0, 0)),   # conv1(+proj) W
            pl.BlockSpec((1, c1), lambda b: (0, 0)),              # conv1 BN scale
            pl.BlockSpec((1, c1), lambda b: (0, 0)),              # conv1 BN bias
            pl.BlockSpec((kk, cpad, cpad), lambda b: (0, 0, 0)),  # conv2 W
            pl.BlockSpec((1, cpad), lambda b: (0, 0)),            # conv2 BN scale
            pl.BlockSpec((1, cpad), lambda b: (0, 0)),            # conv2 BN bias
        ]

    kernel = functools.partial(
        _stage_kernel, stride=stride, ho=ho, wo=wo,
        cpad=cpad, num_blocks=num_blocks)

    return pl.pallas_call(
        kernel,
        out_shape=jax.ShapeDtypeStruct((n, ho, wo, cpad), jnp.float32),
        grid=(n,),
        in_specs=in_specs,
        out_specs=pl.BlockSpec((1, ho, wo, cpad), lambda b: (b, 0, 0, 0)),
        scratch_shapes=[pltpu.VMEM((ho + 2, wo + 2, cpad), jnp.float32),
                        pltpu.VMEM((ho + 2, wo + 2, cpad), jnp.float32)],
        compiler_params=pltpu.CompilerParams(
            dimension_semantics=("parallel",),
            vmem_limit_bytes=64 * 1024 * 1024),
    )(x_ph, *weight_args)


def blocks_forward(x_nhwc, params, stride):
    cout = params[0]["w1"].shape[3]
    y = stage_forward(x_nhwc, params, stride)
    return y[..., :cout]                  # strip lane padding once, at the end


# ----------------------------------------------------------------------------
# Parameters (deterministic, synthetic)
# ----------------------------------------------------------------------------
_EPS = 1e-5


def _fold_bn(gamma, beta, mean, var):
    scale = gamma / jnp.sqrt(var + _EPS)
    return scale, beta - mean * scale


def _bn_params(cout, salt):
    gamma = jnp.linspace(0.9, 1.1, cout, dtype=jnp.float32) + 0.01 * salt
    beta = jnp.linspace(-0.1, 0.1, cout, dtype=jnp.float32)
    mean = jnp.linspace(-0.05, 0.05, cout, dtype=jnp.float32)
    var = jnp.linspace(0.5, 1.5, cout, dtype=jnp.float32)
    return _fold_bn(gamma, beta, mean, var)


def make_block_params(key, cin, cout, use_projection):
    k1, k2, k3 = jax.random.split(key, 3)
    p = {
        "w1": 0.1 * jax.random.normal(k1, (3, 3, cin, cout), jnp.float32),
        "w2": 0.1 * jax.random.normal(k2, (3, 3, cout, cout), jnp.float32),
    }
    p["s1"], p["b1"] = _bn_params(cout, 1.0)
    p["s2"], p["b2"] = _bn_params(cout, 2.0)
    if use_projection:
        p["wp"] = 0.1 * jax.random.normal(k3, (1, 1, cin, cout), jnp.float32)
        p["sp"], p["bp"] = _bn_params(cout, 3.0)
    return p


def make_blocks_params(key, num_blocks, in_channels, out_channels):
    keys = jax.random.split(key, num_blocks)
    params = [make_block_params(keys[0], in_channels, out_channels, True)]
    for i in range(1, num_blocks):
        params.append(make_block_params(keys[i], out_channels, out_channels, False))
    return params


# ----------------------------------------------------------------------------
# Pure-JAX f32 reference (lax.conv) for the correctness check
# ----------------------------------------------------------------------------
def _ref_conv_bn(x, w, s, b, stride, pad, relu, residual=None):
    y = lax.conv_general_dilated(
        x, w, window_strides=(stride, stride), padding=[(pad, pad), (pad, pad)],
        dimension_numbers=("NHWC", "HWIO", "NHWC"))
    y = y * s.reshape(1, 1, 1, -1) + b.reshape(1, 1, 1, -1)
    if residual is not None:
        y = y + residual
    if relu:
        y = jnp.maximum(y, 0.0)
    return y


def _ref_block(x, p, stride, use_projection):
    shortcut = (_ref_conv_bn(x, p["wp"], p["sp"], p["bp"], stride, 0, False)
                if use_projection else x)
    h = _ref_conv_bn(x, p["w1"], p["s1"], p["b1"], stride, 1, True)
    return _ref_conv_bn(h, p["w2"], p["s2"], p["b2"], 1, 1, True, residual=shortcut)


def _ref_forward(x, params, stride):
    x = _ref_block(x, params[0], stride, True)
    for p in params[1:]:
        x = _ref_block(x, p, 1, False)
    return x


# ----------------------------------------------------------------------------
if __name__ == "__main__":
    # Blocks(ResidualBlock, num_blocks=2, in_channels=4, out_channels=8, stride=2)
    batch, in_channels, spatial = 2, 4, 16
    out_channels, num_blocks, stride = 8, 2, 2

    key = jax.random.PRNGKey(0)
    kx, kp = jax.random.split(key)
    x_nchw = jax.random.normal(kx, (batch, in_channels, spatial, spatial), jnp.float32)
    x_nhwc = jnp.transpose(x_nchw, (0, 2, 3, 1))   # NCHW (PyTorch) -> NHWC

    params = make_blocks_params(kp, num_blocks, in_channels, out_channels)

    fwd = jax.jit(blocks_forward, static_argnums=2)
    out = jax.block_until_ready(fwd(x_nhwc, params, stride))

    ref = jax.block_until_ready(_ref_forward(x_nhwc, params, stride))
    assert out.shape == (batch, spatial // stride, spatial // stride, out_channels)
    # bf16 MXU operands (f32 accumulation) -> looser tolerance than pure f32
    max_err = float(jnp.max(jnp.abs(out - ref)))
    assert jnp.allclose(out, ref, atol=3e-2, rtol=3e-2), f"mismatch, max_err={max_err}"

    print("KERNEL_OK")
</pallas_src>

<mosaic_0001>
module attributes {stable_mosaic.version = 11 : i64} {
  func.func @_stage_kernel(%arg0: i32, %arg1: memref<1x9x9x512xf32, #tpu.memory_space<vmem>>, %arg2: memref<9x128x256xbf16, #tpu.memory_space<vmem>>, %arg3: memref<1x256xf32, #tpu.memory_space<vmem>>, %arg4: memref<1x256xf32, #tpu.memory_space<vmem>>, %arg5: memref<9x128x128xbf16, #tpu.memory_space<vmem>>, %arg6: memref<1x128xf32, #tpu.memory_space<vmem>>, %arg7: memref<1x128xf32, #tpu.memory_space<vmem>>, %arg8: memref<9x128x128xbf16, #tpu.memory_space<vmem>>, %arg9: memref<1x128xf32, #tpu.memory_space<vmem>>, %arg10: memref<1x128xf32, #tpu.memory_space<vmem>>, %arg11: memref<9x128x128xbf16, #tpu.memory_space<vmem>>, %arg12: memref<1x128xf32, #tpu.memory_space<vmem>>, %arg13: memref<1x128xf32, #tpu.memory_space<vmem>>, %arg14: memref<1x8x8x128xf32, #tpu.memory_space<vmem>>, %arg15: memref<10x10x128xf32, #tpu.memory_space<vmem>>, %arg16: memref<10x10x128xf32, #tpu.memory_space<vmem>>) attributes {dimension_semantics = [#tpu.dimension_semantics<parallel>], iteration_bounds = array<i64: 2>, scalar_prefetch = 0 : i64, scratch_operands = 2 : i64, tpu.core_type = #tpu.core_type<tc>, window_params = [{transform_indices = @transform_0, window_bounds = array<i64: 1, 9, 9, 512>}, {pipeline_mode = #tpu.pipeline_mode<synchronous>, transform_indices = @transform_1, window_bounds = array<i64: 9, 128, 256>}, {pipeline_mode = #tpu.pipeline_mode<synchronous>, transform_indices = @transform_2, window_bounds = array<i64: 1, 256>}, {pipeline_mode = #tpu.pipeline_mode<synchronous>, transform_indices = @transform_3, window_bounds = array<i64: 1, 256>}, {pipeline_mode = #tpu.pipeline_mode<synchronous>, transform_indices = @transform_4, window_bounds = array<i64: 9, 128, 128>}, {pipeline_mode = #tpu.pipeline_mode<synchronous>, transform_indices = @transform_5, window_bounds = array<i64: 1, 128>}, {pipeline_mode = #tpu.pipeline_mode<synchronous>, transform_indices = @transform_6, window_bounds = array<i64: 1, 128>}, {pipeline_mode = #tpu.pipeline_mode<synchronous>, transform_indices = @transform_7, window_bounds = array<i64: 9, 128, 128>}, {pipeline_mode = #tpu.pipeline_mode<synchronous>, transform_indices = @transform_8, window_bounds = array<i64: 1, 128>}, {pipeline_mode = #tpu.pipeline_mode<synchronous>, transform_indices = @transform_9, window_bounds = array<i64: 1, 128>}, {pipeline_mode = #tpu.pipeline_mode<synchronous>, transform_indices = @transform_10, window_bounds = array<i64: 9, 128, 128>}, {pipeline_mode = #tpu.pipeline_mode<synchronous>, transform_indices = @transform_11, window_bounds = array<i64: 1, 128>}, {pipeline_mode = #tpu.pipeline_mode<synchronous>, transform_indices = @transform_12, window_bounds = array<i64: 1, 128>}, {transform_indices = @transform_13, window_bounds = array<i64: 1, 8, 8, 128>}]} {
    %cst = arith.constant 0.000000e+00 : f32
    %0 = vector.broadcast %cst : f32 to vector<10x10x128xf32>
    %c0 = arith.constant 0 : index
    %c0_0 = arith.constant 0 : index
    %c0_1 = arith.constant 0 : index
    %1 = vector.load %arg15[%c0, %c0_0, %c0_1] : memref<10x10x128xf32, #tpu.memory_space<vmem>>, vector<10x10x128xf32>
    tpu.vector_store %arg15[%c0, %c0_0, %c0_1], %0 {strides = array<i32>} : memref<10x10x128xf32, #tpu.memory_space<vmem>>, vector<10x10x128xf32>,
    %cst_2 = arith.constant 0.000000e+00 : f32
    %2 = vector.broadcast %cst_2 : f32 to vector<10x10x128xf32>
    %c0_3 = arith.constant 0 : index
    %c0_4 = arith.constant 0 : index
    %c0_5 = arith.constant 0 : index
    %3 = vector.load %arg16[%c0_3, %c0_4, %c0_5] : memref<10x10x128xf32, #tpu.memory_space<vmem>>, vector<10x10x128xf32>
    tpu.vector_store %arg16[%c0_3, %c0_4, %c0_5], %2 {strides = array<i32>} : memref<10x10x128xf32, #tpu.memory_space<vmem>>, vector<10x10x128xf32>,
    %cst_6 = arith.constant 0.000000e+00 : f32
    %4 = vector.broadcast %cst_6 : f32 to vector<64x256xf32>
    %c0_7 = arith.constant 0 : index
    %c0_8 = arith.constant 0 : index
    %c0_9 = arith.constant 0 : index
    %c0_10 = arith.constant 0 : index
    %5 = vector.load %arg1[%c0_7, %c0_8, %c0_9, %c0_10] : memref<1x9x9x512xf32, #tpu.memory_space<vmem>>, vector<1x8x8x128xf32>
    %6 = vector.shape_cast %5 : vector<1x8x8x128xf32> to vector<8x8x128xf32>
    %7 = vector.shape_cast %6 : vector<8x8x128xf32> to vector<64x128xf32>
    %8 = arith.truncf %7 : vector<64x128xf32> to vector<64x128xbf16>
    %c0_11 = arith.constant 0 : index
    %c0_12 = arith.constant 0 : index
    %c0_13 = arith.constant 0 : index
    %9 = vector.load %arg2[%c0_11, %c0_12, %c0_13] : memref<9x128x256xbf16, #tpu.memory_space<vmem>>, vector<1x128x256xbf16>
    %10 = vector.shape_cast %9 : vector<1x128x256xbf16> to vector<128x256xbf16>
    %cst_14 = arith.constant dense<0.000000e+00> : vector<64x256xf32>
    %11 = tpu.matmul %8, %10, %cst_14 {dimension_numbers = #tpu.dot_dimension_numbers<[1], [0], [0], [1], [0, 0, 1, 1], [], []>} : vector<64x128xbf16>, vector<128x256xbf16>, vector<64x256xf32> -> vector<64x256xf32>
    %12 = arith.addf %4, %11 : vector<64x256xf32>
    %c0_15 = arith.constant 0 : index
    %c0_16 = arith.constant 0 : index
    %c0_17 = arith.constant 0 : index
    %c128 = arith.constant 128 : index
    %13 = vector.load %arg1[%c0_15, %c0_16, %c0_17, %c128] : memref<1x9x9x512xf32, #tpu.memory_space<vmem>>, vector<1x8x8x128xf32>
    %14 = vector.shape_cast %13 : vector<1x8x8x128xf32> to vector<8x8x128xf32>
    %15 = vector.shape_cast %14 : vector<8x8x128xf32> to vector<64x128xf32>
    %16 = arith.truncf %15 : vector<64x128xf32> to vector<64x128xbf16>
    %c1 = arith.constant 1 : index
    %c0_18 = arith.constant 0 : index
    %c0_19 = arith.constant 0 : index
    %17 = vector.load %arg2[%c1, %c0_18, %c0_19] : memref<9x128x256xbf16, #tpu.memory_space<vmem>>, vector<1x128x256xbf16>
    %18 = vector.shape_cast %17 : vector<1x128x256xbf16> to vector<128x256xbf16>
    %cst_20 = arith.constant dense<0.000000e+00> : vector<64x256xf32>
    %19 = tpu.matmul %16, %18, %cst_20 {dimension_numbers = #tpu.dot_dimension_numbers<[1], [0], [0], [1], [0, 0, 1, 1], [], []>} : vector<64x128xbf16>, vector<128x256xbf16>, vector<64x256xf32> -> vector<64x256xf32>
    %20 = arith.addf %12, %19 : vector<64x256xf32>
    %c0_21 = arith.constant 0 : index
    %c0_22 = arith.constant 0 : index
    %c1_23 = arith.constant 1 : index
    %c0_24 = arith.constant 0 : index
    %21 = vector.load %arg1[%c0_21, %c0_22, %c1_23, %c0_24] : memref<1x9x9x512xf32, #tpu.memory_space<vmem>>, vector<1x8x8x128xf32>
    %22 = vector.shape_cast %21 : vector<1x8x8x128xf32> to vector<8x8x128xf32>
    %23 = vector.shape_cast %22 : vector<8x8x128xf32> to vector<64x128xf32>
    %24 = arith.truncf %23 : vector<64x128xf32> to vector<64x128xbf16>
    %c2 = arith.constant 2 : index
    %c0_25 = arith.constant 0 : index
    %c0_26 = arith.constant 0 : index
    %25 = vector.load %arg2[%c2, %c0_25, %c0_26] : memref<9x128x256xbf16, #tpu.memory_space<vmem>>, vector<1x128x256xbf16>
    %26 = vector.shape_cast %25 : vector<1x128x256xbf16> to vector<128x256xbf16>
    %cst_27 = arith.constant dense<0.000000e+00> : vector<64x256xf32>
    %27 = tpu.matmul %24, %26, %cst_27 {dimension_numbers = #tpu.dot_dimension_numbers<[1], [0], [0], [1], [0, 0, 1, 1], [], []>} : vector<64x128xbf16>, vector<128x256xbf16>, vector<64x256xf32> -> vector<64x256xf32>
    %28 = arith.addf %20, %27 : vector<64x256xf32>
    %c0_28 = arith.constant 0 : index
    %c0_29 = arith.constant 0 : index
    %c0_30 = arith.constant 0 : index
    %c256 = arith.constant 256 : index
    %29 = vector.load %arg1[%c0_28, %c0_29, %c0_30, %c256] : memref<1x9x9x512xf32, #tpu.memory_space<vmem>>, vector<1x8x8x128xf32>
    %30 = vector.shape_cast %29 : vector<1x8x8x128xf32> to vector<8x8x128xf32>
    %31 = vector.shape_cast %30 : vector<8x8x128xf32> to vector<64x128xf32>
    %32 = arith.truncf %31 : vector<64x128xf32> to vector<64x128xbf16>
    %c3 = arith.constant 3 : index
    %c0_31 = arith.constant 0 : index
    %c0_32 = arith.constant 0 : index
    %33 = vector.load %arg2[%c3, %c0_31, %c0_32] : memref<9x128x256xbf16, #tpu.memory_space<vmem>>, vector<1x128x256xbf16>
    %34 = vector.shape_cast %33 : vector<1x128x256xbf16> to vector<128x256xbf16>
    %cst_33 = arith.constant dense<0.000000e+00> : vector<64x256xf32>
    %35 = tpu.matmul %32, %34, %cst_33 {dimension_numbers = #tpu.dot_dimension_numbers<[1], [0], [0], [1], [0, 0, 1, 1], [], []>} : vector<64x128xbf16>, vector<128x256xbf16>, vector<64x256xf32> -> vector<64x256xf32>
    %36 = arith.addf %28, %35 : vector<64x256xf32>
    %c0_34 = arith.constant 0 : index
    %c0_35 = arith.constant 0 : index
    %c0_36 = arith.constant 0 : index
    %c384 = arith.constant 384 : index
    %37 = vector.load %arg1[%c0_34, %c0_35, %c0_36, %c384] : memref<1x9x9x512xf32, #tpu.memory_space<vmem>>, vector<1x8x8x128xf32>
    %38 = vector.shape_cast %37 : vector<1x8x8x128xf32> to vector<8x8x128xf32>
    %39 = vector.shape_cast %38 : vector<8x8x128xf32> to vector<64x128xf32>
    %40 = arith.truncf %39 : vector<64x128xf32> to vector<64x128xbf16>
    %c4 = arith.constant 4 : index
    %c0_37 = arith.constant 0 : index
    %c0_38 = arith.constant 0 : index
    %41 = vector.load %arg2[%c4, %c0_37, %c0_38] : memref<9x128x256xbf16, #tpu.memory_space<vmem>>, vector<1x128x256xbf16>
    %42 = vector.shape_cast %41 : vector<1x128x256xbf16> to vector<128x256xbf16>
    %cst_39 = arith.constant dense<0.000000e+00> : vector<64x256xf32>
    %43 = tpu.matmul %40, %42, %cst_39 {dimension_numbers = #tpu.dot_dimension_numbers<[1], [0], [0], [1], [0, 0, 1, 1], [], []>} : vector<64x128xbf16>, vector<128x256xbf16>, vector<64x256xf32> -> vector<64x256xf32>
    %44 = arith.addf %36, %43 : vector<64x256xf32>
    %c0_40 = arith.constant 0 : index
    %c0_41 = arith.constant 0 : index
    %c1_42 = arith.constant 1 : index
    %c256_43 = arith.constant 256 : index
    %45 = vector.load %arg1[%c0_40, %c0_41, %c1_42, %c256_43] : memref<1x9x9x512xf32, #tpu.memory_space<vmem>>, vector<1x8x8x128xf32>
    %46 = vector.shape_cast %45 : vector<1x8x8x128xf32> to vector<8x8x128xf32>
    %47 = vector.shape_cast %46 : vector<8x8x128xf32> to vector<64x128xf32>
    %48 = arith.truncf %47 : vector<64x128xf32> to vector<64x128xbf16>
    %c5 = arith.constant 5 : index
    %c0_44 = arith.constant 0 : index
    %c0_45 = arith.constant 0 : index
    %49 = vector.load %arg2[%c5, %c0_44, %c0_45] : memref<9x128x256xbf16, #tpu.memory_space<vmem>>, vector<1x128x256xbf16>
    %50 = vector.shape_cast %49 : vector<1x128x256xbf16> to vector<128x256xbf16>
    %cst_46 = arith.constant dense<0.000000e+00> : vector<64x256xf32>
    %51 = tpu.matmul %48, %50, %cst_46 {dimension_numbers = #tpu.dot_dimension_numbers<[1], [0], [0], [1], [0, 0, 1, 1], [], []>} : vector<64x128xbf16>, vector<128x256xbf16>, vector<64x256xf32> -> vector<64x256xf32>
    %52 = arith.addf %44, %51 : vector<64x256xf32>
    %c0_47 = arith.constant 0 : index
    %c1_48 = arith.constant 1 : index
    %c0_49 = arith.constant 0 : index
    %c0_50 = arith.constant 0 : index
    %53 = vector.load %arg1[%c0_47, %c1_48, %c0_49, %c0_50] : memref<1x9x9x512xf32, #tpu.memory_space<vmem>>, vector<1x8x8x128xf32>
    %54 = vector.shape_cast %53 : vector<1x8x8x128xf32> to vector<8x8x128xf32>
    %55 = vector.shape_cast %54 : vector<8x8x128xf32> to vector<64x128xf32>
    %56 = arith.truncf %55 : vector<64x128xf32> to vector<64x128xbf16>
    %c6 = arith.constant 6 : index
    %c0_51 = arith.constant 0 : index
    %c0_52 = arith.constant 0 : index
    %57 = vector.load %arg2[%c6, %c0_51, %c0_52] : memref<9x128x256xbf16, #tpu.memory_space<vmem>>, vector<1x128x256xbf16>
    %58 = vector.shape_cast %57 : vector<1x128x256xbf16> to vector<128x256xbf16>
    %cst_53 = arith.constant dense<0.000000e+00> : vector<64x256xf32>
    %59 = tpu.matmul %56, %58, %cst_53 {dimension_numbers = #tpu.dot_dimension_numbers<[1], [0], [0], [1], [0, 0, 1, 1], [], []>} : vector<64x128xbf16>, vector<128x256xbf16>, vector<64x256xf32> -> vector<64x256xf32>
    %60 = arith.addf %52, %59 : vector<64x256xf32>
    %c0_54 = arith.constant 0 : index
    %c1_55 = arith.constant 1 : index
    %c0_56 = arith.constant 0 : index
    %c128_57 = arith.constant 128 : index
    %61 = vector.load %arg1[%c0_54, %c1_55, %c0_56, %c128_57] : memref<1x9x9x512xf32, #tpu.memory_space<vmem>>, vector<1x8x8x128xf32>
    %62 = vector.shape_cast %61 : vector<1x8x8x128xf32> to vector<8x8x128xf32>
    %63 = vector.shape_cast %62 : vector<8x8x128xf32> to vector<64x128xf32>
    %64 = arith.truncf %63 : vector<64x128xf32> to vector<64x128xbf16>
    %c7 = arith.constant 7 : index
    %c0_58 = arith.constant 0 : index
    %c0_59 = arith.constant 0 : index
    %65 = vector.load %arg2[%c7, %c0_58, %c0_59] : memref<9x128x256xbf16, #tpu.memory_space<vmem>>, vector<1x128x256xbf16>
    %66 = vector.shape_cast %65 : vector<1x128x256xbf16> to vector<128x256xbf16>
    %cst_60 = arith.constant dense<0.000000e+00> : vector<64x256xf32>
    %67 = tpu.matmul %64, %66, %cst_60 {dimension_numbers = #tpu.dot_dimension_numbers<[1], [0], [0], [1], [0, 0, 1, 1], [], []>} : vector<64x128xbf16>, vector<128x256xbf16>, vector<64x256xf32> -> vector<64x256xf32>
    %68 = arith.addf %60, %67 : vector<64x256xf32>
    %c0_61 = arith.constant 0 : index
    %c1_62 = arith.constant 1 : index
    %c1_63 = arith.constant 1 : index
    %c0_64 = arith.constant 0 : index
    %69 = vector.load %arg1[%c0_61, %c1_62, %c1_63, %c0_64] : memref<1x9x9x512xf32, #tpu.memory_space<vmem>>, vector<1x8x8x128xf32>
    %70 = vector.shape_cast %69 : vector<1x8x8x128xf32> to vector<8x8x128xf32>
    %71 = vector.shape_cast %70 : vector<8x8x128xf32> to vector<64x128xf32>
    %72 = arith.truncf %71 : vector<64x128xf32> to vector<64x128xbf16>
    %c8 = arith.constant 8 : index
    %c0_65 = arith.constant 0 : index
    %c0_66 = arith.constant 0 : index
    %73 = vector.load %arg2[%c8, %c0_65, %c0_66] : memref<9x128x256xbf16, #tpu.memory_space<vmem>>, vector<1x128x256xbf16>
    %74 = vector.shape_cast %73 : vector<1x128x256xbf16> to vector<128x256xbf16>
    %cst_67 = arith.constant dense<0.000000e+00> : vector<64x256xf32>
    %75 = tpu.matmul %72, %74, %cst_67 {dimension_numbers = #tpu.dot_dimension_numbers<[1], [0], [0], [1], [0, 0, 1, 1], [], []>} : vector<64x128xbf16>, vector<128x256xbf16>, vector<64x256xf32> -> vector<64x256xf32>
    %76 = arith.addf %68, %75 : vector<64x256xf32>
    %c0_68 = arith.constant 0 : index
    %c0_69 = arith.constant 0 : index
    %77 = vector.load %arg3[%c0_68, %c0_69] : memref<1x256xf32, #tpu.memory_space<vmem>>, vector<1x256xf32>
    %78 = vector.broadcast %77 : vector<1x256xf32> to vector<64x256xf32>
    %79 = arith.mulf %76, %78 : vector<64x256xf32>
    %c0_70 = arith.constant 0 : index
    %c0_71 = arith.constant 0 : index
    %80 = vector.load %arg4[%c0_70, %c0_71] : memref<1x256xf32, #tpu.memory_space<vmem>>, vector<1x256xf32>
    %81 = vector.broadcast %80 : vector<1x256xf32> to vector<64x256xf32>
    %82 = arith.addf %79, %81 : vector<64x256xf32>
    %83 = vector.extract_strided_slice %82 {offsets = [0, 0], sizes = [64, 128], strides = [1, 1]} : vector<64x256xf32> to vector<64x128xf32>
    %cst_72 = arith.constant 0.000000e+00 : f32
    %84 = vector.broadcast %cst_72 : f32 to vector<64x128xf32>
    %85 = arith.maximumf %83, %84 : vector<64x128xf32>
    %86 = vector.extract_strided_slice %82 {offsets = [0, 128], sizes = [64, 128], strides = [1, 1]} : vector<64x256xf32> to vector<64x128xf32>
    %87 = vector.shape_cast %85 : vector<64x128xf32> to vector<8x8x128xf32>
    %c1_73 = arith.constant 1 : index
    %c1_74 = arith.constant 1 : index
    %c0_75 = arith.constant 0 : index
    %88 = vector.load %arg16[%c1_73, %c1_74, %c0_75] : memref<10x10x128xf32, #tpu.memory_space<vmem>>, vector<8x8x128xf32>
    tpu.vector_store %arg16[%c1_73, %c1_74, %c0_75], %87 {strides = array<i32>} : memref<10x10x128xf32, #tpu.memory_space<vmem>>, vector<8x8x128xf32>,
    %cst_76 = arith.constant 0.000000e+00 : f32
    %89 = vector.broadcast %cst_76 : f32 to vector<64x128xf32>
    %c0_77 = arith.constant 0 : index
    %c0_78 = arith.constant 0 : index
    %c0_79 = arith.constant 0 : index
    %90 = vector.load %arg16[%c0_77, %c0_78, %c0_79] : memref<10x10x128xf32, #tpu.memory_space<vmem>>, vector<8x8x128xf32>
    %91 = vector.shape_cast %90 : vector<8x8x128xf32> to vector<64x128xf32>
    %92 = arith.truncf %91 : vector<64x128xf32> to vector<64x128xbf16>
    %c0_80 = arith.constant 0 : index
    %c0_81 = arith.constant 0 : index
    %c0_82 = arith.constant 0 : index
    %93 = vector.load %arg5[%c0_80, %c0_81, %c0_82] : memref<9x128x128xbf16, #tpu.memory_space<vmem>>, vector<1x128x128xbf16>
    %94 = vector.shape_cast %93 : vector<1x128x128xbf16> to vector<128x128xbf16>
    %cst_83 = arith.constant dense<0.000000e+00> : vector<64x128xf32>
    %95 = tpu.matmul %92, %94, %cst_83 {dimension_numbers = #tpu.dot_dimension_numbers<[1], [0], [0], [1], [0, 0, 1, 1], [], []>} : vector<64x128xbf16>, vector<128x128xbf16>, vector<64x128xf32> -> vector<64x128xf32>
    %96 = arith.addf %89, %95 : vector<64x128xf32>
    %c0_84 = arith.constant 0 : index
    %c1_85 = arith.constant 1 : index
    %c0_86 = arith.constant 0 : index
    %97 = vector.load %arg16[%c0_84, %c1_85, %c0_86] : memref<10x10x128xf32, #tpu.memory_space<vmem>>, vector<8x8x128xf32>
    %98 = vector.shape_cast %97 : vector<8x8x128xf32> to vector<64x128xf32>
    %99 = arith.truncf %98 : vector<64x128xf32> to vector<64x128xbf16>
    %c1_87 = arith.constant 1 : index
    %c0_88 = arith.constant 0 : index
    %c0_89 = arith.constant 0 : index
    %100 = vector.load %arg5[%c1_87, %c0_88, %c0_89] : memref<9x128x128xbf16, #tpu.memory_space<vmem>>, vector<1x128x128xbf16>
    %101 = vector.shape_cast %100 : vector<1x128x128xbf16> to vector<128x128xbf16>
    %cst_90 = arith.constant dense<0.000000e+00> : vector<64x128xf32>
    %102 = tpu.matmul %99, %101, %cst_90 {dimension_numbers = #tpu.dot_dimension_numbers<[1], [0], [0], [1], [0, 0, 1, 1], [], []>} : vector<64x128xbf16>, vector<128x128xbf16>, vector<64x128xf32> -> vector<64x128xf32>
    %103 = arith.addf %96, %102 : vector<64x128xf32>
    %c0_91 = arith.constant 0 : index
    %c2_92 = arith.constant 2 : index
    %c0_93 = arith.constant 0 : index
    %104 = vector.load %arg16[%c0_91, %c2_92, %c0_93] : memref<10x10x128xf32, #tpu.memory_space<vmem>>, vector<8x8x128xf32>
    %105 = vector.shape_cast %104 : vector<8x8x128xf32> to vector<64x128xf32>
    %106 = arith.truncf %105 : vector<64x128xf32> to vector<64x128xbf16>
    %c2_94 = arith.constant 2 : index
    %c0_95 = arith.constant 0 : index
    %c0_96 = arith.constant 0 : index
    %107 = vector.load %arg5[%c2_94, %c0_95, %c0_96] : memref<9x128x128xbf16, #tpu.memory_space<vmem>>, vector<1x128x128xbf16>
    %108 = vector.shape_cast %107 : vector<1x128x128xbf16> to vector<128x128xbf16>
    %cst_97 = arith.constant dense<0.000000e+00> : vector<64x128xf32>
    %109 = tpu.matmul %106, %108, %cst_97 {dimension_numbers = #tpu.dot_dimension_numbers<[1], [0], [0], [1], [0, 0, 1, 1], [], []>} : vector<64x128xbf16>, vector<128x128xbf16>, vector<64x128xf32> -> vector<64x128xf32>
    %110 = arith.addf %103, %109 : vector<64x128xf32>
    %c1_98 = arith.constant 1 : index
    %c0_99 = arith.constant 0 : index
    %c0_100 = arith.constant 0 : index
    %111 = vector.load %arg16[%c1_98, %c0_99, %c0_100] : memref<10x10x128xf32, #tpu.memory_space<vmem>>, vector<8x8x128xf32>
    %112 = vector.shape_cast %111 : vector<8x8x128xf32> to vector<64x128xf32>
    %113 = arith.truncf %112 : vector<64x128xf32> to vector<64x128xbf16>
    %c3_101 = arith.constant 3 : index
    %c0_102 = arith.constant 0 : index
    %c0_103 = arith.constant 0 : index
    %114 = vector.load %arg5[%c3_101, %c0_102, %c0_103] : memref<9x128x128xbf16, #tpu.memory_space<vmem>>, vector<1x128x128xbf16>
    %115 = vector.shape_cast %114 : vector<1x128x128xbf16> to vector<128x128xbf16>
    %cst_104 = arith.constant dense<0.000000e+00> : vector<64x128xf32>
    %116 = tpu.matmul %113, %115, %cst_104 {dimension_numbers = #tpu.dot_dimension_numbers<[1], [0], [0], [1], [0, 0, 1, 1], [], []>} : vector<64x128xbf16>, vector<128x128xbf16>, vector<64x128xf32> -> vector<64x128xf32>
    %117 = arith.addf %110, %116 : vector<64x128xf32>
    %c1_105 = arith.constant 1 : index
    %c1_106 = arith.constant 1 : index
    %c0_107 = arith.constant 0 : index
    %118 = vector.load %arg16[%c1_105, %c1_106, %c0_107] : memref<10x10x128xf32, #tpu.memory_space<vmem>>, vector<8x8x128xf32>
    %119 = vector.shape_cast %118 : vector<8x8x128xf32> to vector<64x128xf32>
    %120 = arith.truncf %119 : vector<64x128xf32> to vector<64x128xbf16>
    %c4_108 = arith.constant 4 : index
    %c0_109 = arith.constant 0 : index
    %c0_110 = arith.constant 0 : index
    %121 = vector.load %arg5[%c4_108, %c0_109, %c0_110] : memref<9x128x128xbf16, #tpu.memory_space<vmem>>, vector<1x128x128xbf16>
    %122 = vector.shape_cast %121 : vector<1x128x128xbf16> to vector<128x128xbf16>
    %cst_111 = arith.constant dense<0.000000e+00> : vector<64x128xf32>
    %123 = tpu.matmul %120, %122, %cst_111 {dimension_numbers = #tpu.dot_dimension_numbers<[1], [0], [0], [1], [0, 0, 1, 1], [], []>} : vector<64x128xbf16>, vector<128x128xbf16>, vector<64x128xf32> -> vector<64x128xf32>
    %124 = arith.addf %117, %123 : vector<64x128xf32>
    %c1_112 = arith.constant 1 : index
    %c2_113 = arith.constant 2 : index
    %c0_114 = arith.constant 0 : index
    %125 = vector.load %arg16[%c1_112, %c2_113, %c0_114] : memref<10x10x128xf32, #tpu.memory_space<vmem>>, vector<8x8x128xf32>
    %126 = vector.shape_cast %125 : vector<8x8x128xf32> to vector<64x128xf32>
    %127 = arith.truncf %126 : vector<64x128xf32> to vector<64x128xbf16>
    %c5_115 = arith.constant 5 : index
    %c0_116 = arith.constant 0 : index
    %c0_117 = arith.constant 0 : index
    %128 = vector.load %arg5[%c5_115, %c0_116, %c0_117] : memref<9x128x128xbf16, #tpu.memory_space<vmem>>, vector<1x128x128xbf16>
    %129 = vector.shape_cast %128 : vector<1x128x128xbf16> to vector<128x128xbf16>
    %cst_118 = arith.constant dense<0.000000e+00> : vector<64x128xf32>
    %130 = tpu.matmul %127, %129, %cst_118 {dimension_numbers = #tpu.dot_dimension_numbers<[1], [0], [0], [1], [0, 0, 1, 1], [], []>} : vector<64x128xbf16>, vector<128x128xbf16>, vector<64x128xf32> -> vector<64x128xf32>
    %131 = arith.addf %124, %130 : vector<64x128xf32>
    %c2_119 = arith.constant 2 : index
    %c0_120 = arith.constant 0 : index
    %c0_121 = arith.constant 0 : index
    %132 = vector.load %arg16[%c2_119, %c0_120, %c0_121] : memref<10x10x128xf32, #tpu.memory_space<vmem>>, vector<8x8x128xf32>
    %133 = vector.shape_cast %132 : vector<8x8x128xf32> to vector<64x128xf32>
    %134 = arith.truncf %133 : vector<64x128xf32> to vector<64x128xbf16>
    %c6_122 = arith.constant 6 : index
    %c0_123 = arith.constant 0 : index
    %c0_124 = arith.constant 0 : index
    %135 = vector.load %arg5[%c6_122, %c0_123, %c0_124] : memref<9x128x128xbf16, #tpu.memory_space<vmem>>, vector<1x128x128xbf16>
    %136 = vector.shape_cast %135 : vector<1x128x128xbf16> to vector<128x128xbf16>
    %cst_125 = arith.constant dense<0.000000e+00> : vector<64x128xf32>
    %137 = tpu.matmul %134, %136, %cst_125 {dimension_numbers = #tpu.dot_dimension_numbers<[1], [0], [0], [1], [0, 0, 1, 1], [], []>} : vector<64x128xbf16>, vector<128x128xbf16>, vector<64x128xf32> -> vector<64x128xf32>
    %138 = arith.addf %131, %137 : vector<64x128xf32>
    %c2_126 = arith.constant 2 : index
    %c1_127 = arith.constant 1 : index
    %c0_128 = arith.constant 0 : index
    %139 = vector.load %arg16[%c2_126, %c1_127, %c0_128] : memref<10x10x128xf32, #tpu.memory_space<vmem>>, vector<8x8x128xf32>
    %140 = vector.shape_cast %139 : vector<8x8x128xf32> to vector<64x128xf32>
    %141 = arith.truncf %140 : vector<64x128xf32> to vector<64x128xbf16>
    %c7_129 = arith.constant 7 : index
    %c0_130 = arith.constant 0 : index
    %c0_131 = arith.constant 0 : index
    %142 = vector.load %arg5[%c7_129, %c0_130, %c0_131] : memref<9x128x128xbf16, #tpu.memory_space<vmem>>, vector<1x128x128xbf16>
    %143 = vector.shape_cast %142 : vector<1x128x128xbf16> to vector<128x128xbf16>
    %cst_132 = arith.constant dense<0.000000e+00> : vector<64x128xf32>
    %144 = tpu.matmul %141, %143, %cst_132 {dimension_numbers = #tpu.dot_dimension_numbers<[1], [0], [0], [1], [0, 0, 1, 1], [], []>} : vector<64x128xbf16>, vector<128x128xbf16>, vector<64x128xf32> -> vector<64x128xf32>
    %145 = arith.addf %138, %144 : vector<64x128xf32>
    %c2_133 = arith.constant 2 : index
    %c2_134 = arith.constant 2 : index
    %c0_135 = arith.constant 0 : index
    %146 = vector.load %arg16[%c2_133, %c2_134, %c0_135] : memref<10x10x128xf32, #tpu.memory_space<vmem>>, vector<8x8x128xf32>
    %147 = vector.shape_cast %146 : vector<8x8x128xf32> to vector<64x128xf32>
    %148 = arith.truncf %147 : vector<64x128xf32> to vector<64x128xbf16>
    %c8_136 = arith.constant 8 : index
    %c0_137 = arith.constant 0 : index
    %c0_138 = arith.constant 0 : index
    %149 = vector.load %arg5[%c8_136, %c0_137, %c0_138] : memref<9x128x128xbf16, #tpu.memory_space<vmem>>, vector<1x128x128xbf16>
    %150 = vector.shape_cast %149 : vector<1x128x128xbf16> to vector<128x128xbf16>
    %cst_139 = arith.constant dense<0.000000e+00> : vector<64x128xf32>
    %151 = tpu.matmul %148, %150, %cst_139 {dimension_numbers = #tpu.dot_dimension_numbers<[1], [0], [0], [1], [0, 0, 1, 1], [], []>} : vector<64x128xbf16>, vector<128x128xbf16>, vector<64x128xf32> -> vector<64x128xf32>
    %152 = arith.addf %145, %151 : vector<64x128xf32>
    %c0_140 = arith.constant 0 : index
    %c0_141 = arith.constant 0 : index
    %153 = vector.load %arg6[%c0_140, %c0_141] : memref<1x128xf32, #tpu.memory_space<vmem>>, vector<1x128xf32>
    %154 = vector.broadcast %153 : vector<1x128xf32> to vector<64x128xf32>
    %155 = arith.mulf %152, %154 : vector<64x128xf32>
    %c0_142 = arith.constant 0 : index
    %c0_143 = arith.constant 0 : index
    %156 = vector.load %arg7[%c0_142, %c0_143] : memref<1x128xf32, #tpu.memory_space<vmem>>, vector<1x128xf32>
    %157 = vector.broadcast %156 : vector<1x128xf32> to vector<64x128xf32>
    %158 = arith.addf %155, %157 : vector<64x128xf32>
    %159 = arith.addf %158, %86 : vector<64x128xf32>
    %cst_144 = arith.constant 0.000000e+00 : f32
    %160 = vector.broadcast %cst_144 : f32 to vector<64x128xf32>
    %161 = arith.maximumf %159, %160 : vector<64x128xf32>
    %162 = vector.shape_cast %161 : vector<64x128xf32> to vector<8x8x128xf32>
    %c1_145 = arith.constant 1 : index
    %c1_146 = arith.constant 1 : index
    %c0_147 = arith.constant 0 : index
    %163 = vector.load %arg15[%c1_145, %c1_146, %c0_147] : memref<10x10x128xf32, #tpu.memory_space<vmem>>, vector<8x8x128xf32>
    tpu.vector_store %arg15[%c1_145, %c1_146, %c0_147], %162 {strides = array<i32>} : memref<10x10x128xf32, #tpu.memory_space<vmem>>, vector<8x8x128xf32>,
    %cst_148 = arith.constant 0.000000e+00 : f32
    %164 = vector.broadcast %cst_148 : f32 to vector<64x128xf32>
    %c0_149 = arith.constant 0 : index
    %c0_150 = arith.constant 0 : index
    %c0_151 = arith.constant 0 : index
    %165 = vector.load %arg15[%c0_149, %c0_150, %c0_151] : memref<10x10x128xf32, #tpu.memory_space<vmem>>, vector<8x8x128xf32>
    %166 = vector.shape_cast %165 : vector<8x8x128xf32> to vector<64x128xf32>
    %167 = arith.truncf %166 : vector<64x128xf32> to vector<64x128xbf16>
    %c0_152 = arith.constant 0 : index
    %c0_153 = arith.constant 0 : index
    %c0_154 = arith.constant 0 : index
    %168 = vector.load %arg8[%c0_152, %c0_153, %c0_154] : memref<9x128x128xbf16, #tpu.memory_space<vmem>>, vector<1x128x128xbf16>
    %169 = vector.shape_cast %168 : vector<1x128x128xbf16> to vector<128x128xbf16>
    %cst_155 = arith.constant dense<0.000000e+00> : vector<64x128xf32>
    %170 = tpu.matmul %167, %169, %cst_155 {dimension_numbers = #tpu.dot_dimension_numbers<[1], [0], [0], [1], [0, 0, 1, 1], [], []>} : vector<64x128xbf16>, vector<128x128xbf16>, vector<64x128xf32> -> vector<64x128xf32>
    %171 = arith.addf %164, %170 : vector<64x128xf32>
    %c0_156 = arith.constant 0 : index
    %c1_157 = arith.constant 1 : index
    %c0_158 = arith.constant 0 : index
    %172 = vector.load %arg15[%c0_156, %c1_157, %c0_158] : memref<10x10x128xf32, #tpu.memory_space<vmem>>, vector<8x8x128xf32>
    %173 = vector.shape_cast %172 : vector<8x8x128xf32> to vector<64x128xf32>
    %174 = arith.truncf %173 : vector<64x128xf32> to vector<64x128xbf16>
    %c1_159 = arith.constant 1 : index
    %c0_160 = arith.constant 0 : index
    %c0_161 = arith.constant 0 : index
    %175 = vector.load %arg8[%c1_159, %c0_160, %c0_161] : memref<9x128x128xbf16, #tpu.memory_space<vmem>>, vector<1x128x128xbf16>
    %176 = vector.shape_cast %175 : vector<1x128x128xbf16> to vector<128x128xbf16>
    %cst_162 = arith.constant dense<0.000000e+00> : vector<64x128xf32>
    %177 = tpu.matmul %174, %176, %cst_162 {dimension_numbers = #tpu.dot_dimension_numbers<[1], [0], [0], [1], [0, 0, 1, 1], [], []>} : vector<64x128xbf16>, vector<128x128xbf16>, vector<64x128xf32> -> vector<64x128xf32>
    %178 = arith.addf %171, %177 : vector<64x128xf32>
    %c0_163 = arith.constant 0 : index
    %c2_164 = arith.constant 2 : index
    %c0_165 = arith.constant 0 : index
    %179 = vector.load %arg15[%c0_163, %c2_164, %c0_165] : memref<10x10x128xf32, #tpu.memory_space<vmem>>, vector<8x8x128xf32>
    %180 = vector.shape_cast %179 : vector<8x8x128xf32> to vector<64x128xf32>
    %181 = arith.truncf %180 : vector<64x128xf32> to vector<64x128xbf16>
    %c2_166 = arith.constant 2 : index
    %c0_167 = arith.constant 0 : index
    %c0_168 = arith.constant 0 : index
    %182 = vector.load %arg8[%c2_166, %c0_167, %c0_168] : memref<9x128x128xbf16, #tpu.memory_space<vmem>>, vector<1x128x128xbf16>
    %183 = vector.shape_cast %182 : vector<1x128x128xbf16> to vector<128x128xbf16>
    %cst_169 = arith.constant dense<0.000000e+00> : vector<64x128xf32>
    %184 = tpu.matmul %181, %183, %cst_169 {dimension_numbers = #tpu.dot_dimension_numbers<[1], [0], [0], [1], [0, 0, 1, 1], [], []>} : vector<64x128xbf16>, vector<128x128xbf16>, vector<64x128xf32> -> vector<64x128xf32>
    %185 = arith.addf %178, %184 : vector<64x128xf32>
    %c1_170 = arith.constant 1 : index
    %c0_171 = arith.constant 0 : index
    %c0_172 = arith.constant 0 : index
    %186 = vector.load %arg15[%c1_170, %c0_171, %c0_172] : memref<10x10x128xf32, #tpu.memory_space<vmem>>, vector<8x8x128xf32>
    %187 = vector.shape_cast %186 : vector<8x8x128xf32> to vector<64x128xf32>
    %188 = arith.truncf %187 : vector<64x128xf32> to vector<64x128xbf16>
    %c3_173 = arith.constant 3 : index
    %c0_174 = arith.constant 0 : index
    %c0_175 = arith.constant 0 : index
    %189 = vector.load %arg8[%c3_173, %c0_174, %c0_175] : memref<9x128x128xbf16, #tpu.memory_space<vmem>>, vector<1x128x128xbf16>
    %190 = vector.shape_cast %189 : vector<1x128x128xbf16> to vector<128x128xbf16>
    %cst_176 = arith.constant dense<0.000000e+00> : vector<64x128xf32>
    %191 = tpu.matmul %188, %190, %cst_176 {dimension_numbers = #tpu.dot_dimension_numbers<[1], [0], [0], [1], [0, 0, 1, 1], [], []>} : vector<64x128xbf16>, vector<128x128xbf16>, vector<64x128xf32> -> vector<64x128xf32>
    %192 = arith.addf %185, %191 : vector<64x128xf32>
    %c1_177 = arith.constant 1 : index
    %c1_178 = arith.constant 1 : index
    %c0_179 = arith.constant 0 : index
    %193 = vector.load %arg15[%c1_177, %c1_178, %c0_179] : memref<10x10x128xf32, #tpu.memory_space<vmem>>, vector<8x8x128xf32>
    %194 = vector.shape_cast %193 : vector<8x8x128xf32> to vector<64x128xf32>
    %195 = arith.truncf %194 : vector<64x128xf32> to vector<64x128xbf16>
    %c4_180 = arith.constant 4 : index
    %c0_181 = arith.constant 0 : index
    %c0_182 = arith.constant 0 : index
    %196 = vector.load %arg8[%c4_180, %c0_181, %c0_182] : memref<9x128x128xbf16, #tpu.memory_space<vmem>>, vector<1x128x128xbf16>
    %197 = vector.shape_cast %196 : vector<1x128x128xbf16> to vector<128x128xbf16>
    %cst_183 = arith.constant dense<0.000000e+00> : vector<64x128xf32>
    %198 = tpu.matmul %195, %197, %cst_183 {dimension_numbers = #tpu.dot_dimension_numbers<[1], [0], [0], [1], [0, 0, 1, 1], [], []>} : vector<64x128xbf16>, vector<128x128xbf16>, vector<64x128xf32> -> vector<64x128xf32>
    %199 = arith.addf %192, %198 : vector<64x128xf32>
    %c1_184 = arith.constant 1 : index
    %c2_185 = arith.constant 2 : index
    %c0_186 = arith.constant 0 : index
    %200 = vector.load %arg15[%c1_184, %c2_185, %c0_186] : memref<10x10x128xf32, #tpu.memory_space<vmem>>, vector<8x8x128xf32>
    %201 = vector.shape_cast %200 : vector<8x8x128xf32> to vector<64x128xf32>
    %202 = arith.truncf %201 : vector<64x128xf32> to vector<64x128xbf16>
    %c5_187 = arith.constant 5 : index
    %c0_188 = arith.constant 0 : index
    %c0_189 = arith.constant 0 : index
    %203 = vector.load %arg8[%c5_187, %c0_188, %c0_189] : memref<9x128x128xbf16, #tpu.memory_space<vmem>>, vector<1x128x128xbf16>
    %204 = vector.shape_cast %203 : vector<1x128x128xbf16> to vector<128x128xbf16>
    %cst_190 = arith.constant dense<0.000000e+00> : vector<64x128xf32>
    %205 = tpu.matmul %202, %204, %cst_190 {dimension_numbers = #tpu.dot_dimension_numbers<[1], [0], [0], [1], [0, 0, 1, 1], [], []>} : vector<64x128xbf16>, vector<128x128xbf16>, vector<64x128xf32> -> vector<64x128xf32>
    %206 = arith.addf %199, %205 : vector<64x128xf32>
    %c2_191 = arith.constant 2 : index
    %c0_192 = arith.constant 0 : index
    %c0_193 = arith.constant 0 : index
    %207 = vector.load %arg15[%c2_191, %c0_192, %c0_193] : memref<10x10x128xf32, #tpu.memory_space<vmem>>, vector<8x8x128xf32>
    %208 = vector.shape_cast %207 : vector<8x8x128xf32> to vector<64x128xf32>
    %209 = arith.truncf %208 : vector<64x128xf32> to vector<64x128xbf16>
    %c6_194 = arith.constant 6 : index
    %c0_195 = arith.constant 0 : index
    %c0_196 = arith.constant 0 : index
    %210 = vector.load %arg8[%c6_194, %c0_195, %c0_196] : memref<9x128x128xbf16, #tpu.memory_space<vmem>>, vector<1x128x128xbf16>
    %211 = vector.shape_cast %210 : vector<1x128x128xbf16> to vector<128x128xbf16>
    %cst_197 = arith.constant dense<0.000000e+00> : vector<64x128xf32>
    %212 = tpu.matmul %209, %211, %cst_197 {dimension_numbers = #tpu.dot_dimension_numbers<[1], [0], [0], [1], [0, 0, 1, 1], [], []>} : vector<64x128xbf16>, vector<128x128xbf16>, vector<64x128xf32> -> vector<64x128xf32>
    %213 = arith.addf %206, %212 : vector<64x128xf32>
    %c2_198 = arith.constant 2 : index
    %c1_199 = arith.constant 1 : index
    %c0_200 = arith.constant 0 : index
    %214 = vector.load %arg15[%c2_198, %c1_199, %c0_200] : memref<10x10x128xf32, #tpu.memory_space<vmem>>, vector<8x8x128xf32>
    %215 = vector.shape_cast %214 : vector<8x8x128xf32> to vector<64x128xf32>
    %216 = arith.truncf %215 : vector<64x128xf32> to vector<64x128xbf16>
    %c7_201 = arith.constant 7 : index
    %c0_202 = arith.constant 0 : index
    %c0_203 = arith.constant 0 : index
    %217 = vector.load %arg8[%c7_201, %c0_202, %c0_203] : memref<9x128x128xbf16, #tpu.memory_space<vmem>>, vector<1x128x128xbf16>
    %218 = vector.shape_cast %217 : vector<1x128x128xbf16> to vector<128x128xbf16>
    %cst_204 = arith.constant dense<0.000000e+00> : vector<64x128xf32>
    %219 = tpu.matmul %216, %218, %cst_204 {dimension_numbers = #tpu.dot_dimension_numbers<[1], [0], [0], [1], [0, 0, 1, 1], [], []>} : vector<64x128xbf16>, vector<128x128xbf16>, vector<64x128xf32> -> vector<64x128xf32>
    %220 = arith.addf %213, %219 : vector<64x128xf32>
    %c2_205 = arith.constant 2 : index
    %c2_206 = arith.constant 2 : index
    %c0_207 = arith.constant 0 : index
    %221 = vector.load %arg15[%c2_205, %c2_206, %c0_207] : memref<10x10x128xf32, #tpu.memory_space<vmem>>, vector<8x8x128xf32>
    %222 = vector.shape_cast %221 : vector<8x8x128xf32> to vector<64x128xf32>
    %223 = arith.truncf %222 : vector<64x128xf32> to vector<64x128xbf16>
    %c8_208 = arith.constant 8 : index
    %c0_209 = arith.constant 0 : index
    %c0_210 = arith.constant 0 : index
    %224 = vector.load %arg8[%c8_208, %c0_209, %c0_210] : memref<9x128x128xbf16, #tpu.memory_space<vmem>>, vector<1x128x128xbf16>
    %225 = vector.shape_cast %224 : vector<1x128x128xbf16> to vector<128x128xbf16>
    %cst_211 = arith.constant dense<0.000000e+00> : vector<64x128xf32>
    %226 = tpu.matmul %223, %225, %cst_211 {dimension_numbers = #tpu.dot_dimension_numbers<[1], [0], [0], [1], [0, 0, 1, 1], [], []>} : vector<64x128xbf16>, vector<128x128xbf16>, vector<64x128xf32> -> vector<64x128xf32>
    %227 = arith.addf %220, %226 : vector<64x128xf32>
    %c0_212 = arith.constant 0 : index
    %c0_213 = arith.constant 0 : index
    %228 = vector.load %arg9[%c0_212, %c0_213] : memref<1x128xf32, #tpu.memory_space<vmem>>, vector<1x128xf32>
    %229 = vector.broadcast %228 : vector<1x128xf32> to vector<64x128xf32>
    %230 = arith.mulf %227, %229 : vector<64x128xf32>
    %c0_214 = arith.constant 0 : index
    %c0_215 = arith.constant 0 : index
    %231 = vector.load %arg10[%c0_214, %c0_215] : memref<1x128xf32, #tpu.memory_space<vmem>>, vector<1x128xf32>
    %232 = vector.broadcast %231 : vector<1x128xf32> to vector<64x128xf32>
    %233 = arith.addf %230, %232 : vector<64x128xf32>
    %cst_216 = arith.constant 0.000000e+00 : f32
    %234 = vector.broadcast %cst_216 : f32 to vector<64x128xf32>
    %235 = arith.maximumf %233, %234 : vector<64x128xf32>
    %236 = vector.shape_cast %235 : vector<64x128xf32> to vector<8x8x128xf32>
    %c1_217 = arith.constant 1 : index
    %c1_218 = arith.constant 1 : index
    %c0_219 = arith.constant 0 : index
    %237 = vector.load %arg16[%c1_217, %c1_218, %c0_219] : memref<10x10x128xf32, #tpu.memory_space<vmem>>, vector<8x8x128xf32>
    tpu.vector_store %arg16[%c1_217, %c1_218, %c0_219], %236 {strides = array<i32>} : memref<10x10x128xf32, #tpu.memory_space<vmem>>, vector<8x8x128xf32>,
    %cst_220 = arith.constant 0.000000e+00 : f32
    %238 = vector.broadcast %cst_220 : f32 to vector<64x128xf32>
    %c0_221 = arith.constant 0 : index
    %c0_222 = arith.constant 0 : index
    %c0_223 = arith.constant 0 : index
    %239 = vector.load %arg16[%c0_221, %c0_222, %c0_223] : memref<10x10x128xf32, #tpu.memory_space<vmem>>, vector<8x8x128xf32>
    %240 = vector.shape_cast %239 : vector<8x8x128xf32> to vector<64x128xf32>
    %241 = arith.truncf %240 : vector<64x128xf32> to vector<64x128xbf16>
    %c0_224 = arith.constant 0 : index
    %c0_225 = arith.constant 0 : index
    %c0_226 = arith.constant 0 : index
    %242 = vector.load %arg11[%c0_224, %c0_225, %c0_226] : memref<9x128x128xbf16, #tpu.memory_space<vmem>>, vector<1x128x128xbf16>
    %243 = vector.shape_cast %242 : vector<1x128x128xbf16> to vector<128x128xbf16>
    %cst_227 = arith.constant dense<0.000000e+00> : vector<64x128xf32>
    %244 = tpu.matmul %241, %243, %cst_227 {dimension_numbers = #tpu.dot_dimension_numbers<[1], [0], [0], [1], [0, 0, 1, 1], [], []>} : vector<64x128xbf16>, vector<128x128xbf16>, vector<64x128xf32> -> vector<64x128xf32>
    %245 = arith.addf %238, %244 : vector<64x128xf32>
    %c0_228 = arith.constant 0 : index
    %c1_229 = arith.constant 1 : index
    %c0_230 = arith.constant 0 : index
    %246 = vector.load %arg16[%c0_228, %c1_229, %c0_230] : memref<10x10x128xf32, #tpu.memory_space<vmem>>, vector<8x8x128xf32>
    %247 = vector.shape_cast %246 : vector<8x8x128xf32> to vector<64x128xf32>
    %248 = arith.truncf %247 : vector<64x128xf32> to vector<64x128xbf16>
    %c1_231 = arith.constant 1 : index
    %c0_232 = arith.constant 0 : index
    %c0_233 = arith.constant 0 : index
    %249 = vector.load %arg11[%c1_231, %c0_232, %c0_233] : memref<9x128x128xbf16, #tpu.memory_space<vmem>>, vector<1x128x128xbf16>
    %250 = vector.shape_cast %249 : vector<1x128x128xbf16> to vector<128x128xbf16>
    %cst_234 = arith.constant dense<0.000000e+00> : vector<64x128xf32>
    %251 = tpu.matmul %248, %250, %cst_234 {dimension_numbers = #tpu.dot_dimension_numbers<[1], [0], [0], [1], [0, 0, 1, 1], [], []>} : vector<64x128xbf16>, vector<128x128xbf16>, vector<64x128xf32> -> vector<64x128xf32>
    %252 = arith.addf %245, %251 : vector<64x128xf32>
    %c0_235 = arith.constant 0 : index
    %c2_236 = arith.constant 2 : index
    %c0_237 = arith.constant 0 : index
    %253 = vector.load %arg16[%c0_235, %c2_236, %c0_237] : memref<10x10x128xf32, #tpu.memory_space<vmem>>, vector<8x8x128xf32>
    %254 = vector.shape_cast %253 : vector<8x8x128xf32> to vector<64x128xf32>
    %255 = arith.truncf %254 : vector<64x128xf32> to vector<64x128xbf16>
    %c2_238 = arith.constant 2 : index
    %c0_239 = arith.constant 0 : index
    %c0_240 = arith.constant 0 : index
    %256 = vector.load %arg11[%c2_238, %c0_239, %c0_240] : memref<9x128x128xbf16, #tpu.memory_space<vmem>>, vector<1x128x128xbf16>
    %257 = vector.shape_cast %256 : vector<1x128x128xbf16> to vector<128x128xbf16>
    %cst_241 = arith.constant dense<0.000000e+00> : vector<64x128xf32>
    %258 = tpu.matmul %255, %257, %cst_241 {dimension_numbers = #tpu.dot_dimension_numbers<[1], [0], [0], [1], [0, 0, 1, 1], [], []>} : vector<64x128xbf16>, vector<128x128xbf16>, vector<64x128xf32> -> vector<64x128xf32>
    %259 = arith.addf %252, %258 : vector<64x128xf32>
    %c1_242 = arith.constant 1 : index
    %c0_243 = arith.constant 0 : index
    %c0_244 = arith.constant 0 : index
    %260 = vector.load %arg16[%c1_242, %c0_243, %c0_244] : memref<10x10x128xf32, #tpu.memory_space<vmem>>, vector<8x8x128xf32>
    %261 = vector.shape_cast %260 : vector<8x8x128xf32> to vector<64x128xf32>
    %262 = arith.truncf %261 : vector<64x128xf32> to vector<64x128xbf16>
    %c3_245 = arith.constant 3 : index
    %c0_246 = arith.constant 0 : index
    %c0_247 = arith.constant 0 : index
    %263 = vector.load %arg11[%c3_245, %c0_246, %c0_247] : memref<9x128x128xbf16, #tpu.memory_space<vmem>>, vector<1x128x128xbf16>
    %264 = vector.shape_cast %263 : vector<1x128x128xbf16> to vector<128x128xbf16>
    %cst_248 = arith.constant dense<0.000000e+00> : vector<64x128xf32>
    %265 = tpu.matmul %262, %264, %cst_248 {dimension_numbers = #tpu.dot_dimension_numbers<[1], [0], [0], [1], [0, 0, 1, 1], [], []>} : vector<64x128xbf16>, vector<128x128xbf16>, vector<64x128xf32> -> vector<64x128xf32>
    %266 = arith.addf %259, %265 : vector<64x128xf32>
    %c1_249 = arith.constant 1 : index
    %c1_250 = arith.constant 1 : index
    %c0_251 = arith.constant 0 : index
    %267 = vector.load %arg16[%c1_249, %c1_250, %c0_251] : memref<10x10x128xf32, #tpu.memory_space<vmem>>, vector<8x8x128xf32>
    %268 = vector.shape_cast %267 : vector<8x8x128xf32> to vector<64x128xf32>
    %269 = arith.truncf %268 : vector<64x128xf32> to vector<64x128xbf16>
    %c4_252 = arith.constant 4 : index
    %c0_253 = arith.constant 0 : index
    %c0_254 = arith.constant 0 : index
    %270 = vector.load %arg11[%c4_252, %c0_253, %c0_254] : memref<9x128x128xbf16, #tpu.memory_space<vmem>>, vector<1x128x128xbf16>
    %271 = vector.shape_cast %270 : vector<1x128x128xbf16> to vector<128x128xbf16>
    %cst_255 = arith.constant dense<0.000000e+00> : vector<64x128xf32>
    %272 = tpu.matmul %269, %271, %cst_255 {dimension_numbers = #tpu.dot_dimension_numbers<[1], [0], [0], [1], [0, 0, 1, 1], [], []>} : vector<64x128xbf16>, vector<128x128xbf16>, vector<64x128xf32> -> vector<64x128xf32>
    %273 = arith.addf %266, %272 : vector<64x128xf32>
    %c1_256 = arith.constant 1 : index
    %c2_257 = arith.constant 2 : index
    %c0_258 = arith.constant 0 : index
    %274 = vector.load %arg16[%c1_256, %c2_257, %c0_258] : memref<10x10x128xf32, #tpu.memory_space<vmem>>, vector<8x8x128xf32>
    %275 = vector.shape_cast %274 : vector<8x8x128xf32> to vector<64x128xf32>
    %276 = arith.truncf %275 : vector<64x128xf32> to vector<64x128xbf16>
    %c5_259 = arith.constant 5 : index
    %c0_260 = arith.constant 0 : index
    %c0_261 = arith.constant 0 : index
    %277 = vector.load %arg11[%c5_259, %c0_260, %c0_261] : memref<9x128x128xbf16, #tpu.memory_space<vmem>>, vector<1x128x128xbf16>
    %278 = vector.shape_cast %277 : vector<1x128x128xbf16> to vector<128x128xbf16>
    %cst_262 = arith.constant dense<0.000000e+00> : vector<64x128xf32>
    %279 = tpu.matmul %276, %278, %cst_262 {dimension_numbers = #tpu.dot_dimension_numbers<[1], [0], [0], [1], [0, 0, 1, 1], [], []>} : vector<64x128xbf16>, vector<128x128xbf16>, vector<64x128xf32> -> vector<64x128xf32>
    %280 = arith.addf %273, %279 : vector<64x128xf32>
    %c2_263 = arith.constant 2 : index
    %c0_264 = arith.constant 0 : index
    %c0_265 = arith.constant 0 : index
    %281 = vector.load %arg16[%c2_263, %c0_264, %c0_265] : memref<10x10x128xf32, #tpu.memory_space<vmem>>, vector<8x8x128xf32>
    %282 = vector.shape_cast %281 : vector<8x8x128xf32> to vector<64x128xf32>
    %283 = arith.truncf %282 : vector<64x128xf32> to vector<64x128xbf16>
    %c6_266 = arith.constant 6 : index
    %c0_267 = arith.constant 0 : index
    %c0_268 = arith.constant 0 : index
    %284 = vector.load %arg11[%c6_266, %c0_267, %c0_268] : memref<9x128x128xbf16, #tpu.memory_space<vmem>>, vector<1x128x128xbf16>
    %285 = vector.shape_cast %284 : vector<1x128x128xbf16> to vector<128x128xbf16>
    %cst_269 = arith.constant dense<0.000000e+00> : vector<64x128xf32>
    %286 = tpu.matmul %283, %285, %cst_269 {dimension_numbers = #tpu.dot_dimension_numbers<[1], [0], [0], [1], [0, 0, 1, 1], [], []>} : vector<64x128xbf16>, vector<128x128xbf16>, vector<64x128xf32> -> vector<64x128xf32>
    %287 = arith.addf %280, %286 : vector<64x128xf32>
    %c2_270 = arith.constant 2 : index
    %c1_271 = arith.constant 1 : index
    %c0_272 = arith.constant 0 : index
    %288 = vector.load %arg16[%c2_270, %c1_271, %c0_272] : memref<10x10x128xf32, #tpu.memory_space<vmem>>, vector<8x8x128xf32>
    %289 = vector.shape_cast %288 : vector<8x8x128xf32> to vector<64x128xf32>
    %290 = arith.truncf %289 : vector<64x128xf32> to vector<64x128xbf16>
    %c7_273 = arith.constant 7 : index
    %c0_274 = arith.constant 0 : index
    %c0_275 = arith.constant 0 : index
    %291 = vector.load %arg11[%c7_273, %c0_274, %c0_275] : memref<9x128x128xbf16, #tpu.memory_space<vmem>>, vector<1x128x128xbf16>
    %292 = vector.shape_cast %291 : vector<1x128x128xbf16> to vector<128x128xbf16>
    %cst_276 = arith.constant dense<0.000000e+00> : vector<64x128xf32>
    %293 = tpu.matmul %290, %292, %cst_276 {dimension_numbers = #tpu.dot_dimension_numbers<[1], [0], [0], [1], [0, 0, 1, 1], [], []>} : vector<64x128xbf16>, vector<128x128xbf16>, vector<64x128xf32> -> vector<64x128xf32>
    %294 = arith.addf %287, %293 : vector<64x128xf32>
    %c2_277 = arith.constant 2 : index
    %c2_278 = arith.constant 2 : index
    %c0_279 = arith.constant 0 : index
    %295 = vector.load %arg16[%c2_277, %c2_278, %c0_279] : memref<10x10x128xf32, #tpu.memory_space<vmem>>, vector<8x8x128xf32>
    %296 = vector.shape_cast %295 : vector<8x8x128xf32> to vector<64x128xf32>
    %297 = arith.truncf %296 : vector<64x128xf32> to vector<64x128xbf16>
    %c8_280 = arith.constant 8 : index
    %c0_281 = arith.constant 0 : index
    %c0_282 = arith.constant 0 : index
    %298 = vector.load %arg11[%c8_280, %c0_281, %c0_282] : memref<9x128x128xbf16, #tpu.memory_space<vmem>>, vector<1x128x128xbf16>
    %299 = vector.shape_cast %298 : vector<1x128x128xbf16> to vector<128x128xbf16>
    %cst_283 = arith.constant dense<0.000000e+00> : vector<64x128xf32>
    %300 = tpu.matmul %297, %299, %cst_283 {dimension_numbers = #tpu.dot_dimension_numbers<[1], [0], [0], [1], [0, 0, 1, 1], [], []>} : vector<64x128xbf16>, vector<128x128xbf16>, vector<64x128xf32> -> vector<64x128xf32>
    %301 = arith.addf %294, %300 : vector<64x128xf32>
    %c0_284 = arith.constant 0 : index
    %c0_285 = arith.constant 0 : index
    %302 = vector.load %arg12[%c0_284, %c0_285] : memref<1x128xf32, #tpu.memory_space<vmem>>, vector<1x128xf32>
    %303 = vector.broadcast %302 : vector<1x128xf32> to vector<64x128xf32>
    %304 = arith.mulf %301, %303 : vector<64x128xf32>
    %c0_286 = arith.constant 0 : index
    %c0_287 = arith.constant 0 : index
    %305 = vector.load %arg13[%c0_286, %c0_287] : memref<1x128xf32, #tpu.memory_space<vmem>>, vector<1x128xf32>
    %306 = vector.broadcast %305 : vector<1x128xf32> to vector<64x128xf32>
    %307 = arith.addf %304, %306 : vector<64x128xf32>
    %308 = arith.addf %307, %161 : vector<64x128xf32>
    %cst_288 = arith.constant 0.000000e+00 : f32
    %309 = vector.broadcast %cst_288 : f32 to vector<64x128xf32>
    %310 = arith.maximumf %308, %309 : vector<64x128xf32>
    %311 = vector.shape_cast %310 : vector<64x128xf32> to vector<1x8x8x128xf32>
    %c0_289 = arith.constant 0 : index
    %c0_290 = arith.constant 0 : index
    %c0_291 = arith.constant 0 : index
    %c0_292 = arith.constant 0 : index
    %312 = vector.load %arg14[%c0_289, %c0_290, %c0_291, %c0_292] : memref<1x8x8x128xf32, #tpu.memory_space<vmem>>, vector<1x8x8x128xf32>
    tpu.vector_store %arg14[%c0_289, %c0_290, %c0_291, %c0_292], %311 {strides = array<i32>} : memref<1x8x8x128xf32, #tpu.memory_space<vmem>>, vector<1x8x8x128xf32>,
    return
  }
  func.func @transform_0(%arg0: i32) -> (i32, i32, i32, i32) {
    %c0_i32 = arith.constant 0 : i32
    %c0_i32_0 = arith.constant 0 : i32
    %c0_i32_1 = arith.constant 0 : i32
    %c0_i32_2 = arith.constant 0 : i32
    return %arg0, %c0_i32, %c0_i32_0, %c0_i32_1 : i32, i32, i32, i32
  }
  func.func @transform_1(%arg0: i32) -> (i32, i32, i32) {
    %c0_i32 = arith.constant 0 : i32
    %c0_i32_0 = arith.constant 0 : i32
    %c0_i32_1 = arith.constant 0 : i32
    %c0_i32_2 = arith.constant 0 : i32
    return %c0_i32, %c0_i32_0, %c0_i32_1 : i32, i32, i32
  }
  func.func @transform_2(%arg0: i32) -> (i32, i32) {
    %c0_i32 = arith.constant 0 : i32
    %c0_i32_0 = arith.constant 0 : i32
    %c0_i32_1 = arith.constant 0 : i32
    return %c0_i32, %c0_i32_0 : i32, i32
  }
  func.func @transform_3(%arg0: i32) -> (i32, i32) {
    %c0_i32 = arith.constant 0 : i32
    %c0_i32_0 = arith.constant 0 : i32
    %c0_i32_1 = arith.constant 0 : i32
    return %c0_i32, %c0_i32_0 : i32, i32
  }
  func.func @transform_4(%arg0: i32) -> (i32, i32, i32) {
    %c0_i32 = arith.constant 0 : i32
    %c0_i32_0 = arith.constant 0 : i32
    %c0_i32_1 = arith.constant 0 : i32
    %c0_i32_2 = arith.constant 0 : i32
    return %c0_i32, %c0_i32_0, %c0_i32_1 : i32, i32, i32
  }
  func.func @transform_5(%arg0: i32) -> (i32, i32) {
    %c0_i32 = arith.constant 0 : i32
    %c0_i32_0 = arith.constant 0 : i32
    %c0_i32_1 = arith.constant 0 : i32
    return %c0_i32, %c0_i32_0 : i32, i32
  }
  func.func @transform_6(%arg0: i32) -> (i32, i32) {
    %c0_i32 = arith.constant 0 : i32
    %c0_i32_0 = arith.constant 0 : i32
    %c0_i32_1 = arith.constant 0 : i32
    return %c0_i32, %c0_i32_0 : i32, i32
  }
  func.func @transform_7(%arg0: i32) -> (i32, i32, i32) {
    %c0_i32 = arith.constant 0 : i32
    %c0_i32_0 = arith.constant 0 : i32
    %c0_i32_1 = arith.constant 0 : i32
    %c0_i32_2 = arith.constant 0 : i32
    return %c0_i32, %c0_i32_0, %c0_i32_1 : i32, i32, i32
  }
  func.func @transform_8(%arg0: i32) -> (i32, i32) {
    %c0_i32 = arith.constant 0 : i32
    %c0_i32_0 = arith.constant 0 : i32
    %c0_i32_1 = arith.constant 0 : i32
    return %c0_i32, %c0_i32_0 : i32, i32
  }
  func.func @transform_9(%arg0: i32) -> (i32, i32) {
    %c0_i32 = arith.constant 0 : i32
    %c0_i32_0 = arith.constant 0 : i32
    %c0_i32_1 = arith.constant 0 : i32
    return %c0_i32, %c0_i32_0 : i32, i32
  }
  func.func @transform_10(%arg0: i32) -> (i32, i32, i32) {
    %c0_i32 = arith.constant 0 : i32
    %c0_i32_0 = arith.constant 0 : i32
    %c0_i32_1 = arith.constant 0 : i32
    %c0_i32_2 = arith.constant 0 : i32
    return %c0_i32, %c0_i32_0, %c0_i32_1 : i32, i32, i32
  }
  func.func @transform_11(%arg0: i32) -> (i32, i32) {
    %c0_i32 = arith.constant 0 : i32
    %c0_i32_0 = arith.constant 0 : i32
    %c0_i32_1 = arith.constant 0 : i32
    return %c0_i32, %c0_i32_0 : i32, i32
  }
  func.func @transform_12(%arg0: i32) -> (i32, i32) {
    %c0_i32 = arith.constant 0 : i32
    %c0_i32_0 = arith.constant 0 : i32
    %c0_i32_1 = arith.constant 0 : i32
    return %c0_i32, %c0_i32_0 : i32, i32
  }
  func.func @transform_13(%arg0: i32) -> (i32, i32, i32, i32) {
    %c0_i32 = arith.constant 0 : i32
    %c0_i32_0 = arith.constant 0 : i32
    %c0_i32_1 = arith.constant 0 : i32
    %c0_i32_2 = arith.constant 0 : i32
    return %arg0, %c0_i32, %c0_i32_0, %c0_i32_1 : i32, i32, i32, i32
  }
}

</mosaic_0001>

<bundles_post_ra>
// kernel: blocks_forward.1
= control target key start
LH: loop header
LB: loop body
LE: loop exit
PB: predicated region body
PF: predicated region fallthrough
CT: control target
= control target key end

     0   :  { %18 = vsyncpa [#allocation5], 0  ;;  %s11785_s0 = inlined_call_operand.vmem [shape: f32[2,9,9,512], index: 0, kind: input, shape index: {}]   ;;  %s11786_s1 = inlined_call_operand.vmem [shape: bf16[9,128,256], index: 1, kind: input, shape index: {}]   ;;  %s11787_s2 = inlined_call_operand.vmem [shape: f32[1,256], index: 2, kind: input, shape index: {}]   ;;  %s11788_s3 = inlined_call_operand.vmem [shape: f32[1,256], index: 3, kind: input, shape index: {}]   ;;  %s11789_s4 = inlined_call_operand.vmem [shape: bf16[9,128,128], index: 4, kind: input, shape index: {}]   ;;  %s11790_s5 = inlined_call_operand.vmem [shape: f32[1,128], index: 5, kind: input, shape index: {}]   ;;  %s11791_s6 = inlined_call_operand.vmem [shape: f32[1,128], index: 6, kind: input, shape index: {}]   ;;  %s11792_s7 = inlined_call_operand.vmem [shape: bf16[9,128,128], index: 7, kind: input, shape index: {}]   ;;  %s11793_s8 = inlined_call_operand.vmem [shape: f32[1,128], index: 8, kind: input, shape index: {}]   ;;  %s11794_s9 = inlined_call_operand.vmem [shape: f32[1,128], index: 9, kind: input, shape index: {}]   ;;  %s11795_s10 = inlined_call_operand.vmem [shape: bf16[9,128,128], index: 10, kind: input, shape index: {}]   ;;  %s11796_s11 = inlined_call_operand.vmem [shape: f32[1,128], index: 11, kind: input, shape index: {}]   ;;  %s11797_s12 = inlined_call_operand.vmem [shape: f32[1,128], index: 12, kind: input, shape index: {}]   ;;  %s11798_s13 = inlined_call_operand.hbm [shape: f32[2,8,8,128], index: 13, kind: output, shape index: {}]  }
   0x1   :  { %20 = vsyncpa [#allocation5 + $0x1], 0  ;;  %s9223_s25 = smov 0   ;;  %s9225_s26 = smov 0  }
   0x2   :  { %s9227_s27 = smov 0   ;;  %s9229_s28 = smov 0  }
   0x3 LB: > { %11813 = sst [smem:[#allocation7_spill]] %s9142_s27  ;;  %s9244_s29 = sadd.s32 4294967295, %s9146_s28   ;;  %s9146_s28 = sphi %s9229_s28, %s11949_s28   ;;  %s9142_s27 = sphi %s9227_s27, %s11951_s27   ;;  %s9138_s26 = sphi %s9225_s26, %s11953_s26   ;;  %s9134_s25 = sphi %s9223_s25, %s11952_s25  }
   0x4   : > { %s6704_s30 = sadd.s32 4294967294, %s9146_s28   ;;  %s9248_s14 = sadd.s32 1, %s9146_s28  }
   0x5   : > { %11814 = sst [smem:[#allocation8_spill]] %s9248_s14  ;;  %s311_s15 = sadd.s32 1, %s9142_s27 }
   0x6   : > { %s308_s16 = ssub.s32 %s9146_s28, %s9248_s14  ;;  %p321_p0 = scmp.ne.s32.totalorder %s9142_s27, %s9138_s26 }
   0x7   : > { %p309_p1 = scmp.eq.s32.totalorder %s308_s16, 0  ;;  %p322_p2 = scmp.eq.s32.totalorder %s9244_s29, 1 }
   0x8   : > { %p327_p3 = scmp.ne.s32.totalorder %s9138_s26, %s9134_s25  ;;  %p328_p4 = scmp.eq.s32.totalorder %s6704_s30, 1 }
   0x9   : > { %s9259_s17 = scalar_select %p309_p1, %s9142_s27, %s311_s15  }
   0xa   : > { %p9261_p5 = por %p322_p2, %p321_p0  ;;  %p9265_p6 = por %p328_p4, %p327_p3 }
   0xb   : > { %11815 = sst [smem:[#allocation9_spill]] %s9259_s17  ;;  %p6707_p7 = scmp.ge.s32.totalorder %s9146_s28, 1 }
   0xc   : > { %s11817_s19 = scalar_select %p9265_p6, 1, 0 }
   0xd   : > { %p390_p8 = scmp.lt.s32.totalorder %s9146_s28, 3 }
   0xe   : > { %11818 = sst [smem:[#allocation10_spill]] %s11817_s19 }
   0xf   : > { %p391_p9 = pnand %p6707_p7, %p390_p8 }
  0x11   : > { %394 = sbr.rel (%p391_p9) target bundleno = 1437 (0x59d), region = 72 }
  0x16   : > { %v8642_v0 = vld [vmem:[%s11786_s1 + $0xf4] ss:$8 sps:$4 sm:$0xff]   ;;  %v9148_v2 = vmov 0   ;;  %v8646_v3 = vld [vmem:[%s11786_s1 + $0xf0] ss:$8 sps:$4 sm:$0xff]   ;;  %p434_p10 = scmp.lt.s32.totalorder %s9244_s29, 1 }
  0x17   : > { %v8644_v1 = vld [vmem:[%s11786_s1 + $0x74] ss:$8 sps:$4 sm:$0xff]   ;;  %649 = vmatprep.mubr.bf16.mxu0 %v9148_v2  ;;  %802 = vmatprep.mubr.bf16.mxu1 %v9148_v2  ;;  %v8647_v4 = vld [vmem:[%s11786_s1 + $0x70] ss:$8 sps:$4 sm:$0xff]   ;;  %v8648_v5 = vld [vmem:[%s11786_s1 + $0xe4] ss:$8 sps:$4 sm:$0xff]  }
  0x18   : > { %617 = vmatprep.subr.bf16.mxu0 %v8642_v0  ;;  %770 = vmatprep.subr.bf16.mxu1 %v8644_v1  ;;  %v8650_v6 = vld [vmem:[%s11786_s1 + $0x64] ss:$8 sps:$4 sm:$0xff]   ;;  %v8652_v7 = vld [vmem:[%s11786_s1 + $0xe0] ss:$8 sps:$4 sm:$0xff]   ;;  %v8654_v9 = vld [vmem:[%s11786_s1 + $0xd4] ss:$8 sps:$4 sm:$0xff]  }
  0x19   : > { %618 = vmatpush1.bf16.msra.mxu0 %v8646_v3  ;;  %771 = vmatpush1.bf16.msra.mxu1 %v8647_v4  ;;  %v8653_v8 = vld [vmem:[%s11786_s1 + $0x60] ss:$8 sps:$4 sm:$0xff]   ;;  %v8656_v10 = vld [vmem:[%s11786_s1 + $0x54] ss:$8 sps:$4 sm:$0xff]   ;;  %v8658_v11 = vld [vmem:[%s11786_s1 + $0xd0] ss:$8 sps:$4 sm:$0xff]  }
  0x1a   : > { %619 = vmatprep.subr.bf16.mxu0 %v8648_v5  ;;  %772 = vmatprep.subr.bf16.mxu1 %v8650_v6  ;;  %v8659_v12 = vld [vmem:[%s11786_s1 + $0x50] ss:$8 sps:$4 sm:$0xff]   ;;  %v8660_v13 = vld [vmem:[%s11786_s1 + $0xc4] ss:$8 sps:$4 sm:$0xff]   ;;  %v8664_v15 = vld [vmem:[%s11786_s1 + $0xc0] ss:$8 sps:$4 sm:$0xff]  }
  0x1b   : > { %v8662_v14 = vld [vmem:[%s11786_s1 + $0x44] ss:$8 sps:$4 sm:$0xff]   ;;  %v8665_v16 = vld [vmem:[%s11786_s1 + $0x40] ss:$8 sps:$4 sm:$0xff]   ;;  %v8666_v17 = vld [vmem:[%s11786_s1 + $0xb4] ss:$8 sps:$4 sm:$0xff]  }
  0x1c   : > { %v8668_v18 = vld [vmem:[%s11786_s1 + $0x34] ss:$8 sps:$4 sm:$0xff]   ;;  %v8670_v19 = vld [vmem:[%s11786_s1 + $0xb0] ss:$8 sps:$4 sm:$0xff]   ;;  %s435_s22 = scalar_select %p434_p10, %s9244_s29, 1  ;;  %vm875_vm0 = vcmask 1046528  }
  0x1d   : > { %620 = vmatpush1.bf16.msra.mxu0 %v8652_v7  ;;  %773 = vmatpush1.bf16.msra.mxu1 %v8653_v8  ;;  %v8671_v20 = vld [vmem:[%s11786_s1 + $0x30] ss:$8 sps:$4 sm:$0xff]   ;;  %v8672_v21 = vld [vmem:[%s11786_s1 + $0xa4] ss:$8 sps:$4 sm:$0xff]   ;;  %v8676_v23 = vld [vmem:[%s11786_s1 + $0xa0] ss:$8 sps:$4 sm:$0xff]  }
  0x1e   : > { %621 = vmatprep.subr.bf16.mxu0 %v8654_v9  ;;  %774 = vmatprep.subr.bf16.mxu1 %v8656_v10  ;;  %v8674_v22 = vld [vmem:[%s11786_s1 + $0x24] ss:$8 sps:$4 sm:$0xff]   ;;  %s8598_s30 = smul.u32 576, %s435_s22  ;;  %v8677_v24 = vld [vmem:[%s11786_s1 + $0x20] ss:$8 sps:$4 sm:$0xff]   ;;  %s431_s27 = sand.u32 1, %s9138_s26  }
  0x1f   : > { %v8678_v25 = vld [vmem:[%s11786_s1 + $0x94] ss:$8 sps:$4 sm:$0xff]   ;;  %v8682_v27 = vld [vmem:[%s11786_s1 + $0x90] ss:$8 sps:$4 sm:$0xff]   ;;  %v8684_v29 = vld [vmem:[%s11786_s1 + $0x84] ss:$8 sps:$4 sm:$0xff]  }
  0x20   : > { %v8680_v26 = vld [vmem:[%s11786_s1 + $0x14] ss:$8 sps:$4 sm:$0xff]   ;;  %v8683_v28 = vld [vmem:[%s11786_s1 + $0x10] ss:$8 sps:$4 sm:$0xff]   ;;  %s9362_s19 = scalar_lea.vmem %s11785_s0, %s8598_s30  ;;  %v8686_v30 = vld [vmem:[%s11786_s1 + $0x4] ss:$8 sps:$4 sm:$0xff]  }
  0x21   : > { %622 = vmatpush1.bf16.msra.mxu0 %v8658_v11  ;;  %775 = vmatpush1.bf16.msra.mxu1 %v8659_v12  ;;  %v8688_v31 = vld [vmem:[%s11786_s1 + $0x80] ss:$8 sps:$4 sm:$0xff]   ;;  %v8692_v37 = vld [vmem:[%s11786_s1 + $0x174] ss:$8 sps:$4 sm:$0xff]   ;;  %v8690_v45 = vld [vmem:[%s11786_s1 + $0x170] ss:$8 sps:$4 sm:$0xff]  }
  0x22   : > { %623 = vmatprep.subr.bf16.mxu0 %v8660_v13  ;;  %776 = vmatprep.subr.bf16.mxu1 %v8662_v14  ;;  %v8689_v32 = vld [vmem:[%s11786_s1] ss:$8 sps:$4 sm:$0xff]   ;;  %v8695_v40 = vld [vmem:[%s11786_s1 + $0x1f4] ss:$8 sps:$4 sm:$0xff]   ;;  %v8693_v46 = vld [vmem:[%s11786_s1 + $0x1f0] ss:$8 sps:$4 sm:$0xff]  }
  0x23   : > { %v508_v33 = vld [vmem:[%s9362_s19 + $0x8] sm:$0xff]  ;;  %v480_v35 = vld [vmem:[%s9362_s19] sm:$0xff]  ;;  %v8704_v56 = vld [vmem:[%s11786_s1 + $0x154] ss:$8 sps:$4 sm:$0xff]   ;;  %s6708_s22 = sshll.u32 %s431_s27, 6  ;;  %s7625_s15 = sshll.u32 %s9244_s29, 10 }
  0x24   : > { %v9378_v34 = vld [vmem:[%s9362_s19 + $0x48] sm:$0xff]  ;;  %v9382_v36 = vld [vmem:[%s9362_s19 + $0x40] sm:$0xff]  ;;  %v8707_v58 = vld [vmem:[%s11786_s1 + $0x1d4] ss:$8 sps:$4 sm:$0xff]   ;;  %s11715_s24 = scalar_lea.vmem [#allocation4], %s6708_s22  ;;  %s11737_s14 = scalar_lea.hbm %s11798_s13, %s7625_s15 }
  0x25   : > { %624 = vmatpush1.bf16.msra.mxu0 %v8664_v15  ;;  %777 = vmatpush1.bf16.msra.mxu1 %v8665_v16  ;;  %v9388_v38 = vld [vmem:[%s9362_s19 + $0x88] sm:$0xff]  ;;  %v9391_v39 = vld [vmem:[%s9362_s19 + $0x80] sm:$0xff]  ;;  %v516_v43 = vpack.c.bf16 %v9378_v34, %v508_v33  ;;  %v488_v44 = vpack.c.bf16 %v9382_v36, %v480_v35  ;;  %v8702_v61 = vld [vmem:[%s11786_s1 + $0x150] ss:$8 sps:$4 sm:$0xff]   ;;  %s6642_s16 = sshll.u32 %s11715_s24, 4  ;;  %s11745_s29 = scalar_lea.sflag [#allocation5], %s431_s27  ;;  %s11739_s16 = int_to_ptr.vmem [resolvable:$true] %s6642_s16 }
  0x26   : > { %625 = vmatprep.subr.bf16.mxu0 %v8666_v17  ;;  %778 = vmatprep.subr.bf16.mxu1 %v8668_v18  ;;  %v1757_v41 = vpack.c.bf16 %v9391_v39, %v9382_v36  ;;  %v1955_v42 = vpack.c.bf16 %v9388_v38, %v9378_v34  ;;  %v8698_v47 = vld [vmem:[%s11786_s1 + $0x164] ss:$8 sps:$4 sm:$0xff]   ;;  %v8696_v49 = vld [vmem:[%s11786_s1 + $0x160] ss:$8 sps:$4 sm:$0xff]   ;;  %v8705_v62 = vld [vmem:[%s11786_s1 + $0x1d0] ss:$8 sps:$4 sm:$0xff]  }
  0x27   : > { %v8701_v48 = vld [vmem:[%s11786_s1 + $0x1e4] ss:$8 sps:$4 sm:$0xff]   ;;  %v8699_v52 = vld [vmem:[%s11786_s1 + $0x1e0] ss:$8 sps:$4 sm:$0xff]   ;;  %v8716_v10 = vld [vmem:[%s11786_s1 + $0x134] ss:$8 sps:$4 sm:$0xff]  }
  0x28   : > { %v9418_v50 = vld [vmem:[%s9362_s19 + $0xc8] sm:$0xff]  ;;  %v9427_v53 = vld [vmem:[%s9362_s19 + $0xc0] sm:$0xff]  ;;  %v8719_v11 = vld [vmem:[%s11786_s1 + $0x1b4] ss:$8 sps:$4 sm:$0xff]   ;;  %s9150_s23 = smov [#allocation4]  }
  0x29   : > { %626 = vmatpush1.bf16.msra.mxu0 %v8670_v19  ;;  %779 = vmatpush1.bf16.msra.mxu1 %v8671_v20  ;;  %v9421_v51 = vld [vmem:[%s9362_s19 + $0x108] sm:$0xff]  ;;  %v9430_v54 = vld [vmem:[%s9362_s19 + $0x100] sm:$0xff]  ;;  %v517_v59 = vpack.c.bf16 %v9418_v50, %v9388_v38  ;;  %v489_v60 = vpack.c.bf16 %v9427_v53, %v9391_v39  ;;  %v8714_v14 = vld [vmem:[%s11786_s1 + $0x130] ss:$8 sps:$4 sm:$0xff]   ;;  %s9090_s17 = sshll.u32 %s9150_s23, 4  ;;  %s9091_s17 = int_to_ptr.vmem [resolvable:$false] %s9090_s17 }
  0x2a   : > { %627 = vmatprep.subr.bf16.mxu0 %v8672_v21  ;;  %780 = vmatprep.subr.bf16.mxu1 %v8674_v22  ;;  %v1956_v55 = vpack.c.bf16 %v9421_v51, %v9418_v50  ;;  %v1758_v57 = vpack.c.bf16 %v9430_v54, %v9427_v53  ;;  %v8710_v63 = vld [vmem:[%s11786_s1 + $0x144] ss:$8 sps:$4 sm:$0xff]   ;;  %v8708_v7 = vld [vmem:[%s11786_s1 + $0x140] ss:$8 sps:$4 sm:$0xff]   ;;  %v8717_v15 = vld [vmem:[%s11786_s1 + $0x1b0] ss:$8 sps:$4 sm:$0xff]   ;;  %p9093_p0 = scmp.lt.s32.totalorder %s11739_s16, %s9091_s17 }
  0x2b   : > { %v8713_v0 = vld [vmem:[%s11786_s1 + $0x1c4] ss:$8 sps:$4 sm:$0xff]   ;;  %v8711_v8 = vld [vmem:[%s11786_s1 + $0x1c0] ss:$8 sps:$4 sm:$0xff]   ;;  %v8728_v22 = vld [vmem:[%s11786_s1 + $0x114] ss:$8 sps:$4 sm:$0xff]  }
  0x2c   : > { %v9461_v1 = vld [vmem:[%s9362_s19 + $0x148] sm:$0xff]  ;;  %v9467_v4 = vld [vmem:[%s9362_s19 + $0x140] sm:$0xff]  ;;  %v8848_v38 = vld [vmem:[%s11786_s1 + $0x434] ss:$8 sps:$4 sm:$0xff]   ;;  %s9092_s30 = scalar_lea.vmem %s9091_s17, 2048 }
  0x2d   : > { %628 = vmatpush1.bf16.msra.mxu0 %v8676_v23  ;;  %781 = vmatpush1.bf16.msra.mxu1 %v8677_v24  ;;  %v9464_v3 = vld [vmem:[%s9362_s19 + $0x188] sm:$0xff]  ;;  %v9470_v5 = vld [vmem:[%s9362_s19 + $0x180] sm:$0xff]  ;;  %v518_v12 = vpack.c.bf16 %v9461_v1, %v9421_v51  ;;  %v490_v13 = vpack.c.bf16 %v9467_v4, %v9430_v54  ;;  %v8731_v23 = vld [vmem:[%s11786_s1 + $0x194] ss:$8 sps:$4 sm:$0xff]  }
  0x2e   : > { %629 = vmatprep.subr.bf16.mxu0 %v8678_v25  ;;  %782 = vmatprep.subr.bf16.mxu1 %v8680_v26  ;;  %v1957_v6 = vpack.c.bf16 %v9464_v3, %v9461_v1  ;;  %v1759_v9 = vpack.c.bf16 %v9470_v5, %v9467_v4  ;;  %v8722_v16 = vld [vmem:[%s11786_s1 + $0x124] ss:$8 sps:$4 sm:$0xff]   ;;  %v8720_v18 = vld [vmem:[%s11786_s1 + $0x120] ss:$8 sps:$4 sm:$0xff]   ;;  %v8846_v39 = vld [vmem:[%s11786_s1 + $0x430] ss:$8 sps:$4 sm:$0xff]  }
  0x2f   : > { %v8725_v17 = vld [vmem:[%s11786_s1 + $0x1a4] ss:$8 sps:$4 sm:$0xff]   ;;  %v8723_v19 = vld [vmem:[%s11786_s1 + $0x1a0] ss:$8 sps:$4 sm:$0xff]   ;;  %v8854_v53 = vld [vmem:[%s11786_s1 + $0x414] ss:$8 sps:$4 sm:$0xff]  }
  0x30   : > { %v515_v20 = vld [vmem:[%s9362_s19 + $0x1c8] sm:$0xff]  ;;  %v487_v21 = vld [vmem:[%s9362_s19 + $0x1c0] sm:$0xff]  ;;  %v8852_v54 = vld [vmem:[%s11786_s1 + $0x410] ss:$8 sps:$4 sm:$0xff]  }
  0x31   : > { %630 = vmatpush1.bf16.msra.mxu0 %v8682_v27  ;;  %783 = vmatpush1.bf16.msra.mxu1 %v8683_v28  ;;  %v843_v24 = vld [vmem:[%s9362_s19] sm:$0xfe]  ;;  %v844_v25 = vld [vmem:[%s9362_s19 + $0x20] sm:$0x1]  ;;  %v519_v28 = vpack.c.bf16 %v515_v20, %v9464_v3  ;;  %v8755_v20 = vld [vmem:[%s11786_s1 + $0x2d4] ss:$8 sps:$4 sm:$0xff]  }
  0x32   : > { %631 = vmatprep.subr.bf16.mxu0 %v8684_v29  ;;  %784 = vmatprep.subr.bf16.mxu1 %v8686_v30  ;;  %v845_v26 = vld [vmem:[%s9362_s19 + $0x40] sm:$0xfe]  ;;  %v846_v27 = vld [vmem:[%s9362_s19 + $0x60] sm:$0x1]  ;;  %v491_v29 = vpack.c.bf16 %v487_v21, %v9470_v5  ;;  %v8726_v30 = vld [vmem:[%s11786_s1 + $0x110] ss:$8 sps:$4 sm:$0xff]  }
  0x33   : > { %v876_v33 = vrot.slane %v843_v24, 1  ;;  %v877_v35 = vrot.slane %v844_v25, 1  ;;  %v851_v21 = vld [vmem:[%s9362_s19 + $0x100] sm:$0xfe]  ;;  %v852_v24 = vld [vmem:[%s9362_s19 + $0x120] sm:$0x1] }
  0x34   : > { %v853_v25 = vld [vmem:[%s9362_s19 + $0x140] sm:$0xfe]  ;;  %v6933_v51 = vld [vmem:[%s9362_s19 + $0x208] sm:$0xff] }
  0x35   : > { %632 = vmatpush1.bf16.msra.mxu0 %v8688_v31  ;;  %785 = vmatpush1.bf16.msra.mxu1 %v8689_v32  ;;  %v8729_v31 = vld [vmem:[%s11786_s1 + $0x190] ss:$8 sps:$4 sm:$0xff]   ;;  %v8734_v32 = vld [vmem:[%s11786_s1 + $0x104] ss:$8 sps:$4 sm:$0xff]   ;;  %v8843_v34 = vld [vmem:[%s11786_s1 + $0x440] ss:$8 sps:$4 sm:$0xff]  }
  0x36   : > { %1009 = vmatprep.subr.bf16.mxu0 %v8692_v37  ;;  %1207 = vmatprep.subr.bf16.mxu1 %v8695_v40  ;;  %v879_v37 = vrot.slane %v845_v26, 1  ;;  %v880_v40 = vrot.slane %v846_v27, 1  ;;  %v854_v26 = vld [vmem:[%s9362_s19 + $0x160] sm:$0x1]  ;;  %v8845_v36 = vld [vmem:[%s11786_s1 + $0x444] ss:$8 sps:$4 sm:$0xff]  }
  0x37   : > { %v6893_v50 = vld [vmem:[%s9362_s19 + $0x200] sm:$0xff]  ;;  %v9075_v4 = vld [vmem:[%s9362_s19 + $0x1c8] sm:$0xff] }
  0x38   : > { %650 = vmatmul.mubr.bf16.vlgmr.msra.gmra.mxu0 %v516_v43  ;;  %803 = vmatmul.mubr.bf16.vlgmr.msra.gmra.mxu1 %v488_v44  ;;  %v8737_v43 = vld [vmem:[%s11786_s1 + $0x184] ss:$8 sps:$4 sm:$0xff]   ;;  %v8732_v44 = vld [vmem:[%s11786_s1 + $0x100] ss:$8 sps:$4 sm:$0xff]   ;;  %v1958_v5 = vpack.c.bf16 %v6933_v51, %v9075_v4 }
  0x39   : > { %1010 = vmatpush1.bf16.msra.mxu0 %v8690_v45  ;;  %1208 = vmatpush1.bf16.msra.mxu1 %v8693_v46  ;;  %v8735_v45 = vld [vmem:[%s11786_s1 + $0x180] ss:$8 sps:$4 sm:$0xff]   ;;  %v1098_v46 = vld [vmem:[%s9362_s19 + $0x10] sm:$0xff]  ;;  %v8857_v1 = vld [vmem:[%s11786_s1 + $0x404] ss:$8 sps:$4 sm:$0xff]  }
  0x3a   : > { %1011 = vmatprep.subr.bf16.mxu0 %v8698_v47  ;;  %1209 = vmatprep.subr.bf16.mxu1 %v8701_v48  ;;  %v1099_v47 = vld [vmem:[%s9362_s19 + $0x50] sm:$0xff]  ;;  %v8855_v3 = vld [vmem:[%s11786_s1 + $0x400] ss:$8 sps:$4 sm:$0xff]  }
  0x3b   : > { %659 = vmatprep.mubr.bf16.mxu0 %v9148_v2  ;;  %812 = vmatprep.mubr.bf16.mxu1 %v9148_v2  ;;  %v8740_v48 = vld [vmem:[%s11786_s1 + $0x274] ss:$8 sps:$4 sm:$0xff]  }
  0x3d   : > { %1012 = vmatpush1.bf16.msra.mxu0 %v8696_v49  ;;  %1210 = vmatpush1.bf16.msra.mxu1 %v8699_v52  ;;  %v8743_v49 = vld [vmem:[%s11786_s1 + $0x2f4] ss:$8 sps:$4 sm:$0xff]   ;;  %v878_v52 = vsel %vm875_vm0, %v876_v33, %v877_v35  ;;  %v891_v33 = vrot.slane %v853_v25, 1  ;;  %v892_v35 = vrot.slane %v854_v26, 1  ;;  %v1497_v25 = vld [vmem:[%s9362_s19 + $0x70] sm:$0x1] }
  0x3e   : > { %1013 = vmatprep.subr.bf16.mxu0 %v8704_v56  ;;  %1211 = vmatprep.subr.bf16.mxu1 %v8707_v58  ;;  %v881_v56 = vsel %vm875_vm0, %v879_v37, %v880_v40  ;;  %v847_v58 = vld [vmem:[%s9362_s19 + $0x80] sm:$0xfe] }
  0x3f   : > { %v8758_v37 = vld [vmem:[%s11786_s1 + $0x244] ss:$8 sps:$4 sm:$0xff]  }
  0x40   : > { %660 = vmatmul.mubr.bf16.gmra.mxu0 %v517_v59  ;;  %813 = vmatmul.mubr.bf16.gmra.mxu1 %v489_v60  ;;  %v848_v59 = vld [vmem:[%s9362_s19 + $0xa0] sm:$0x1]  ;;  %v849_v60 = vld [vmem:[%s9362_s19 + $0xc0] sm:$0xfe] }
  0x41   : > { %1014 = vmatpush1.bf16.msra.mxu0 %v8702_v61  ;;  %1212 = vmatpush1.bf16.msra.mxu1 %v8705_v62  ;;  %v850_v61 = vld [vmem:[%s9362_s19 + $0xe0] sm:$0x1]  ;;  %v908_v62 = vpack.c.bf16 %v881_v56, %v878_v52  ;;  %v8761_v40 = vld [vmem:[%s11786_s1 + $0x2c4] ss:$8 sps:$4 sm:$0xff]  }
  0x42   : > { %1015 = vmatprep.subr.bf16.mxu0 %v8710_v63  ;;  %1213 = vmatprep.subr.bf16.mxu1 %v8713_v0  ;;  %v8738_v63 = vld [vmem:[%s11786_s1 + $0x270] ss:$8 sps:$4 sm:$0xff]   ;;  %v1106_v0 = vpack.c.bf16 %v1099_v47, %v1098_v46  ;;  %v8764_v47 = vld [vmem:[%s11786_s1 + $0x234] ss:$8 sps:$4 sm:$0xff]   ;;  %v856_v52 = vld [vmem:[%s9362_s19 + $0x1a0] sm:$0x1] }
  0x43   : > { %669 = vmatprep.mubr.bf16.mxu0 %v9148_v2  ;;  %822 = vmatprep.mubr.bf16.mxu1 %v9148_v2  ;;  %v1103_v46 = vld [vmem:[%s9362_s19 + $0x150] sm:$0xff] }
  0x45   : > { %1016 = vmatpush1.bf16.msra.mxu0 %v8708_v7  ;;  %1214 = vmatpush1.bf16.msra.mxu1 %v8711_v8  ;;  %v8741_v7 = vld [vmem:[%s11786_s1 + $0x2f0] ss:$8 sps:$4 sm:$0xff]   ;;  %v8746_v8 = vld [vmem:[%s11786_s1 + $0x264] ss:$8 sps:$4 sm:$0xff]  }
  0x46   : > { %1017 = vmatprep.subr.bf16.mxu0 %v8716_v10  ;;  %1215 = vmatprep.subr.bf16.mxu1 %v8719_v11  ;;  %v882_v10 = vrot.slane %v847_v58, 1  ;;  %v883_v11 = vrot.slane %v848_v59, 1  ;;  %v893_v58 = vsel %vm875_vm0, %v891_v33, %v892_v35  ;;  %v857_v59 = vld [vmem:[%s9362_s19 + $0x1c0] sm:$0xfe]  ;;  %v1530_v33 = vrot.slane %v1497_v25, 1 }
  0x47   : > { %v8782_v35 = vld [vmem:[%s11786_s1 + $0x204] ss:$8 sps:$4 sm:$0xff]  }
  0x48   : > { %670 = vmatmul.mubr.bf16.gmra.mxu0 %v518_v12  ;;  %823 = vmatmul.mubr.bf16.gmra.mxu1 %v490_v13  ;;  %v885_v12 = vrot.slane %v849_v60, 1  ;;  %v886_v13 = vrot.slane %v850_v61, 1  ;;  %v858_v60 = vld [vmem:[%s9362_s19 + $0x1e0] sm:$0x1] }
  0x49   : > { %1018 = vmatpush1.bf16.msra.mxu0 %v8714_v14  ;;  %1216 = vmatpush1.bf16.msra.mxu1 %v8717_v15  ;;  %v8749_v14 = vld [vmem:[%s11786_s1 + $0x2e4] ss:$8 sps:$4 sm:$0xff]   ;;  %v8744_v15 = vld [vmem:[%s11786_s1 + $0x260] ss:$8 sps:$4 sm:$0xff]  }
  0x4a   : > { %1019 = vmatprep.subr.bf16.mxu0 %v8722_v16  ;;  %1217 = vmatprep.subr.bf16.mxu1 %v8725_v17  ;;  %v8747_v16 = vld [vmem:[%s11786_s1 + $0x2e0] ss:$8 sps:$4 sm:$0xff]   ;;  %v1100_v17 = vld [vmem:[%s9362_s19 + $0x90] sm:$0xff] }
  0x4b   : > { %679 = vmatprep.mubr.bf16.mxu0 %v9148_v2  ;;  %832 = vmatprep.mubr.bf16.mxu1 %v9148_v2 }
  0x4d   : > { %1020 = vmatpush1.bf16.msra.mxu0 %v8720_v18  ;;  %1218 = vmatpush1.bf16.msra.mxu1 %v8723_v19  ;;  %v1101_v18 = vld [vmem:[%s9362_s19 + $0xd0] sm:$0xff] }
  0x4e   : > { %1021 = vmatprep.subr.bf16.mxu0 %v8728_v22  ;;  %1219 = vmatprep.subr.bf16.mxu1 %v8731_v23  ;;  %v8752_v19 = vld [vmem:[%s11786_s1 + $0x254] ss:$8 sps:$4 sm:$0xff]   ;;  %v884_v22 = vsel %vm875_vm0, %v882_v10, %v883_v11  ;;  %v887_v23 = vsel %vm875_vm0, %v885_v12, %v886_v13  ;;  %v897_v10 = vrot.slane %v857_v59, 1  ;;  %v898_v11 = vrot.slane %v858_v60, 1  ;;  %v8770_v12 = vld [vmem:[%s11786_s1 + $0x224] ss:$8 sps:$4 sm:$0xff]  }
  0x4f   : > { %v909_v27 = vpack.c.bf16 %v887_v23, %v884_v22  ;;  %v8773_v13 = vld [vmem:[%s11786_s1 + $0x2a4] ss:$8 sps:$4 sm:$0xff]   ;;  %v1495_v23 = vld [vmem:[%s9362_s19 + $0x30] sm:$0x1] }
  0x50   : > { %680 = vmatmul.mubr.bf16.gmra.mxu0 %v519_v28  ;;  %833 = vmatmul.mubr.bf16.gmra.mxu1 %v491_v29  ;;  %v8750_v28 = vld [vmem:[%s11786_s1 + $0x250] ss:$8 sps:$4 sm:$0xff]   ;;  %v1107_v29 = vpack.c.bf16 %v1101_v18, %v1100_v17  ;;  %v8776_v18 = vld [vmem:[%s11786_s1 + $0x214] ss:$8 sps:$4 sm:$0xff]   ;;  %v899_v22 = vsel %vm875_vm0, %v897_v10, %v898_v11  ;;  %v8794_v11 = vld [vmem:[%s11786_s1 + $0x364] ss:$8 sps:$4 sm:$0xff]  }
  0x51   : > { %1022 = vmatpush1.bf16.msra.mxu0 %v8726_v30  ;;  %1220 = vmatpush1.bf16.msra.mxu1 %v8729_v31  ;;  %v8753_v30 = vld [vmem:[%s11786_s1 + $0x2d0] ss:$8 sps:$4 sm:$0xff]   ;;  %v888_v31 = vrot.slane %v851_v21, 1 }
  0x52   : > { %1023 = vmatprep.subr.bf16.mxu0 %v8734_v32  ;;  %1221 = vmatprep.subr.bf16.mxu1 %v8737_v43  ;;  %v889_v32 = vrot.slane %v852_v24, 1  ;;  %v8756_v43 = vld [vmem:[%s11786_s1 + $0x240] ss:$8 sps:$4 sm:$0xff]   ;;  %v1105_v17 = vld [vmem:[%s9362_s19 + $0x1d0] sm:$0xff] }
  0x53   : > { %1041 = vmatprep.mubr.bf16.mxu0 %v9148_v2  ;;  %1239 = vmatprep.mubr.bf16.mxu1 %v9148_v2  ;;  %v1496_v24 = vld [vmem:[%s9362_s19 + $0x50] sm:$0xfe]  ;;  %v1501_v59 = vld [vmem:[%s9362_s19 + $0xf0] sm:$0x1] }
  0x54   : > { %v890_v56 = vsel %vm875_vm0, %v888_v31, %v889_v32  ;;  %v1527_v31 = vrot.slane %v1495_v23, 1  ;;  %v1529_v32 = vrot.slane %v1496_v24, 1  ;;  %v1536_v10 = vrot.slane %v1501_v59, 1  ;;  %v1504_v23 = vld [vmem:[%s9362_s19 + $0x150] sm:$0xfe] }
  0x55   : > { %1024 = vmatpush1.bf16.msra.mxu0 %v8732_v44  ;;  %1222 = vmatpush1.bf16.msra.mxu1 %v8735_v45  ;;  %v8759_v44 = vld [vmem:[%s11786_s1 + $0x2c0] ss:$8 sps:$4 sm:$0xff]   ;;  %v1102_v45 = vld [vmem:[%s9362_s19 + $0x110] sm:$0xff]  ;;  %v910_v61 = vpack.c.bf16 %v893_v58, %v890_v56 }
  0x56   : > { %1405 = vmatprep.subr.bf16.mxu0 %v8740_v48  ;;  %1659 = vmatprep.subr.bf16.mxu1 %v8743_v49  ;;  %v8767_v48 = vld [vmem:[%s11786_s1 + $0x2b4] ss:$8 sps:$4 sm:$0xff]   ;;  %v855_v49 = vld [vmem:[%s9362_s19 + $0x180] sm:$0xfe]  ;;  %v1499_v56 = vld [vmem:[%s9362_s19 + $0xb0] sm:$0x1] }
  0x57   : > { %v1500_v58 = vld [vmem:[%s9362_s19 + $0xd0] sm:$0xfe]  ;;  %v1505_v24 = vld [vmem:[%s9362_s19 + $0x170] sm:$0x1] }
  0x58   : > { %1042 = vmatmul.mubr.bf16.vlgmr.msra.gmra.mxu0 %v908_v62  ;;  %1240 = vmatmul.mubr.bf16.vlgmr.msra.gmra.mxu1 %v1106_v0  ;;  %v8762_v62 = vld [vmem:[%s11786_s1 + $0x230] ss:$8 sps:$4 sm:$0xff]  }
  0x59   : > { %1406 = vmatpush1.bf16.msra.mxu0 %v8738_v63  ;;  %1660 = vmatpush1.bf16.msra.mxu1 %v8741_v7  ;;  %v1108_v63 = vpack.c.bf16 %v1103_v46, %v1102_v45  ;;  %v8765_v0 = vld [vmem:[%s11786_s1 + $0x2b0] ss:$8 sps:$4 sm:$0xff]   ;;  %v894_v7 = vrot.slane %v855_v49, 1  ;;  %v8788_v46 = vld [vmem:[%s11786_s1 + $0x374] ss:$8 sps:$4 sm:$0xff]   ;;  %v1531_v49 = vsel %vm875_vm0, %v1529_v32, %v1530_v33  ;;  %v1541_v32 = vrot.slane %v1504_v23, 1 }
  0x5a   : > { %1407 = vmatprep.subr.bf16.mxu0 %v8746_v8  ;;  %1661 = vmatprep.subr.bf16.mxu1 %v8749_v14  ;;  %v895_v8 = vrot.slane %v856_v52, 1  ;;  %v8768_v14 = vld [vmem:[%s11786_s1 + $0x220] ss:$8 sps:$4 sm:$0xff]   ;;  %v1297_v45 = vld [vmem:[%s9362_s19 + $0x58] sm:$0xff]  ;;  %v1498_v52 = vld [vmem:[%s9362_s19 + $0x90] sm:$0xfe] }
  0x5b   : > { %1051 = vmatprep.mubr.bf16.mxu0 %v9148_v2  ;;  %1249 = vmatprep.mubr.bf16.mxu1 %v9148_v2  ;;  %v1542_v33 = vrot.slane %v1505_v24, 1  ;;  %v8810_v59 = vld [vmem:[%s11786_s1 + $0x330] ss:$8 sps:$4 sm:$0xff]   ;;  %v8830_v24 = vld [vmem:[%s11786_s1 + $0x304] ss:$8 sps:$4 sm:$0xff]  }
  0x5c   : > { %v896_v21 = vsel %vm875_vm0, %v894_v7, %v895_v8  ;;  %v1533_v7 = vrot.slane %v1499_v56, 1  ;;  %v1535_v8 = vrot.slane %v1500_v58, 1  ;;  %v1508_v56 = vld [vmem:[%s9362_s19 + $0x1d0] sm:$0xfe]  ;;  %v1509_v58 = vld [vmem:[%s9362_s19 + $0x1f0] sm:$0x1] }
  0x5d   : > { %1408 = vmatpush1.bf16.msra.mxu0 %v8744_v15  ;;  %1662 = vmatpush1.bf16.msra.mxu1 %v8747_v16  ;;  %v8771_v15 = vld [vmem:[%s11786_s1 + $0x2a0] ss:$8 sps:$4 sm:$0xff]   ;;  %v1104_v16 = vld [vmem:[%s9362_s19 + $0x190] sm:$0xff]  ;;  %v911_v26 = vpack.c.bf16 %v899_v22, %v896_v21 }
  0x5e   : > { %1409 = vmatprep.subr.bf16.mxu0 %v8752_v19  ;;  %1663 = vmatprep.subr.bf16.mxu1 %v8755_v20  ;;  %v8779_v19 = vld [vmem:[%s11786_s1 + $0x294] ss:$8 sps:$4 sm:$0xff]   ;;  %v1503_v22 = vld [vmem:[%s9362_s19 + $0x130] sm:$0x1] }
  0x5f   : > { %v1494_v20 = vld [vmem:[%s9362_s19 + $0x10] sm:$0xfe] }
  0x60   : > { %1052 = vmatmul.mubr.bf16.gmra.mxu0 %v909_v27  ;;  %1250 = vmatmul.mubr.bf16.gmra.mxu1 %v1107_v29  ;;  %v8774_v27 = vld [vmem:[%s11786_s1 + $0x210] ss:$8 sps:$4 sm:$0xff]  }
  0x61   : > { %1410 = vmatpush1.bf16.msra.mxu0 %v8750_v28  ;;  %1664 = vmatpush1.bf16.msra.mxu1 %v8753_v30  ;;  %v1109_v28 = vpack.c.bf16 %v1105_v17, %v1104_v16  ;;  %v8777_v29 = vld [vmem:[%s11786_s1 + $0x290] ss:$8 sps:$4 sm:$0xff]   ;;  %v1526_v30 = vrot.slane %v1494_v20, 1  ;;  %v8800_v17 = vld [vmem:[%s11786_s1 + $0x354] ss:$8 sps:$4 sm:$0xff]   ;;  %v1537_v20 = vsel %vm875_vm0, %v1535_v8, %v1536_v10  ;;  %v1547_v8 = vrot.slane %v1508_v56, 1 }
  0x62   : > { %1411 = vmatprep.subr.bf16.mxu0 %v8758_v37  ;;  %1665 = vmatprep.subr.bf16.mxu1 %v8761_v40  ;;  %v8785_v37 = vld [vmem:[%s11786_s1 + $0x284] ss:$8 sps:$4 sm:$0xff]   ;;  %v8780_v40 = vld [vmem:[%s11786_s1 + $0x200] ss:$8 sps:$4 sm:$0xff]   ;;  %v1299_v16 = vld [vmem:[%s9362_s19 + $0xd8] sm:$0xff]  ;;  %v1548_v10 = vrot.slane %v1509_v58, 1 }
  0x63   : > { %1061 = vmatprep.mubr.bf16.mxu0 %v9148_v2  ;;  %1259 = vmatprep.mubr.bf16.mxu1 %v9148_v2  ;;  %v1502_v21 = vld [vmem:[%s9362_s19 + $0x110] sm:$0xfe]  ;;  %v9854_v56 = vld [vmem:[%s9362_s19 + $0x180] sm:$0xfe]  ;;  %v9857_v58 = vld [vmem:[%s9362_s19 + $0x1a0] sm:$0x1] }
  0x64   : > { %v8825_v23 = vld [vmem:[%s11786_s1 + $0x390] ss:$8 sps:$4 sm:$0xff]  }
  0x65   : > { %1412 = vmatpush1.bf16.msra.mxu0 %v8756_v43  ;;  %1666 = vmatpush1.bf16.msra.mxu1 %v8759_v44  ;;  %v8783_v43 = vld [vmem:[%s11786_s1 + $0x280] ss:$8 sps:$4 sm:$0xff]   ;;  %v1296_v44 = vld [vmem:[%s9362_s19 + $0x18] sm:$0xff] }
  0x66   : > { %1413 = vmatprep.subr.bf16.mxu0 %v8764_v47  ;;  %1667 = vmatprep.subr.bf16.mxu1 %v8767_v48  ;;  %v8791_v47 = vld [vmem:[%s11786_s1 + $0x3f4] ss:$8 sps:$4 sm:$0xff]   ;;  %v1528_v48 = vsel %vm875_vm0, %v1526_v30, %v1527_v31  ;;  %v1304_v60 = vpack.c.bf16 %v1297_v45, %v1296_v44  ;;  %v1538_v30 = vrot.slane %v1502_v21, 1  ;;  %v1539_v31 = vrot.slane %v1503_v22, 1 }
  0x67   : > { %v1301_v44 = vld [vmem:[%s9362_s19 + $0x158] sm:$0xff] }
  0x68   : > { %1062 = vmatmul.mubr.bf16.gmra.mxu0 %v910_v61  ;;  %1260 = vmatmul.mubr.bf16.gmra.mxu1 %v1108_v63  ;;  %v8786_v61 = vld [vmem:[%s11786_s1 + $0x370] ss:$8 sps:$4 sm:$0xff]   ;;  %v8812_v45 = vld [vmem:[%s11786_s1 + $0x334] ss:$8 sps:$4 sm:$0xff]  }
  0x69   : > { %1414 = vmatpush1.bf16.msra.mxu0 %v8762_v62  ;;  %1668 = vmatpush1.bf16.msra.mxu1 %v8765_v0  ;;  %v1558_v62 = vpack.c.bf16 %v1531_v49, %v1528_v48  ;;  %v8789_v63 = vld [vmem:[%s11786_s1 + $0x3f0] ss:$8 sps:$4 sm:$0xff]   ;;  %v1532_v0 = vrot.slane %v1498_v52, 1  ;;  %v1540_v49 = vsel %vm875_vm0, %v1538_v30, %v1539_v31  ;;  %v1543_v52 = vsel %vm875_vm0, %v1541_v32, %v1542_v33  ;;  %v8828_v30 = vld [vmem:[%s11786_s1 + $0x300] ss:$8 sps:$4 sm:$0xff]  }
  0x6a   : > { %1415 = vmatprep.subr.bf16.mxu0 %v8770_v12  ;;  %1669 = vmatprep.subr.bf16.mxu1 %v8773_v13  ;;  %v8797_v12 = vld [vmem:[%s11786_s1 + $0x3e4] ss:$8 sps:$4 sm:$0xff]   ;;  %v8792_v13 = vld [vmem:[%s11786_s1 + $0x360] ss:$8 sps:$4 sm:$0xff]   ;;  %v1507_v48 = vld [vmem:[%s9362_s19 + $0x1b0] sm:$0x1] }
  0x6b   : > { %1071 = vmatprep.mubr.bf16.mxu0 %v9148_v2  ;;  %1269 = vmatprep.mubr.bf16.mxu1 %v9148_v2  ;;  %v8831_v31 = vld [vmem:[%s11786_s1 + $0x380] ss:$8 sps:$4 sm:$0xff]  }
  0x6d   : > { %1416 = vmatpush1.bf16.msra.mxu0 %v8768_v14  ;;  %1670 = vmatpush1.bf16.msra.mxu1 %v8771_v15  ;;  %v8795_v14 = vld [vmem:[%s11786_s1 + $0x3e0] ss:$8 sps:$4 sm:$0xff]   ;;  %v1298_v15 = vld [vmem:[%s9362_s19 + $0x98] sm:$0xff] }
  0x6e   : > { %1417 = vmatprep.subr.bf16.mxu0 %v8776_v18  ;;  %1671 = vmatprep.subr.bf16.mxu1 %v8779_v19  ;;  %v8803_v18 = vld [vmem:[%s11786_s1 + $0x3d4] ss:$8 sps:$4 sm:$0xff]   ;;  %v1534_v19 = vsel %vm875_vm0, %v1532_v0, %v1533_v7  ;;  %v1305_v25 = vpack.c.bf16 %v1299_v16, %v1298_v15  ;;  %v1545_v7 = vrot.slane %v1507_v48, 1  ;;  %v9849_v48 = vld [vmem:[%s9362_s19 + $0x160] sm:$0x1] }
  0x6f   : > { %v1303_v15 = vld [vmem:[%s9362_s19 + $0x1d8] sm:$0xff] }
  0x70   : > { %1072 = vmatmul.mubr.bf16.gmra.mxu0 %v911_v26  ;;  %1270 = vmatmul.mubr.bf16.gmra.mxu1 %v1109_v28  ;;  %v8798_v26 = vld [vmem:[%s11786_s1 + $0x350] ss:$8 sps:$4 sm:$0xff]  }
  0x71   : > { %1418 = vmatpush1.bf16.msra.mxu0 %v8774_v27  ;;  %1672 = vmatpush1.bf16.msra.mxu1 %v8777_v29  ;;  %v1559_v27 = vpack.c.bf16 %v1537_v20, %v1534_v19  ;;  %v8801_v28 = vld [vmem:[%s11786_s1 + $0x3d0] ss:$8 sps:$4 sm:$0xff]   ;;  %v8806_v29 = vld [vmem:[%s11786_s1 + $0x344] ss:$8 sps:$4 sm:$0xff]   ;;  %v8827_v19 = vld [vmem:[%s11786_s1 + $0x394] ss:$8 sps:$4 sm:$0xff]  }
  0x72   : > { %1419 = vmatprep.subr.bf16.mxu0 %v8782_v35  ;;  %1673 = vmatprep.subr.bf16.mxu1 %v8785_v37  ;;  %v8809_v35 = vld [vmem:[%s11786_s1 + $0x3c4] ss:$8 sps:$4 sm:$0xff]   ;;  %v8804_v37 = vld [vmem:[%s11786_s1 + $0x340] ss:$8 sps:$4 sm:$0xff]   ;;  %v8822_v20 = vld [vmem:[%s11786_s1 + $0x310] ss:$8 sps:$4 sm:$0xff]  }
  0x73   : > { %1437 = vmatprep.mubr.bf16.mxu0 %v9148_v2  ;;  %1691 = vmatprep.mubr.bf16.mxu1 %v9148_v2 }
  0x75   : > { %1420 = vmatpush1.bf16.msra.mxu0 %v8780_v40  ;;  %1674 = vmatpush1.bf16.msra.mxu1 %v8783_v43  ;;  %v8807_v40 = vld [vmem:[%s11786_s1 + $0x3c0] ss:$8 sps:$4 sm:$0xff]   ;;  %v1300_v43 = vld [vmem:[%s9362_s19 + $0x118] sm:$0xff] }
  0x76   : > { %1858 = vmatprep.subr.bf16.mxu0 %v8788_v46  ;;  %2056 = vmatprep.subr.bf16.mxu1 %v8791_v47  ;;  %v8815_v46 = vld [vmem:[%s11786_s1 + $0x3b4] ss:$8 sps:$4 sm:$0xff]  }
  0x77   : > { %v1506_v47 = vld [vmem:[%s9362_s19 + $0x190] sm:$0xfe] }
  0x78   : > { %1438 = vmatmul.mubr.bf16.vlgmr.msra.gmra.mxu0 %v1304_v60  ;;  %1692 = vmatmul.mubr.bf16.vlgmr.msra.gmra.mxu1 %v1558_v62  ;;  %v1306_v60 = vpack.c.bf16 %v1301_v44, %v1300_v43  ;;  %v8813_v62 = vld [vmem:[%s11786_s1 + $0x3b0] ss:$8 sps:$4 sm:$0xff]   ;;  %v1544_v0 = vrot.slane %v1506_v47, 1  ;;  %v9838_v43 = vld [vmem:[%s9362_s19 + $0x100] sm:$0xfe] }
  0x79   : > { %1859 = vmatpush1.bf16.msra.mxu0 %v8786_v61  ;;  %2057 = vmatpush1.bf16.msra.mxu1 %v8789_v63  ;;  %v1560_v61 = vpack.c.bf16 %v1543_v52, %v1540_v49  ;;  %v8818_v63 = vld [vmem:[%s11786_s1 + $0x324] ss:$8 sps:$4 sm:$0xff]   ;;  %v9841_v44 = vld [vmem:[%s9362_s19 + $0x120] sm:$0x1] }
  0x7a   : > { %1860 = vmatprep.subr.bf16.mxu0 %v8794_v11  ;;  %2058 = vmatprep.subr.bf16.mxu1 %v8797_v12  ;;  %v8821_v11 = vld [vmem:[%s11786_s1 + $0x3a4] ss:$8 sps:$4 sm:$0xff]   ;;  %v8816_v12 = vld [vmem:[%s11786_s1 + $0x320] ss:$8 sps:$4 sm:$0xff]   ;;  %v1546_v16 = vsel %vm875_vm0, %v1544_v0, %v1545_v7 }
  0x7b   : > { %1447 = vmatprep.mubr.bf16.mxu0 %v9148_v2  ;;  %1701 = vmatprep.mubr.bf16.mxu1 %v9148_v2  ;;  %v9846_v47 = vld [vmem:[%s9362_s19 + $0x140] sm:$0xfe] }
  0x7c   : > { %v9869_v0 = vld [vmem:[%s9362_s19 + $0x1c0] sm:$0xfe] }
  0x7d   : > { %1861 = vmatpush1.bf16.msra.mxu0 %v8792_v13  ;;  %2059 = vmatpush1.bf16.msra.mxu1 %v8795_v14  ;;  %v8819_v13 = vld [vmem:[%s11786_s1 + $0x3a0] ss:$8 sps:$4 sm:$0xff]   ;;  %v1302_v14 = vld [vmem:[%s9362_s19 + $0x198] sm:$0xff]  ;;  %v8839_v7 = vld [vmem:[%s11786_s1 + $0x464] ss:$8 sps:$4 sm:$0xff]  }
  0x7e   : > { %1862 = vmatprep.subr.bf16.mxu0 %v8800_v17  ;;  %2060 = vmatprep.subr.bf16.mxu1 %v8803_v18  ;;  %v1549_v17 = vsel %vm875_vm0, %v1547_v8, %v1548_v10  ;;  %v8824_v18 = vld [vmem:[%s11786_s1 + $0x314] ss:$8 sps:$4 sm:$0xff]   ;;  %v1307_v21 = vpack.c.bf16 %v1303_v15, %v1302_v14  ;;  %v2192_v8 = vrot.slane %v9854_v56, 1  ;;  %v2193_v10 = vrot.slane %v9857_v58, 1 }
  0x7f   : > { %v1561_v22 = vpack.c.bf16 %v1549_v17, %v1546_v16  ;;  %v2195_v14 = vrot.slane %v9869_v0, 1 }
  0x80   : > { %1448 = vmatmul.mubr.bf16.gmra.mxu0 %v1305_v25  ;;  %1702 = vmatmul.mubr.bf16.gmra.mxu1 %v1559_v27  ;;  %v8833_v25 = vld [vmem:[%s11786_s1 + $0x384] ss:$8 sps:$4 sm:$0xff]   ;;  %v9812_v27 = vld [vmem:[%s9362_s19 + $0x60] sm:$0x1] }
  0x81   : > { %1863 = vmatpush1.bf16.msra.mxu0 %v8798_v26  ;;  %2061 = vmatpush1.bf16.msra.mxu1 %v8801_v28  ;;  %v9809_v26 = vld [vmem:[%s9362_s19 + $0x40] sm:$0xfe]  ;;  %v2178_v33 = vrot.slane %v9812_v27, 1 }
  0x82   : > { %1864 = vmatprep.subr.bf16.mxu0 %v8806_v29  ;;  %2062 = vmatprep.subr.bf16.mxu1 %v8809_v35  ;;  %v9815_v28 = vld [vmem:[%s9362_s19 + $0x80] sm:$0xfe]  ;;  %v9818_v29 = vld [vmem:[%s9362_s19 + $0xa0] sm:$0x1]  ;;  %v2177_v32 = vrot.slane %v9809_v26, 1  ;;  %v2194_v26 = vsel %vm875_vm0, %v2192_v8, %v2193_v10  ;;  %v8868_v8 = vld [vmem:[%s11789_s4 + $0x50] sm:$0xff]  }
  0x83   : > { %1457 = vmatprep.mubr.bf16.mxu0 %v9148_v2  ;;  %1711 = vmatprep.mubr.bf16.mxu1 %v9148_v2  ;;  %v9829_v35 = vld [vmem:[%s9362_s19 + $0xc0] sm:$0xfe] }
  0x84   : > { %v2183_v49 = vrot.slane %v9829_v35, 1  ;;  %v2401_v35 = vlaneseq }
  0x85   : > { %1865 = vmatpush1.bf16.msra.mxu0 %v8804_v37  ;;  %2063 = vmatpush1.bf16.msra.mxu1 %v8807_v40  ;;  %v8836_v37 = vld [vmem:[%s11786_s1 + $0x474] ss:$8 sps:$4 sm:$0xff]   ;;  %v9835_v40 = vld [vmem:[%s9362_s19 + $0xe0] sm:$0x1] }
  0x86   : > { %1866 = vmatprep.subr.bf16.mxu0 %v8812_v45  ;;  %2064 = vmatprep.subr.bf16.mxu1 %v8815_v46  ;;  %v2180_v45 = vrot.slane %v9815_v28, 1  ;;  %v2181_v46 = vrot.slane %v9818_v29, 1  ;;  %v2184_v52 = vrot.slane %v9835_v40, 1  ;;  %v8864_v40 = vld [vmem:[%s11789_s4 + $0x60] sm:$0xff]  }
  0x88   : > { %1458 = vmatmul.mubr.bf16.gmra.mxu0 %v1306_v60  ;;  %1712 = vmatmul.mubr.bf16.gmra.mxu1 %v1560_v61  ;;  %v2186_v60 = vrot.slane %v9838_v43, 1  ;;  %v2187_v61 = vrot.slane %v9841_v44, 1  ;;  %v10018_v43 = vshrl.u32 %v2401_v35, 7 }
  0x89   : > { %1867 = vmatpush1.bf16.msra.mxu0 %v8810_v59  ;;  %2065 = vmatpush1.bf16.msra.mxu1 %v8813_v62  ;;  %v8834_v59 = vld [vmem:[%s11786_s1 + $0x470] ss:$8 sps:$4 sm:$0xff]   ;;  %v2189_v62 = vrot.slane %v9846_v47, 1  ;;  %v8863_v47 = vld [vmem:[%s11789_s4 + $0x28] sm:$0xff]  }
  0x8a   : > { %1868 = vmatprep.subr.bf16.mxu0 %v8818_v63  ;;  %2066 = vmatprep.subr.bf16.mxu1 %v8821_v11  ;;  %v2190_v63 = vrot.slane %v9849_v48, 1  ;;  %v9877_v11 = vld [vmem:[%s9362_s19 + $0x1e0] sm:$0x1]  ;;  %v8866_v48 = vld [vmem:[%s11789_s4 + $0x58] sm:$0xff]   ;;  %v2407_v56 = vsub.s32 1, %v10018_v43 }
  0x8b   : > { %1467 = vmatprep.mubr.bf16.mxu0 %v9148_v2  ;;  %1721 = vmatprep.mubr.bf16.mxu1 %v9148_v2  ;;  %v2196_v15 = vrot.slane %v9877_v11, 1 }
  0x8d   : > { %1869 = vmatpush1.bf16.msra.mxu0 %v8816_v12  ;;  %2067 = vmatpush1.bf16.msra.mxu1 %v8819_v13  ;;  %v9880_v12 = vld [vmem:[%s9362_s19 + $0x200] sm:$0xfe]  ;;  %v9883_v13 = vld [vmem:[%s9362_s19 + $0x220] sm:$0x1]  ;;  %v2197_v28 = vsel %vm875_vm0, %v2195_v14, %v2196_v15 }
  0x8e   : > { %1870 = vmatprep.subr.bf16.mxu0 %v8824_v18  ;;  %2068 = vmatprep.subr.bf16.mxu1 %v8827_v19  ;;  %v2198_v16 = vrot.slane %v9880_v12, 1  ;;  %v2199_v17 = vrot.slane %v9883_v13, 1  ;;  %v8837_v18 = vld [vmem:[%s11786_s1 + $0x460] ss:$8 sps:$4 sm:$0xff]   ;;  %v8842_v19 = vld [vmem:[%s11786_s1 + $0x454] ss:$8 sps:$4 sm:$0xff]  }
  0x90   : > { %1468 = vmatmul.mubr.bf16.gmra.mxu0 %v1307_v21  ;;  %1722 = vmatmul.mubr.bf16.gmra.mxu1 %v1561_v22  ;;  %v2185_v22 = vsel %vm875_vm0, %v2183_v49, %v2184_v52  ;;  %v2200_v29 = vsel %vm875_vm0, %v2198_v16, %v2199_v17  ;;  %v11803_v52 = vmov 0.0   ;;  %v8867_v16 = vld [vmem:[%s11789_s4 + $0x18] sm:$0xff]   ;;  %v8870_v17 = vld [vmem:[%s11789_s4 + $0x48] sm:$0xff]  }
  0x91   : > { %1871 = vmatpush1.bf16.msra.mxu0 %v8822_v20  ;;  %2069 = vmatpush1.bf16.msra.mxu1 %v8825_v23  ;;  %v8840_v20 = vld [vmem:[%s11786_s1 + $0x450] ss:$8 sps:$4 sm:$0xff]   ;;  %v2188_v23 = vsel %vm875_vm0, %v2186_v60, %v2187_v61  ;;  %462 = vst [vmem:[#allocation3 + $0x10] sm:$0xff] %v11803_v52  ;;  %463 = vst [vmem:[#allocation3 + $0x18] sm:$0x3] %v11803_v52 }
  0x92   : > { %1872 = vmatprep.subr.bf16.mxu0 %v8830_v24  ;;  %2070 = vmatprep.subr.bf16.mxu1 %v8833_v25  ;;  %v2210_v24 = vpack.c.bf16 %v2188_v23, %v2185_v22  ;;  %v2191_v25 = vsel %vm875_vm0, %v2189_v62, %v2190_v63  ;;  %440 = vst [vmem:[#allocation2] sm:$0xff] %v11803_v52  ;;  %441 = vst [vmem:[#allocation2 + $0x8] sm:$0x3] %v11803_v52  ;;  %v10077_v60 = vld [vmem:[%s11788_s3] sm:$0x3] }
  0x93   : > { %1890 = vmatprep.mubr.bf16.mxu0 %v9148_v2  ;;  %2088 = vmatprep.mubr.bf16.mxu1 %v9148_v2  ;;  %v2211_v27 = vpack.c.bf16 %v2194_v26, %v2191_v25  ;;  %442 = vst [vmem:[#allocation2 + $0x10] sm:$0xff] %v11803_v52  ;;  %443 = vst [vmem:[#allocation2 + $0x18] sm:$0x3] %v11803_v52  ;;  %v10093_v11 = vrot.slane %v10077_v60, %v2407_v56 }
  0x94   : > { %444 = vst [vmem:[#allocation2 + $0x20] sm:$0xff] %v11803_v52  ;;  %445 = vst [vmem:[#allocation2 + $0x28] sm:$0x3] %v11803_v52 }
  0x95   : > { %1873 = vmatpush1.bf16.msra.mxu0 %v8828_v30  ;;  %2071 = vmatpush1.bf16.msra.mxu1 %v8831_v31  ;;  %v2212_v30 = vpack.c.bf16 %v2200_v29, %v2197_v28  ;;  %v8858_v31 = vld [vmem:[%s11789_s4 + $0x78] sm:$0xff]   ;;  %446 = vst [vmem:[#allocation2 + $0x30] sm:$0xff] %v11803_v52  ;;  %447 = vst [vmem:[#allocation2 + $0x38] sm:$0x3] %v11803_v52 }
  0x96   : > { %2310 = vmatprep.subr.bf16.mxu0 %v8836_v37  ;;  %7950 = vmatprep.subr.bf16.mxu1 %v8858_v31  ;;  %v8861_v37 = vld [vmem:[%s11789_s4 + $0x30] sm:$0xff]   ;;  %448 = vst [vmem:[#allocation2 + $0x40] sm:$0xff] %v11803_v52  ;;  %449 = vst [vmem:[#allocation2 + $0x48] sm:$0x3] %v11803_v52 }
  0x97   : > { %450 = vst [vmem:[#allocation2 + $0x50] sm:$0xff] %v11803_v52  ;;  %451 = vst [vmem:[#allocation2 + $0x58] sm:$0x3] %v11803_v52 }
  0x98   : > { %1891 = vmatmul.mubr.bf16.vlgmr.msra.gmra.mxu0 %v1757_v41  ;;  %2089 = vmatmul.mubr.bf16.vlgmr.msra.gmra.mxu1 %v1955_v42  ;;  %v8851_v41 = vld [vmem:[%s11786_s1 + $0x424] ss:$8 sps:$4 sm:$0xff]   ;;  %v8849_v42 = vld [vmem:[%s11786_s1 + $0x420] ss:$8 sps:$4 sm:$0xff]   ;;  %452 = vst [vmem:[#allocation2 + $0x60] sm:$0xff] %v11803_v52  ;;  %454 = vst [vmem:[#allocation2 + $0x70] sm:$0xff] %v11803_v52 }
  0x99   : > { %2311 = vmatpush1.bf16.msra.mxu0 %v8834_v59  ;;  %1900 = vmatprep.mubr.bf16.mxu0 %v9148_v2  ;;  %453 = vst [vmem:[#allocation2 + $0x68] sm:$0x3] %v11803_v52  ;;  %455 = vst [vmem:[#allocation2 + $0x78] sm:$0x3] %v11803_v52 }
  0x9a   : > { %2312 = vmatprep.subr.bf16.mxu0 %v8839_v7  ;;  %2098 = vmatprep.mubr.bf16.mxu1 %v9148_v2  ;;  %456 = vst [vmem:[#allocation2 + $0x80] sm:$0xff] %v11803_v52  ;;  %457 = vst [vmem:[#allocation2 + $0x88] sm:$0x3] %v11803_v52  ;;  %v8865_v7 = vld [vmem:[%s11789_s4 + $0x20] sm:$0xff]  }
  0x9b   : > { %7951 = vmatpush3.bf16.msra.mxu1 %v8858_v31  ;;  %458 = vst [vmem:[#allocation2 + $0x90] sm:$0xff] %v11803_v52  ;;  %459 = vst [vmem:[#allocation2 + $0x98] sm:$0x3] %v11803_v52 }
  0x9c   : > { %460 = vst [vmem:[#allocation3] sm:$0xff] %v11803_v52  ;;  %461 = vst [vmem:[#allocation3 + $0x8] sm:$0x3] %v11803_v52 }
  0x9d   : > { %2313 = vmatpush1.bf16.msra.mxu0 %v8837_v18  ;;  %464 = vst [vmem:[#allocation3 + $0x20] sm:$0xff] %v11803_v52  ;;  %465 = vst [vmem:[#allocation3 + $0x28] sm:$0x3] %v11803_v52 }
  0x9e   : > { %2314 = vmatprep.subr.bf16.mxu0 %v8842_v19  ;;  %466 = vst [vmem:[#allocation3 + $0x30] sm:$0xff] %v11803_v52  ;;  %467 = vst [vmem:[#allocation3 + $0x38] sm:$0x3] %v11803_v52 }
  0x9f   : > { %468 = vst [vmem:[#allocation3 + $0x40] sm:$0xff] %v11803_v52  ;;  %469 = vst [vmem:[#allocation3 + $0x48] sm:$0x3] %v11803_v52 }
  0xa0   : > { %1901 = vmatmul.mubr.bf16.gmra.mxu0 %v1758_v57  ;;  %2099 = vmatmul.mubr.bf16.gmra.mxu1 %v1956_v55  ;;  %v9074_v55 = vld [vmem:[%s9362_s19 + $0x1c0] sm:$0xff]  ;;  %470 = vst [vmem:[#allocation3 + $0x50] sm:$0xff] %v11803_v52  ;;  %471 = vst [vmem:[#allocation3 + $0x58] sm:$0x3] %v11803_v52  ;;  %s9086_s19 = scalar_lea.vmem %s11739_s16, 1024 }
  0xa1   : > { %2315 = vmatpush1.bf16.msra.mxu0 %v8840_v20  ;;  %1910 = vmatprep.mubr.bf16.mxu0 %v9148_v2  ;;  %v1760_v57 = vpack.c.bf16 %v6893_v50, %v9074_v55  ;;  %472 = vst [vmem:[#allocation3 + $0x60] sm:$0xff] %v11803_v52  ;;  %473 = vst [vmem:[#allocation3 + $0x68] sm:$0x3] %v11803_v52  ;;  %v8871_v55 = vld [vmem:[%s11789_s4 + $0x8] sm:$0xff]   ;;  %p9087_p11 = scmp.ne.s32.totalorder %s11739_s16, %s9086_s19  ;;  %p9094_p1 = scmp.lt.s32.totalorder %s9092_s30, %s9086_s19 }
  0xa2   : > { %2316 = vmatprep.subr.bf16.mxu0 %v8845_v36  ;;  %2108 = vmatprep.mubr.bf16.mxu1 %v9148_v2  ;;  %474 = vst [vmem:[#allocation3 + $0x70] sm:$0xff] %v11803_v52  ;;  %475 = vst [vmem:[#allocation3 + $0x78] sm:$0x3] %v11803_v52 }
  0xa3   : > { %476 = vst [vmem:[#allocation3 + $0x80] sm:$0xff] %v11803_v52  ;;  %477 = vst [vmem:[#allocation3 + $0x88] sm:$0x3] %v11803_v52  ;;  %p9088_p12 = pnand %p9087_p11, %p9261_p5  ;;  %p9095_p2 = por %p9094_p1, %p9093_p0 }
  0xa4   : > { %478 = vst [vmem:[#allocation3 + $0x90] sm:$0xff] %v11803_v52  ;;  %479 = vst [vmem:[#allocation3 + $0x98] sm:$0x3] %v11803_v52 }
  0xa5   : > { %2317 = vmatpush1.bf16.msra.mxu0 %v8843_v34  ;;  %11819 = vst [vmem:[#allocation11_spill] sm:$0xff] %v10093_v11  ;;  %p9089_p13 = pneg %p9088_p12 }
  0xa6   : > { %2318 = vmatprep.subr.bf16.mxu0 %v8848_v38 }
  0xa7   : > { %p9096_p3 = pnand %p9095_p2, %p9089_p13 }
  0xa8   : > { %1911 = vmatmul.mubr.bf16.gmra.mxu0 %v1759_v9  ;;  %2109 = vmatmul.mubr.bf16.gmra.mxu1 %v1957_v6  ;;  %v2179_v6 = vsel %vm875_vm0, %v2177_v32, %v2178_v33  ;;  %v2182_v9 = vsel %vm875_vm0, %v2180_v45, %v2181_v46  ;;  %v8859_v32 = vld [vmem:[%s11789_s4 + $0x38] sm:$0xff]   ;;  %v8862_v33 = vld [vmem:[%s11789_s4 + $0x68] sm:$0xff]   ;;  %v10023_v46 = vld [vmem:[%s11787_s2] sm:$0x3] }
  0xa9   : > { %2319 = vmatpush1.bf16.msra.mxu0 %v8846_v39  ;;  %1920 = vmatprep.mubr.bf16.mxu0 %v9148_v2  ;;  %v2209_v21 = vpack.c.bf16 %v2182_v9, %v2179_v6  ;;  %v10082_v62 = vrot.slane %v10023_v46, %v2407_v56  ;;  %v8869_v39 = vld [vmem:[%s11789_s4 + $0x10] sm:$0xff]  }
  0xaa   : > { %2320 = vmatprep.subr.bf16.mxu0 %v8851_v41  ;;  %2118 = vmatprep.mubr.bf16.mxu1 %v9148_v2  ;;  %v8872_v41 = vld [vmem:[%s11789_s4 + $0x40] sm:$0xff]  }
  0xad   : > { %2321 = vmatpush1.bf16.msra.mxu0 %v8849_v42 }
  0xae   : > { %2322 = vmatprep.subr.bf16.mxu0 %v8854_v53 }
  0xb0   : > { %1921 = vmatmul.mubr.bf16.gmra.mxu0 %v1760_v57  ;;  %2119 = vmatmul.mubr.bf16.gmra.mxu1 %v1958_v5  ;;  %v10125_v57 = vld [vmem:[%s11789_s4 + $0xb8] sm:$0xff]  }
  0xb1   : > { %2323 = vmatpush1.bf16.msra.mxu0 %v8852_v54  ;;  %2342 = vmatprep.mubr.bf16.mxu0 %v9148_v2  ;;  %11820 = vst [vmem:[#allocation12_spill] sm:$0xff] %v10125_v57 }
  0xb2   : > { %2324 = vmatprep.subr.bf16.mxu0 %v8857_v1 }
  0xb5   : > { %2325 = vmatpush1.bf16.msra.mxu0 %v8855_v3 }
  0xb6   : > { %7974 = vmatprep.subr.bf16.mxu0 %v8859_v32 }
  0xb8   : > { %2343 = vmatmul.mubr.bf16.vlgmr.msra.gmra.mxu0 %v2209_v21  ;;  %v8873_v21 = vld [vmem:[%s11789_s4] sm:$0xff]  }
  0xb9   : > { %2352 = vmatprep.mubr.bf16.mxu0 %v9148_v2  ;;  %7975 = vmatpush3.bf16.msra.mxu0 %v8859_v32 }
  0xba   : > { %7976 = vmatprep.subr.bf16.mxu0 %v8861_v37 }
  0xbd   : > { %7977 = vmatpush3.bf16.msra.mxu0 %v8861_v37 }
  0xbe   : > { %7978 = vmatprep.subr.bf16.mxu0 %v8863_v47 }
  0xc0   : > { %2353 = vmatmul.mubr.bf16.gmra.mxu0 %v2210_v24 }
  0xc1   : > { %2362 = vmatprep.mubr.bf16.mxu0 %v9148_v2  ;;  %7979 = vmatpush3.bf16.msra.mxu0 %v8863_v47 }
  0xc2   : > { %7980 = vmatprep.subr.bf16.mxu0 %v8865_v7 }
  0xc5   : > { %7981 = vmatpush3.bf16.msra.mxu0 %v8865_v7 }
  0xc6   : > { %7982 = vmatprep.subr.bf16.mxu0 %v8867_v16 }
  0xc8   : > { %2363 = vmatmul.mubr.bf16.gmra.mxu0 %v2211_v27  ;;  %v10138_v27 = vld [vmem:[%s11789_s4 + $0xf8] sm:$0xff]  }
  0xc9   : > { %2372 = vmatprep.mubr.bf16.mxu0 %v9148_v2  ;;  %v8860_v2 = vld [vmem:[%s11789_s4 + $0x70] sm:$0xff]   ;;  %7983 = vmatpush3.bf16.msra.mxu0 %v8867_v16  ;;  %11821 = vst [vmem:[#allocation13_spill] sm:$0xff] %v10138_v27 }
  0xca   : > { %7952 = vmatprep.subr.bf16.mxu1 %v8860_v2  ;;  %7984 = vmatprep.subr.bf16.mxu0 %v8869_v39 }
  0xcb   : > { %7953 = vmatpush3.bf16.msra.mxu1 %v8860_v2 }
  0xcc   : > { %7954 = vmatprep.subr.bf16.mxu1 %v8862_v33 }
  0xcd   : > { %7985 = vmatpush3.bf16.msra.mxu0 %v8869_v39 }
  0xce   : > { %7986 = vmatprep.subr.bf16.mxu0 %v8871_v55 }
  0xcf   : > { %7955 = vmatpush3.bf16.msra.mxu1 %v8862_v33 }
  0xd0   : > { %2373 = vmatmul.mubr.bf16.gmra.mxu0 %v2212_v30  ;;  %7956 = vmatprep.subr.bf16.mxu1 %v8864_v40 }
  0xd1   : > { %7987 = vmatpush3.bf16.msra.mxu0 %v8871_v55 }
  0xd2   : > { %7988 = vmatprep.subr.bf16.mxu0 %v8873_v21 }
  0xd3   : > { %7957 = vmatpush3.bf16.msra.mxu1 %v8864_v40 }
  0xd4   : > { %7958 = vmatprep.subr.bf16.mxu1 %v8866_v48 }
  0xd5   : > { %7989 = vmatpush3.bf16.msra.mxu0 %v8873_v21 }
  0xd6   : > { %8022 = vmatprep.subr.bf16.mxu0 %v10138_v27 }
  0xd7   : > { %7959 = vmatpush3.bf16.msra.mxu1 %v8866_v48 }
  0xd8   : > { %7960 = vmatprep.subr.bf16.mxu1 %v8868_v8 }
  0xdb   : > { %7961 = vmatpush3.bf16.msra.mxu1 %v8868_v8 }
  0xdc   : > { %7962 = vmatprep.subr.bf16.mxu1 %v8870_v17 }
  0xdf   : > { %7963 = vmatpush3.bf16.msra.mxu1 %v8870_v17 }
  0xe0   : > { %7964 = vmatprep.subr.bf16.mxu1 %v8872_v41 }
  0xe3   : > { %7965 = vmatpush3.bf16.msra.mxu1 %v8872_v41 }
  0xe4   : > { %7998 = vmatprep.subr.bf16.mxu1 %v10125_v57 }
  0xf8   : > { %v651_v44 = vpop.f32.mrf.mxu0  ;;  %v804_v45 = vpop.f32.mrf.mxu1 }
  0xf9   : > { %v10031_v49 = vadd.f32 %v804_v45, %v651_v44 }
  0xfa   : > { %v653_v58 = vpop.f32.mrf.mxu0  ;;  %v806_v59 = vpop.f32.mrf.mxu1 }
  0xfb   : > { %v10079_v61 = vadd.f32 %v806_v59, %v653_v58 }
  0xfc   : > { %v655_v63 = vpop.f32.mrf.mxu0  ;;  %v808_v0 = vpop.f32.mrf.mxu1 }
  0xfd   : > { %v10090_v10 = vadd.f32 %v808_v0, %v655_v63 }
  0xfe   : > { %v10095_v12 = vpop.f32.mrf.mxu0  ;;  %v10097_v13 = vpop.f32.mrf.mxu1 }
 0x100   : > { %v661_v14 = vpop.f32.mrf.mxu0  ;;  %v814_v15 = vpop.f32.mrf.mxu1 }
 0x101   : > { %v10105_v18 = vadd.f32 %v814_v15, %v661_v14 }
 0x102   : > { %v663_v19 = vpop.f32.mrf.mxu0  ;;  %v816_v20 = vpop.f32.mrf.mxu1 }
 0x103   : > { %v10107_v36 = vadd.f32 %v816_v20, %v663_v19 }
 0x104   : > { %v665_v34 = vpop.f32.mrf.mxu0  ;;  %v818_v38 = vpop.f32.mrf.mxu1 }
 0x105   : > { %v819_v42 = vadd.f32 %v818_v38, %v665_v34 }
 0x106   : > { %v10115_v50 = vpop.f32.mrf.mxu0  ;;  %v10117_v51 = vpop.f32.mrf.mxu1 }
 0x108   : > { %v671_v53 = vpop.f32.mrf.mxu0  ;;  %v824_v54 = vpop.f32.mrf.mxu1 }
 0x109   : > { %v825_v4 = vadd.f32 %v824_v54, %v671_v53 }
 0x10a   : > { %v673_v5 = vpop.f32.mrf.mxu0  ;;  %v826_v1 = vpop.f32.mrf.mxu1 }
 0x10b   : > { %v827_v3 = vadd.f32 %v826_v1, %v673_v5 }
 0x10c   : > { %v675_v6 = vpop.f32.mrf.mxu0  ;;  %v828_v9 = vpop.f32.mrf.mxu1 }
 0x10d   : > { %v829_v22 = vadd.f32 %v828_v9, %v675_v6 }
 0x10e   : > { %v10131_v23 = vpop.f32.mrf.mxu0  ;;  %v10133_v24 = vpop.f32.mrf.mxu1 }
 0x110   : > { %v681_v25 = vpop.f32.mrf.mxu0  ;;  %v834_v26 = vpop.f32.mrf.mxu1 }
 0x111   : > { %v835_v28 = vadd.f32 %v834_v26, %v681_v25 }
 0x112   : > { %v683_v29 = vpop.f32.mrf.mxu0  ;;  %v836_v30 = vpop.f32.mrf.mxu1 }
 0x113   : > { %v837_v31 = vadd.f32 %v836_v30, %v683_v29 }
 0x114   : > { %v685_v2 = vpop.f32.mrf.mxu0  ;;  %v838_v32 = vpop.f32.mrf.mxu1 }
 0x115   : > { %v839_v33 = vadd.f32 %v838_v32, %v685_v2 }
 0x116   : > { %v10141_v35 = vpop.f32.mrf.mxu0  ;;  %v10143_v37 = vpop.f32.mrf.mxu1 }
 0x118   : > { %v1043_v40 = vpop.f32.mrf.mxu0  ;;  %v10145_v44 = vpop.f32.mrf.mxu1 }
 0x119   : > { %v10148_v45 = vadd.f32 %v1043_v40, %v10031_v49 }
 0x11a   : > { %v1045_v47 = vpop.f32.mrf.mxu0  ;;  %v1243_v48 = vpop.f32.mrf.mxu1 }
 0x11b   : > { %v1083_v56 = vadd.f32 %v1045_v47, %v10079_v61 }
 0x11c   : > { %v1047_v58 = vpop.f32.mrf.mxu0  ;;  %v10151_v59 = vpop.f32.mrf.mxu1 }
 0x11d   : > { %v10154_v63 = vadd.f32 %v1047_v58, %v10090_v10  ;;  %v1281_v0 = vadd.f32 %v1243_v48, %v1083_v56 }
 0x11e   : > { %v10156_v7 = vpop.f32.mrf.mxu0  ;;  %v10158_v8 = vpop.f32.mrf.mxu1 }
 0x120   : > { %v1053_v14 = vpop.f32.mrf.mxu0  ;;  %v10160_v15 = vpop.f32.mrf.mxu1 }
 0x121   : > { %v10163_v49 = vadd.f32 %v1053_v14, %v10105_v18 }
 0x122   : > { %v1055_v16 = vpop.f32.mrf.mxu0  ;;  %v1253_v17 = vpop.f32.mrf.mxu1 }
 0x123   : > { %v1087_v61 = vadd.f32 %v1055_v16, %v10107_v36 }
 0x124   : > { %v1057_v19 = vpop.f32.mrf.mxu0  ;;  %v10166_v20 = vpop.f32.mrf.mxu1 }
 0x125   : > { %v10168_v10 = vadd.f32 %v1057_v19, %v819_v42  ;;  %v1285_v34 = vadd.f32 %v1253_v17, %v1087_v61 }
 0x126   : > { %v10170_v38 = vpop.f32.mrf.mxu0  ;;  %v10172_v39 = vpop.f32.mrf.mxu1 }
 0x128   : > { %v1063_v41 = vpop.f32.mrf.mxu0  ;;  %v10174_v53 = vpop.f32.mrf.mxu1 }
 0x129   : > { %v10176_v54 = vadd.f32 %v1063_v41, %v825_v4 }
 0x12a   : > { %v1065_v18 = vpop.f32.mrf.mxu0  ;;  %v1263_v55 = vpop.f32.mrf.mxu1 }
 0x12b   : > { %v1091_v5 = vadd.f32 %v1065_v18, %v827_v3 }
 0x12c   : > { %v1067_v1 = vpop.f32.mrf.mxu0  ;;  %v10178_v36 = vpop.f32.mrf.mxu1 }
 0x12d   : > { %11822 = vst [vmem:[#allocation14_spill] sm:$0xff] %v10178_v36  ;;  %v10180_v6 = vadd.f32 %v1067_v1, %v829_v22  ;;  %v1289_v42 = vadd.f32 %v1263_v55, %v1091_v5 }
 0x12e   : > { %v10182_v9 = vpop.f32.mrf.mxu0  ;;  %v10184_v21 = vpop.f32.mrf.mxu1 }
 0x12f   : > { %11823 = vst [vmem:[#allocation15_spill] sm:$0xff] %v10184_v21 }
 0x130   : > { %v1073_v25 = vpop.f32.mrf.mxu0  ;;  %v10186_v26 = vpop.f32.mrf.mxu1 }
 0x131   : > { %11824 = vst [vmem:[#allocation16_spill] sm:$0xff] %v10186_v26  ;;  %v10188_v29 = vadd.f32 %v1073_v25, %v835_v28 }
 0x132   : > { %v1075_v4 = vpop.f32.mrf.mxu0  ;;  %v1273_v30 = vpop.f32.mrf.mxu1 }
 0x133   : > { %11825 = vst [vmem:[#allocation17_spill] sm:$0xff] %v10188_v29  ;;  %v1095_v2 = vadd.f32 %v1075_v4, %v837_v31 }
 0x134   : > { %v1077_v32 = vpop.f32.mrf.mxu0  ;;  %v10190_v3 = vpop.f32.mrf.mxu1 }
 0x135   : > { %11826 = vst [vmem:[#allocation18_spill] sm:$0xff] %v10190_v3  ;;  %v10192_v40 = vadd.f32 %v1077_v32, %v839_v33  ;;  %v1293_v22 = vadd.f32 %v1273_v30, %v1095_v2 }
 0x136   : > { %v10194_v47 = vpop.f32.mrf.mxu0  ;;  %v10196_v48 = vpop.f32.mrf.mxu1 }
 0x137   : > { %11827 = vst [vmem:[#allocation19_spill] sm:$0xff] %v10192_v40  ;;  %11828 = vst [vmem:[#allocation20_spill] sm:$0xff] %v10194_v47 }
 0x138   : > { %11829 = vst [vmem:[#allocation21_spill] sm:$0xff] %v10196_v48  ;;  %v10198_v56 = vpop.f32.mrf.mxu0  ;;  %v10200_v58 = vpop.f32.mrf.mxu1 }
 0x13a   : > { %v1441_v14 = vpop.f32.mrf.mxu0  ;;  %v1695_v28 = vpop.f32.mrf.mxu1 }
 0x13b   : > { %v1479_v16 = vadd.f32 %v1441_v14, %v1281_v0 }
 0x13c   : > { %v10202_v17 = vpop.f32.mrf.mxu0  ;;  %v10204_v31 = vpop.f32.mrf.mxu1 }
 0x13d   : > { %v1733_v61 = vadd.f32 %v1695_v28, %v1479_v16 }
 0x13e   : > { %v10206_v19 = vpop.f32.mrf.mxu0  ;;  %v10208_v33 = vpop.f32.mrf.mxu1 }
 0x140   : > { %v10210_v41 = vpop.f32.mrf.mxu0  ;;  %v10212_v18 = vpop.f32.mrf.mxu1 }
 0x142   : > { %v1451_v55 = vpop.f32.mrf.mxu0  ;;  %v1705_v5 = vpop.f32.mrf.mxu1 }
 0x143   : > { %v1483_v1 = vadd.f32 %v1451_v55, %v1285_v34 }
 0x144   : > { %v10214_v25 = vpop.f32.mrf.mxu0  ;;  %v10216_v4 = vpop.f32.mrf.mxu1 }
 0x145   : > { %v1737_v0 = vadd.f32 %v1705_v5, %v1483_v1 }
 0x146   : > { %v10218_v30 = vpop.f32.mrf.mxu0  ;;  %v10220_v2 = vpop.f32.mrf.mxu1 }
 0x147   : > { %11830 = vst [vmem:[#allocation22_spill] sm:$0xff] %v10220_v2 }
 0x148   : > { %v10222_v32 = vpop.f32.mrf.mxu0  ;;  %v10224_v14 = vpop.f32.mrf.mxu1 }
 0x149   : > { %11831 = vst [vmem:[#allocation23_spill] sm:$0xff] %v10224_v14 }
 0x14a   : > { %v1461_v28 = vpop.f32.mrf.mxu0  ;;  %v1715_v16 = vpop.f32.mrf.mxu1 }
 0x14b   : > { %v1487_v52 = vadd.f32 %v1461_v28, %v1289_v42 }
 0x14c   : > { %v10226_v27 = vpop.f32.mrf.mxu0  ;;  %v10228_v57 = vpop.f32.mrf.mxu1 }
 0x14d   : > { %11832 = vst [vmem:[#allocation24_spill] sm:$0xff] %v10226_v27  ;;  %11833 = vst [vmem:[#allocation25_spill] sm:$0xff] %v10228_v57  ;;  %v1741_v34 = vadd.f32 %v1715_v16, %v1487_v52 }
 0x14e   : > { %v10230_v55 = vpop.f32.mrf.mxu0  ;;  %v10232_v48 = vpop.f32.mrf.mxu1 }
 0x14f   : > { %11834 = vst [vmem:[#allocation26_spill] sm:$0xff] %v10230_v55  ;;  %11835 = vst [vmem:[#allocation27_spill] sm:$0xff] %v10232_v48 }
 0x150   : > { %v10234_v5 = vpop.f32.mrf.mxu0  ;;  %v10236_v1 = vpop.f32.mrf.mxu1 }
 0x151   : > { %11836 = vst [vmem:[#allocation28_spill] sm:$0xff] %v10234_v5  ;;  %11837 = vst [vmem:[#allocation29_spill] sm:$0xff] %v10236_v1 }
 0x152   : > { %v1471_v3 = vpop.f32.mrf.mxu0  ;;  %v1725_v40 = vpop.f32.mrf.mxu1 }
 0x153   : > { %v1491_v47 = vadd.f32 %v1471_v3, %v1293_v22 }
 0x154   : > { %v10238_v26 = vpop.f32.mrf.mxu0  ;;  %v10240_v29 = vpop.f32.mrf.mxu1 }
 0x155   : > { %11838 = vst [vmem:[#allocation30_spill] sm:$0xff] %v10238_v26  ;;  %11839 = vst [vmem:[#allocation31_spill] sm:$0xff] %v10240_v29  ;;  %v1745_v42 = vadd.f32 %v1725_v40, %v1491_v47 }
 0x156   : > { %v10242_v28 = vpop.f32.mrf.mxu0  ;;  %v10244_v57 = vpop.f32.mrf.mxu1 }
 0x157   : > { %11840 = vst [vmem:[#allocation32_spill] sm:$0xff] %v10242_v28  ;;  %11841 = vst [vmem:[#allocation33_spill] sm:$0xff] %v10244_v57 }
 0x158   : > { %v1892_v52 = vpop.f32.mrf.mxu0  ;;  %v2090_v16 = vpop.f32.mrf.mxu1 }
 0x15a   : > { %v1894_v55 = vpop.f32.mrf.mxu0  ;;  %v2092_v48 = vpop.f32.mrf.mxu1 }
 0x15b   : > { %v1932_v27 = vadd.f32 %v1894_v55, %v1733_v61 }
 0x15c   : > { %v1896_v5 = vpop.f32.mrf.mxu0  ;;  %v10246_v14 = vpop.f32.mrf.mxu1 }
 0x15d   : > { %v10248_v1 = vadd.f32 %v2092_v48, %v1932_v27 }
 0x15e   : > { %v1898_v3 = vpop.f32.mrf.mxu0  ;;  %v10250_v22 = vpop.f32.mrf.mxu1 }
 0x160   : > { %v1902_v26 = vpop.f32.mrf.mxu0  ;;  %v10252_v29 = vpop.f32.mrf.mxu1 }
 0x161   : > { %11842 = vst [vmem:[#allocation34_spill] sm:$0xff] %v10252_v29  ;;  %v811_v29 = vadd.f32 %v10097_v13, %v10095_v12  ;;  %v1282_v12 = vadd.f32 %v10151_v59, %v10154_v63 }
 0x162   : > { %v1904_v40 = vpop.f32.mrf.mxu0  ;;  %v2102_v47 = vpop.f32.mrf.mxu1 }
 0x163   : > { %v1936_v28 = vadd.f32 %v1904_v40, %v1737_v0  ;;  %v1280_v0 = vadd.f32 %v10145_v44, %v10148_v45 }
 0x164   : > { %v10254_v57 = vpop.f32.mrf.mxu0  ;;  %v10256_v21 = vpop.f32.mrf.mxu1 }
 0x165   : > { %11843 = vst [vmem:[#allocation35_spill] sm:$0xff] %v10256_v21  ;;  %v10258_v11 = vadd.f32 %v2102_v47, %v1936_v28  ;;  %v1085_v47 = vadd.f32 %v10156_v7, %v811_v29  ;;  %v1480_v7 = vadd.f32 %v10202_v17, %v1282_v12  ;;  %v1284_v29 = vadd.f32 %v10160_v15, %v10163_v49 }
 0x166   : > { %v10260_v61 = vpop.f32.mrf.mxu0  ;;  %v10262_v55 = vpop.f32.mrf.mxu1 }
 0x167   : > { %11844 = vst [vmem:[#allocation36_spill] sm:$0xff] %v10258_v11  ;;  %11845 = vst [vmem:[#allocation37_spill] sm:$0xff] %v10262_v55  ;;  %v1478_v55 = vadd.f32 %v10198_v56, %v1280_v0  ;;  %v1283_v45 = vadd.f32 %v10158_v8, %v1085_v47  ;;  %v1734_v17 = vadd.f32 %v10204_v31, %v1480_v7 }
 0x168   : > { %v10264_v27 = vpop.f32.mrf.mxu0  ;;  %v10266_v48 = vpop.f32.mrf.mxu1 }
 0x169   : > { %11846 = vst [vmem:[#allocation38_spill] sm:$0xff] %v10264_v27  ;;  %11847 = vst [vmem:[#allocation39_spill] sm:$0xff] %v10266_v48  ;;  %v1481_v59 = vadd.f32 %v10206_v19, %v1283_v45  ;;  %v11848_v45 = vld [vmem:[#allocation14_spill] sm:$0xff] }
 0x16a   : > { %v1914_v2 = vpop.f32.mrf.mxu0  ;;  %v2112_v36 = vpop.f32.mrf.mxu1 }
 0x16b   : > { %v1940_v40 = vadd.f32 %v1914_v2, %v1741_v34  ;;  %v1732_v2 = vadd.f32 %v10200_v58, %v1478_v55  ;;  %v1482_v58 = vadd.f32 %v10210_v41, %v1284_v29  ;;  %v1735_v49 = vadd.f32 %v10208_v33, %v1481_v59  ;;  %v11851_v29 = vld [vmem:[#allocation11_spill] sm:$0xff] }
 0x16c   : > { %v10272_v21 = vpop.f32.mrf.mxu0  ;;  %v10274_v28 = vpop.f32.mrf.mxu1  ;;  %v1288_v33 = vadd.f32 %v10174_v53, %v10176_v54  ;;  %v11853_v59 = vld [vmem:[#allocation15_spill] sm:$0xff] }
 0x16d   : > { %v10278_v11 = vadd.f32 %v2112_v36, %v1940_v40  ;;  %v821_v36 = vadd.f32 %v10117_v51, %v10115_v50  ;;  %v1931_v63 = vadd.f32 %v1892_v52, %v1732_v2  ;;  %v2403_v40 = vsub.s32 0, %v10018_v43  ;;  %v11849_v2 = vld [vmem:[#allocation22_spill] sm:$0xff] }
 0x16e   : > { %v10280_v48 = vpop.f32.mrf.mxu0  ;;  %v10282_v27 = vpop.f32.mrf.mxu1  ;;  %v1286_v51 = vadd.f32 %v10166_v20, %v10168_v10  ;;  %v1736_v41 = vadd.f32 %v10212_v18, %v1482_v58  ;;  %v1934_v47 = vadd.f32 %v1898_v3, %v1735_v49  ;;  %v831_v10 = vadd.f32 %v10133_v24, %v10131_v23 }
 0x16f   : > { %v1089_v8 = vadd.f32 %v10170_v38, %v821_v36  ;;  %v2129_v19 = vadd.f32 %v2090_v16, %v1931_v63  ;;  %v10312_v43 = vrot.slane %v10023_v46, %v2403_v40  ;;  %v10318_v20 = vrot.slane %v10077_v60, %v2403_v40  ;;  %v2500_v36 = vld [vmem:[#allocation3 + $0x1] sm:$0xff] }
 0x170   : > { %v10286_v13 = vpop.f32.mrf.mxu0  ;;  %v10288_v44 = vpop.f32.mrf.mxu1  ;;  %v1484_v31 = vadd.f32 %v10214_v25, %v1286_v51  ;;  %v841_v60 = vadd.f32 %v10143_v37, %v10141_v35  ;;  %v1093_v3 = vadd.f32 %v10182_v9, %v831_v10  ;;  %v1486_v24 = vadd.f32 %v10222_v32, %v1288_v33  ;;  %v11850_v35 = vld [vmem:[#allocation34_spill] sm:$0xff]  ;;  %v11855_v40 = vld [vmem:[#allocation24_spill] sm:$0xff] }
 0x171   : > { %v1287_v38 = vadd.f32 %v10172_v39, %v1089_v8  ;;  %v2132_v54 = vadd.f32 %v10250_v22, %v1934_v47  ;;  %v11859_v47 = vld [vmem:[#allocation35_spill] sm:$0xff]  ;;  %v11860_v10 = vld [vmem:[#allocation38_spill] sm:$0xff] }
 0x172   : > { %v1924_v56 = vpop.f32.mrf.mxu0  ;;  %v2122_v34 = vpop.f32.mrf.mxu1  ;;  %v1738_v23 = vadd.f32 %v10216_v4, %v1484_v31  ;;  %v1291_v63 = vadd.f32 %v11853_v59, %v1093_v3  ;;  %v11858_v31 = vld [vmem:[#allocation26_spill] sm:$0xff] }
 0x173   : > { %v1944_v0 = vadd.f32 %v1924_v56, %v1745_v42  ;;  %v1933_v42 = vadd.f32 %v1896_v5, %v1734_v17  ;;  %v1485_v46 = vadd.f32 %v10218_v30, %v1287_v38  ;;  %v1935_v5 = vadd.f32 %v1902_v26, %v1736_v41  ;;  %v11857_v38 = vld [vmem:[#allocation16_spill] sm:$0xff] }
 0x174   : > { %v10301_v55 = vpop.f32.mrf.mxu0  ;;  %v1937_v9 = vadd.f32 %v10254_v57, %v1738_v23  ;;  %v11864_v23 = vld [vmem:[#allocation25_spill] sm:$0xff] }
 0x175   : > { %v10304_v50 = vadd.f32 %v2122_v34, %v1944_v0  ;;  %v2131_v18 = vadd.f32 %v10246_v14, %v1933_v42  ;;  %v1739_v7 = vadd.f32 %v11849_v2, %v1485_v46  ;;  %v2133_v37 = vadd.f32 %v11850_v35, %v1935_v5  ;;  %v11854_v0 = vld [vmem:[#allocation23_spill] sm:$0xff]  ;;  %v11856_v42 = vld [vmem:[#allocation17_spill] sm:$0xff] }
 0x176   : > { %v10308_v15 = vpop.f32.mrf.mxu0  ;;  %v1292_v41 = vadd.f32 %v11857_v38, %v11856_v42  ;;  %v11867_v35 = vld [vmem:[#allocation19_spill] sm:$0xff] }
 0x177   : > { %v1938_v58 = vadd.f32 %v10260_v61, %v1739_v7 }
 0x178   : > { %v2344_v52 = vpop.f32.mrf.mxu0 }
 0x179   : > { %v2383_v12 = vadd.f32 %v2344_v52, %v2129_v19  ;;  %v1489_v52 = vadd.f32 %v11858_v31, %v1291_v63 }
 0x17a   : > { %v2346_v39 = vpop.f32.mrf.mxu0 }
 0x17b   : > { %v2411_v25 = vmul.f32 %v10312_v43, %v2383_v12  ;;  %v2384_v16 = vadd.f32 %v2346_v39, %v10248_v1  ;;  %v1290_v1 = vadd.f32 %v11848_v45, %v10180_v6  ;;  %v1740_v6 = vadd.f32 %v11854_v0, %v1486_v24 }
 0x17c   : > { %v2348_v53 = vpop.f32.mrf.mxu0  ;;  %v2135_v12 = vadd.f32 %v11859_v47, %v1937_v9  ;;  %v11869_v9 = vld [vmem:[#allocation27_spill] sm:$0xff] }
 0x17d   : > { %v2439_v26 = vadd.f32 %v10318_v20, %v2411_v25  ;;  %v2412_v30 = vmul.f32 %v10082_v62, %v2384_v16  ;;  %v2385_v14 = vadd.f32 %v2348_v53, %v2131_v18  ;;  %v1488_v8 = vadd.f32 %v11855_v40, %v1290_v1  ;;  %v11862_v18 = vld [vmem:[#allocation36_spill] sm:$0xff] }
 0x17e   : > { %v2350_v4 = vpop.f32.mrf.mxu0  ;;  %v1939_v33 = vadd.f32 %v11860_v10, %v1740_v6  ;;  %v11863_v16 = vld [vmem:[#allocation20_spill] sm:$0xff] }
 0x17f   : > { %v10341_v32 = vmax.f32 %v2439_v26, 0.0  ;;  %v10344_v22 = vadd.f32 %v11851_v29, %v2412_v30  ;;  %v2413_v56 = vmul.f32 %v10312_v43, %v2385_v14  ;;  %v2386_v34 = vadd.f32 %v2350_v4, %v2132_v54  ;;  %v11865_v53 = vld [vmem:[#allocation28_spill] sm:$0xff]  ;;  %v11866_v26 = vld [vmem:[#allocation37_spill] sm:$0xff] }
 0x180   : > { %v2354_v17 = vpop.f32.mrf.mxu0  ;;  %v1097_v3 = vadd.f32 %v11863_v16, %v841_v60  ;;  %v1742_v24 = vadd.f32 %v11864_v23, %v1488_v8  ;;  %v1490_v54 = vadd.f32 %v11865_v53, %v1292_v41  ;;  %v2136_v30 = vadd.f32 %v11866_v26, %v1938_v58  ;;  %v11872_v8 = vld [vmem:[#allocation21_spill] sm:$0xff] }
 0x181   : > { %11852 = vst [vmem:[#allocation14_spill] sm:$0xff] %v10344_v22  ;;  %2464 = vst [vmem:[#allocation3 + $0x11] sm:$0xff] %v10341_v32  ;;  %v2441_v57 = vadd.f32 %v10318_v20, %v2413_v56  ;;  %v2414_v51 = vmul.f32 %v10082_v62, %v2386_v34  ;;  %v2387_v49 = vadd.f32 %v2354_v17, %v2133_v37  ;;  %v11868_v37 = vld [vmem:[#allocation18_spill] sm:$0xff]  ;;  %v11873_v17 = vld [vmem:[#allocation29_spill] sm:$0xff] }
 0x182   : > { %v2508_v19 = vpack.c.bf16 %v10341_v32, %v2500_v36  ;;  %v2356_v61 = vpop.f32.mrf.mxu0  ;;  %v1294_v60 = vadd.f32 %v11868_v37, %v11867_v35  ;;  %v1743_v4 = vadd.f32 %v11869_v9, %v1489_v52  ;;  %v11870_v36 = vld [vmem:[#allocation39_spill] sm:$0xff]  ;;  %v1941_v34 = vadd.f32 %v10272_v21, %v1742_v24 }
 0x183   : > { %v10360_v46 = vmax.f32 %v2441_v57, 0.0  ;;  %v10363_v5 = vadd.f32 %v11851_v29, %v2414_v51  ;;  %v2415_v39 = vmul.f32 %v10312_v43, %v2387_v49  ;;  %v2388_v25 = vadd.f32 %v2356_v61, %v11862_v18  ;;  %v11874_v51 = vld [vmem:[#allocation30_spill] sm:$0xff]  ;;  %v8876_v18 = vld [vmem:[%s11789_s4 + $0xb0] sm:$0xff]  }
 0x184   : > { %7966 = vmatprep.mubr.bf16.mxu1 %v2508_v19  ;;  %v2358_v14 = vpop.f32.mrf.mxu0  ;;  %v2137_v56 = vadd.f32 %v11870_v36, %v1939_v33  ;;  %v1295_v58 = vadd.f32 %v11872_v8, %v1097_v3  ;;  %v1744_v57 = vadd.f32 %v11873_v17, %v1490_v54  ;;  %v1492_v49 = vadd.f32 %v11874_v51, %v1294_v60  ;;  %v2124_v54 = vpop.f32.mrf.mxu1 }
 0x185   : > { %11861 = vst [vmem:[#allocation22_spill] sm:$0xff] %v10363_v5  ;;  %2465 = vst [vmem:[#allocation3 + $0x21] sm:$0xff] %v10360_v46  ;;  %v2443_v45 = vadd.f32 %v10318_v20, %v2415_v39  ;;  %v2416_v1 = vmul.f32 %v10082_v62, %v2388_v25  ;;  %v2389_v2 = vadd.f32 %v2358_v14, %v2135_v12  ;;  %v11875_v52 = vmov 0.0   ;;  %v11876_v12 = vld [vmem:[#allocation32_spill] sm:$0xff] }
 0x186   : > { %v3063_v7 = vpack.c.bf16 %v10360_v46, %v10341_v32  ;;  %v2360_v59 = vpop.f32.mrf.mxu0  ;;  %v1942_v19 = vadd.f32 %v10280_v48, %v1743_v4  ;;  %v1493_v10 = vadd.f32 %v11876_v12, %v1295_v58  ;;  %v2139_v33 = vadd.f32 %v10274_v28, %v1941_v34  ;;  %v8900_v32 = vld [vmem:[%s11789_s4 + $0x110] sm:$0xff]  }
 0x187   : > { %v10381_v63 = vmax.f32 %v2443_v45, 0.0  ;;  %v10384_v0 = vadd.f32 %v11851_v29, %v2416_v1  ;;  %v2417_v6 = vmul.f32 %v10312_v43, %v2389_v2  ;;  %v2390_v40 = vadd.f32 %v2360_v59, %v2136_v30  ;;  %v11879_v45 = vld [vmem:[#allocation12_spill] sm:$0xff]  ;;  %v11880_v1 = vld [vmem:[#allocation33_spill] sm:$0xff] }
 0x188   : > { %v2364_v42 = vpop.f32.mrf.mxu0  ;;  %v10391_v38 = vld [vmem:[#allocation3 + $0x10] sm:$0xff]  ;;  %v1943_v61 = vadd.f32 %v10286_v13, %v1744_v57  ;;  %v11878_v13 = vld [vmem:[#allocation31_spill] sm:$0xff]  ;;  %v2140_v53 = vadd.f32 %v10282_v27, %v1942_v19  ;;  %v8878_v27 = vld [vmem:[%s11789_s4 + $0xa8] sm:$0xff]  }
 0x189   : > { %11871 = vst [vmem:[#allocation34_spill] sm:$0xff] %v10384_v0  ;;  %2466 = vst [vmem:[#allocation3 + $0x31] sm:$0xff] %v10381_v63  ;;  %v2445_v21 = vadd.f32 %v10318_v20, %v2417_v6  ;;  %v2418_v41 = vmul.f32 %v10082_v62, %v2390_v40  ;;  %v2391_v31 = vadd.f32 %v2364_v42, %v2137_v56  ;;  %v2126_v6 = vpop.f32.mrf.mxu1  ;;  %v8880_v19 = vld [vmem:[%s11789_s4 + $0xa0] sm:$0xff]  }
 0x18a   : > { %v2480_v47 = vpack.c.bf16 %v10391_v38, %v11875_v52  ;;  %v2366_v48 = vpop.f32.mrf.mxu0  ;;  %v10403_v39 = vpack.c.bf16 %v10381_v63, %v10360_v46  ;;  %v1746_v23 = vadd.f32 %v11878_v13, %v1492_v49  ;;  %v2141_v2 = vadd.f32 %v10288_v44, %v1943_v61  ;;  %v8899_v46 = vld [vmem:[%s11789_s4 + $0x158] sm:$0xff]  }
 0x18b   : > { %v10408_v25 = vmax.f32 %v2445_v21, 0.0  ;;  %v10411_v16 = vadd.f32 %v11851_v29, %v2418_v41  ;;  %v2419_v3 = vmul.f32 %v10312_v43, %v2391_v31  ;;  %v2392_v28 = vadd.f32 %v2366_v48, %v10278_v11 }
 0x18c   : > { %7990 = vmatprep.mubr.bf16.mxu0 %v2480_v47  ;;  %v2368_v24 = vpop.f32.mrf.mxu0  ;;  %7967 = vmatmul.mubr.bf16.vlgmr.msra.gmra.mxu1 %v10403_v39  ;;  %v1747_v11 = vadd.f32 %v11880_v1, %v1493_v10  ;;  %v1945_v35 = vadd.f32 %v10301_v55, %v1746_v23  ;;  %v10437_v34 = vld [vmem:[#allocation3 + $0x20] sm:$0xff]  ;;  %v11883_v47 = vld [vmem:[#allocation13_spill] sm:$0xff] }
 0x18d   : > { %11877 = vst [vmem:[#allocation11_spill] sm:$0xff] %v10411_v16  ;;  %2467 = vst [vmem:[#allocation3 + $0x41] sm:$0xff] %v10408_v25  ;;  %v2447_v26 = vadd.f32 %v10318_v20, %v2419_v3  ;;  %v2420_v30 = vmul.f32 %v10082_v62, %v2392_v28  ;;  %v2393_v14 = vadd.f32 %v2368_v24, %v2139_v33  ;;  %7999 = vmatpush3.bf16.msra.mxu1 %v11879_v45  ;;  %v2755_v45 = vld [vmem:[#allocation3 + $0x2] sm:$0xff]  ;;  %v10499_v1 = vld [vmem:[#allocation3 + $0x12] sm:$0xff] }
 0x18e   : > { %v2370_v37 = vpop.f32.mrf.mxu0  ;;  %8000 = vmatprep.subr.bf16.mxu1 %v8876_v18  ;;  %v3064_v60 = vpack.c.bf16 %v10408_v25, %v10381_v63  ;;  %v1946_v44 = vadd.f32 %v10308_v15, %v1747_v11  ;;  %v8877_v15 = vld [vmem:[%s11789_s4 + $0xf0] sm:$0xff]   ;;  %v2143_v57 = vadd.f32 %v2124_v54, %v1945_v35  ;;  %v2763_v35 = vpack.c.bf16 %v10499_v1, %v2755_v45  ;;  %v8903_v45 = vld [vmem:[%s11789_s4 + $0x148] sm:$0xff]  }
 0x18f   : > { %v10430_v9 = vmax.f32 %v2447_v26, 0.0  ;;  %v10433_v4 = vadd.f32 %v11851_v29, %v2420_v30  ;;  %v2421_v36 = vmul.f32 %v10312_v43, %v2393_v14  ;;  %v2394_v56 = vadd.f32 %v2370_v37, %v2140_v53  ;;  %v8883_v37 = vld [vmem:[%s11789_s4 + $0xd8] sm:$0xff]   ;;  %v8909_v63 = vld [vmem:[%s11789_s4 + $0x1f0] sm:$0xff]  }
 0x190   : > { %v2374_v55 = vpop.f32.mrf.mxu0  ;;  %v10439_v59 = vld [vmem:[#allocation3 + $0x30] sm:$0xff]  ;;  %v2144_v52 = vadd.f32 %v2126_v6, %v1946_v44  ;;  %v2913_v6 = vpack.c.bf16 %v10437_v34, %v10391_v38  ;;  %v8890_v38 = vld [vmem:[%s11789_s4 + $0x138] sm:$0xff]  }
 0x191   : > { %11881 = vst [vmem:[#allocation15_spill] sm:$0xff] %v10433_v4  ;;  %2468 = vst [vmem:[#allocation3 + $0x51] sm:$0xff] %v10430_v9  ;;  %v2449_v40 = vadd.f32 %v10318_v20, %v2421_v36  ;;  %v2422_v8 = vmul.f32 %v10082_v62, %v2394_v56  ;;  %v2395_v58 = vadd.f32 %v2374_v55, %v2141_v2  ;;  %8001 = vmatpush3.bf16.msra.mxu1 %v8876_v18  ;;  %v8882_v18 = vld [vmem:[%s11789_s4 + $0x98] sm:$0xff]   ;;  %v8885_v55 = vld [vmem:[%s11789_s4 + $0xd0] sm:$0xff]  }
 0x192   : > { %v10446_v17 = vpack.c.bf16 %v10439_v59, %v10437_v34  ;;  %v2376_v51 = vpop.f32.mrf.mxu0  ;;  %8002 = vmatprep.subr.bf16.mxu1 %v8878_v27  ;;  %v10453_v49 = vpack.c.bf16 %v10430_v9, %v10408_v25  ;;  %v10545_v34 = vld [vmem:[#allocation3 + $0x32] sm:$0xff] }
 0x193   : > { %v10458_v42 = vmax.f32 %v2449_v40, 0.0  ;;  %v10461_v21 = vadd.f32 %v11851_v29, %v2422_v8  ;;  %v2423_v41 = vmul.f32 %v10312_v43, %v2395_v58  ;;  %v2396_v31 = vadd.f32 %v2376_v51, %v10304_v50  ;;  %v8879_v50 = vld [vmem:[%s11789_s4 + $0xe8] sm:$0xff]   ;;  %v8888_v40 = vld [vmem:[%s11789_s4 + $0x80] sm:$0xff]  }
 0x194   : > { %7991 = vmatmul.mubr.bf16.vlgmr.msra.gmra.mxu0 %v10446_v17  ;;  %v2378_v12 = vpop.f32.mrf.mxu0  ;;  %7970 = vmatprep.mubr.bf16.mxu1 %v10453_v49  ;;  %v10485_v53 = vld [vmem:[#allocation3 + $0x40] sm:$0xff]  ;;  %v8887_v8 = vld [vmem:[%s11789_s4 + $0xc8] sm:$0xff]  }
 0x195   : > { %11882 = vst [vmem:[#allocation23_spill] sm:$0xff] %v10461_v21  ;;  %8023 = vmatpush3.bf16.msra.mxu0 %v11883_v47  ;;  %2469 = vst [vmem:[#allocation3 + $0x61] sm:$0xff] %v10458_v42  ;;  %v2451_v10 = vadd.f32 %v10318_v20, %v2423_v41  ;;  %v2424_v33 = vmul.f32 %v10082_v62, %v2396_v31  ;;  %v2397_v61 = vadd.f32 %v2378_v12, %v2143_v57  ;;  %v2757_v57 = vld [vmem:[#allocation3 + $0x22] sm:$0xff]  ;;  %v8892_v31 = vld [vmem:[%s11789_s4 + $0x130] sm:$0xff]  }
 0x196   : > { %8024 = vmatprep.subr.bf16.mxu0 %v8877_v15  ;;  %8003 = vmatpush3.bf16.msra.mxu1 %v8878_v27  ;;  %v2380_v48 = vpop.f32.mrf.mxu0  ;;  %v3065_v3 = vpack.c.bf16 %v10458_v42, %v10430_v9  ;;  %v10553_v51 = vpack.c.bf16 %v10545_v34, %v2757_v57  ;;  %v8894_v47 = vld [vmem:[%s11789_s4 + $0x128] sm:$0xff]  }
 0x197   : > { %8004 = vmatprep.subr.bf16.mxu1 %v8880_v19  ;;  %v10479_v28 = vmax.f32 %v2451_v10, 0.0  ;;  %v10482_v13 = vadd.f32 %v11851_v29, %v2424_v33  ;;  %v2425_v23 = vmul.f32 %v10312_v43, %v2397_v61  ;;  %v2398_v24 = vadd.f32 %v2380_v48, %v2144_v52  ;;  %v8881_v43 = vld [vmem:[%s11789_s4 + $0xe0] sm:$0xff]   ;;  %v8891_v52 = vld [vmem:[%s11789_s4 + $0x178] sm:$0xff]   ;;  %v8893_v33 = vld [vmem:[%s11789_s4 + $0x170] sm:$0xff]  }
 0x198   : > { %v10487_v54 = vld [vmem:[#allocation3 + $0x50] sm:$0xff]  ;;  %v2914_v10 = vpack.c.bf16 %v10485_v53, %v10439_v59  ;;  %v8896_v59 = vld [vmem:[%s11789_s4 + $0x120] sm:$0xff]   ;;  %v8911_v9 = vld [vmem:[%s11789_s4 + $0x1e8] sm:$0xff]  }
 0x199   : > { %11884 = vst [vmem:[#allocation24_spill] sm:$0xff] %v10482_v13  ;;  %8025 = vmatpush3.bf16.msra.mxu0 %v8877_v15  ;;  %2470 = vst [vmem:[#allocation3 + $0x71] sm:$0xff] %v10479_v28  ;;  %v2453_v26 = vadd.f32 %v10318_v20, %v2425_v23  ;;  %v2426_v30 = vmul.f32 %v10082_v62, %v2398_v24  ;;  %v10494_v14 = vpack.c.bf16 %v10487_v54, %v10485_v53  ;;  %v8884_v62 = vld [vmem:[%s11789_s4 + $0x90] sm:$0xff]   ;;  %v8889_v15 = vld [vmem:[%s11789_s4 + $0xc0] sm:$0xff]  }
 0x19a   : > { %8026 = vmatprep.subr.bf16.mxu0 %v8879_v50  ;;  %8005 = vmatpush3.bf16.msra.mxu1 %v8880_v19  ;;  %v10503_v11 = vpack.c.bf16 %v10479_v28, %v10458_v42  ;;  %v10547_v58 = vld [vmem:[#allocation3 + $0x52] sm:$0xff]  ;;  %v10555_v19 = vld [vmem:[#allocation3 + $0x42] sm:$0xff] }
 0x19b   : > { %8006 = vmatprep.subr.bf16.mxu1 %v8882_v18  ;;  %v10508_v20 = vmax.f32 %v2453_v26, 0.0  ;;  %v10511_v2 = vadd.f32 %v11851_v29, %v2426_v30  ;;  %7994 = vmatprep.mubr.bf16.mxu0 %v10494_v14  ;;  %v8886_v29 = vld [vmem:[%s11789_s4 + $0x88] sm:$0xff]   ;;  %v10559_v41 = vpack.c.bf16 %v10547_v58, %v10555_v19  ;;  %v8898_v24 = vld [vmem:[%s11789_s4 + $0x118] sm:$0xff]   ;;  %v3213_v26 = vpack.c.bf16 %v2757_v57, %v10499_v1  ;;  %v8901_v30 = vld [vmem:[%s11789_s4 + $0x150] sm:$0xff]  }
 0x19c   : > { %7971 = vmatmul.mubr.bf16.gmra.mxu1 %v10503_v11  ;;  %v2478_v36 = vld [vmem:[#allocation3 + $0x60] sm:$0xff]  ;;  %v8906_v1 = vld [vmem:[%s11789_s4 + $0x1b8] sm:$0xff]  }
 0x19d   : > { %11885 = vst [vmem:[#allocation17_spill] sm:$0xff] %v10511_v2  ;;  %8027 = vmatpush3.bf16.msra.mxu0 %v8879_v50  ;;  %2471 = vst [vmem:[#allocation3 + $0x81] sm:$0xff] %v10508_v20  ;;  %v3066_v27 = vpack.c.bf16 %v10508_v20, %v10479_v28  ;;  %8014 = vmatprep.mubr.bf16.mxu1 %v2763_v35  ;;  %v2915_v61 = vpack.c.bf16 %v2478_v36, %v10487_v54  ;;  %v10580_v50 = vld [vmem:[#allocation3 + $0x62] sm:$0xff]  ;;  %v8908_v35 = vld [vmem:[%s11789_s4 + $0x1b0] sm:$0xff]  }
 0x19e   : > { %8028 = vmatprep.subr.bf16.mxu0 %v8881_v43  ;;  %8007 = vmatpush3.bf16.msra.mxu1 %v8882_v18  ;;  %v8895_v18 = vld [vmem:[%s11789_s4 + $0x168] sm:$0xff]   ;;  %v8897_v54 = vld [vmem:[%s11789_s4 + $0x160] sm:$0xff]   ;;  %v3215_v25 = vpack.c.bf16 %v10580_v50, %v10547_v58 }
 0x19f   : > { %8008 = vmatprep.subr.bf16.mxu1 %v8884_v62  ;;  %v8913_v28 = vld [vmem:[%s11789_s4 + $0x1e0] sm:$0xff]   ;;  %v8924_v58 = vld [vmem:[%s11789_s4 + $0x228] sm:$0xff]  }
 0x1a0   : > { %v10525_v56 = vld [vmem:[#allocation3 + $0x70] sm:$0xff] }
 0x1a1   : > { %8029 = vmatpush3.bf16.msra.mxu0 %v8881_v43  ;;  %v10528_v44 = vpack.c.bf16 %v10525_v56, %v2478_v36  ;;  %v10572_v12 = vld [vmem:[#allocation3 + $0x72] sm:$0xff]  ;;  %v8904_v43 = vld [vmem:[%s11789_s4 + $0x100] sm:$0xff]   ;;  %v3214_v36 = vpack.c.bf16 %v10555_v19, %v10545_v34 }
 0x1a2   : > { %8030 = vmatprep.subr.bf16.mxu0 %v8883_v37  ;;  %8009 = vmatpush3.bf16.msra.mxu1 %v8884_v62  ;;  %v10584_v48 = vpack.c.bf16 %v10572_v12, %v10580_v50  ;;  %v8905_v62 = vld [vmem:[%s11789_s4 + $0x140] sm:$0xff]   ;;  %v8923_v34 = vld [vmem:[%s11789_s4 + $0x230] sm:$0xff]   ;;  %v8935_v50 = vld [vmem:[%s11792_s7 + $0x28] sm:$0xff]  }
 0x1a3   : > { %8010 = vmatprep.subr.bf16.mxu1 %v8886_v29  ;;  %7995 = vmatmul.mubr.bf16.gmra.mxu0 %v10528_v44 }
 0x1a4   : > { %8038 = vmatprep.mubr.bf16.mxu0 %v2913_v6  ;;  %v10593_v23 = vld [vmem:[#allocation3 + $0x80] sm:$0xff]  ;;  %v8917_v6 = vld [vmem:[%s11789_s4 + $0x1d0] sm:$0xff]  }
 0x1a5   : > { %8031 = vmatpush3.bf16.msra.mxu0 %v8883_v37  ;;  %v2916_v53 = vpack.c.bf16 %v10593_v23, %v10525_v56  ;;  %v8907_v37 = vld [vmem:[%s11789_s4 + $0x1f8] sm:$0xff]   ;;  %v10662_v42 = vld [vmem:[#allocation3 + $0x82] sm:$0xff] }
 0x1a6   : > { %8032 = vmatprep.subr.bf16.mxu0 %v8885_v55  ;;  %8011 = vmatpush3.bf16.msra.mxu1 %v8886_v29  ;;  %v8910_v29 = vld [vmem:[%s11789_s4 + $0x1a8] sm:$0xff]   ;;  %v3216_v56 = vpack.c.bf16 %v10662_v42, %v10572_v12  ;;  %v8932_v12 = vld [vmem:[%s11792_s7 + $0x70] sm:$0xff]  }
 0x1a7   : > { %8012 = vmatprep.subr.bf16.mxu1 %v8888_v40 }
 0x1a9   : > { %8033 = vmatpush3.bf16.msra.mxu0 %v8885_v55  ;;  %v8918_v55 = vld [vmem:[%s11789_s4 + $0x188] sm:$0xff]  }
 0x1aa   : > { %8034 = vmatprep.subr.bf16.mxu0 %v8887_v8  ;;  %8013 = vmatpush3.bf16.msra.mxu1 %v8888_v40  ;;  %v8919_v40 = vld [vmem:[%s11789_s4 + $0x1c8] sm:$0xff]  }
 0x1ab   : > { %8046 = vmatprep.subr.bf16.mxu1 %v8890_v38 }
 0x1ad   : > { %8035 = vmatpush3.bf16.msra.mxu0 %v8887_v8  ;;  %8015 = vmatmul.mubr.bf16.vlgmr.msra.gmra.mxu1 %v10553_v51  ;;  %v8922_v8 = vld [vmem:[%s11789_s4 + $0x238] sm:$0xff]  }
 0x1ae   : > { %8036 = vmatprep.subr.bf16.mxu0 %v8889_v15  ;;  %8018 = vmatprep.mubr.bf16.mxu1 %v10559_v41 }
 0x1af   : > { %8047 = vmatpush3.bf16.msra.mxu1 %v8890_v38  ;;  %v8921_v38 = vld [vmem:[%s11789_s4 + $0x1c0] sm:$0xff]  }
 0x1b0   : > { %8048 = vmatprep.subr.bf16.mxu1 %v8892_v31 }
 0x1b1   : > { %8037 = vmatpush3.bf16.msra.mxu0 %v8889_v15  ;;  %v10707_v15 = vld [vmem:[#allocation2] sm:$0xff] }
 0x1b2   : > { %8070 = vmatprep.subr.bf16.mxu0 %v8891_v52  ;;  %11886 = vst [vmem:[#allocation16_spill] sm:$0xff] %v10707_v15  ;;  %v3367_v57 = vpack.c.bf16 %v10707_v15, %v10593_v23  ;;  %v8939_v23 = vld [vmem:[%s11792_s7 + $0x18] sm:$0xff]  }
 0x1b3   : > { %8049 = vmatpush3.bf16.msra.mxu1 %v8892_v31  ;;  %v8927_v31 = vld [vmem:[%s11789_s4 + $0x210] sm:$0xff]  }
 0x1b4   : > { %8039 = vmatmul.mubr.bf16.vlgmr.msra.gmra.mxu0 %v2914_v10  ;;  %8050 = vmatprep.subr.bf16.mxu1 %v8894_v47  ;;  %v8933_v10 = vld [vmem:[%s11792_s7 + $0x30] sm:$0xff]  }
 0x1b5   : > { %8042 = vmatprep.mubr.bf16.mxu0 %v2915_v61  ;;  %8071 = vmatpush3.bf16.msra.mxu0 %v8891_v52  ;;  %v8936_v61 = vld [vmem:[%s11792_s7 + $0x60] sm:$0xff]  }
 0x1b6   : > { %8072 = vmatprep.subr.bf16.mxu0 %v8893_v33  ;;  %8019 = vmatmul.mubr.bf16.gmra.mxu1 %v10584_v48 }
 0x1b7   : > { %8051 = vmatpush3.bf16.msra.mxu1 %v8894_v47  ;;  %8062 = vmatprep.mubr.bf16.mxu1 %v3063_v7  ;;  %v8902_v7 = vld [vmem:[%s11789_s4 + $0x108] sm:$0xff]   ;;  %v8930_v47 = vld [vmem:[%s11792_s7 + $0x78] sm:$0xff]  }
 0x1b8   : > { %8052 = vmatprep.subr.bf16.mxu1 %v8896_v59 }
 0x1b9   : > { %8073 = vmatpush3.bf16.msra.mxu0 %v8893_v33  ;;  %v8934_v33 = vld [vmem:[%s11792_s7 + $0x68] sm:$0xff]  }
 0x1ba   : > { %8074 = vmatprep.subr.bf16.mxu0 %v8895_v18 }
 0x1bb   : > { %8053 = vmatpush3.bf16.msra.mxu1 %v8896_v59  ;;  %v8937_v59 = vld [vmem:[%s11792_s7 + $0x20] sm:$0xff]  }
 0x1bc   : > { %8043 = vmatmul.mubr.bf16.gmra.mxu0 %v2916_v53  ;;  %8054 = vmatprep.subr.bf16.mxu1 %v8898_v24 }
 0x1bd   : > { %8075 = vmatpush3.bf16.msra.mxu0 %v8895_v18  ;;  %8086 = vmatprep.mubr.bf16.mxu0 %v3213_v26  ;;  %v8940_v18 = vld [vmem:[%s11792_s7 + $0x50] sm:$0xff]   ;;  %v8944_v26 = vld [vmem:[%s11792_s7 + $0x40] sm:$0xff]  }
 0x1be   : > { %8076 = vmatprep.subr.bf16.mxu0 %v8897_v54 }
 0x1bf   : > { %8055 = vmatpush3.bf16.msra.mxu1 %v8898_v24  ;;  %v8942_v24 = vld [vmem:[%s11792_s7 + $0x48] sm:$0xff]  }
 0x1c0   : > { %8056 = vmatprep.subr.bf16.mxu1 %v8900_v32 }
 0x1c1   : > { %8077 = vmatpush3.bf16.msra.mxu0 %v8897_v54  ;;  %v8941_v54 = vld [vmem:[%s11792_s7 + $0x10] sm:$0xff]  }
 0x1c2   : > { %8078 = vmatprep.subr.bf16.mxu0 %v8899_v46 }
 0x1c3   : > { %8057 = vmatpush3.bf16.msra.mxu1 %v8900_v32 }
 0x1c4   : > { %8058 = vmatprep.subr.bf16.mxu1 %v8902_v7 }
 0x1c5   : > { %8079 = vmatpush3.bf16.msra.mxu0 %v8899_v46  ;;  %v8943_v46 = vld [vmem:[%s11792_s7 + $0x8] sm:$0xff]  }
 0x1c6   : > { %8080 = vmatprep.subr.bf16.mxu0 %v8901_v30 }
 0x1c7   : > { %8059 = vmatpush3.bf16.msra.mxu1 %v8902_v7  ;;  %v10784_v7 = vld [vmem:[%s11792_s7 + $0xb8] sm:$0xff]  }
 0x1c8   : > { %8060 = vmatprep.subr.bf16.mxu1 %v8904_v43  ;;  %11887 = vst [vmem:[#allocation26_spill] sm:$0xff] %v10784_v7 }
 0x1c9   : > { %8081 = vmatpush3.bf16.msra.mxu0 %v8901_v30 }
 0x1ca   : > { %8082 = vmatprep.subr.bf16.mxu0 %v8903_v45 }
 0x1cb   : > { %8061 = vmatpush3.bf16.msra.mxu1 %v8904_v43 }
 0x1cc   : > { %8094 = vmatprep.subr.bf16.mxu1 %v8906_v1 }
 0x1cd   : > { %8083 = vmatpush3.bf16.msra.mxu0 %v8903_v45  ;;  %v8945_v45 = vld [vmem:[%s11792_s7] sm:$0xff]  }
 0x1ce   : > { %8084 = vmatprep.subr.bf16.mxu0 %v8905_v62  ;;  %8063 = vmatmul.mubr.bf16.vlgmr.msra.gmra.mxu1 %v3064_v60  ;;  %v8912_v60 = vld [vmem:[%s11789_s4 + $0x1a0] sm:$0xff]  }
 0x1cf   : > { %8066 = vmatprep.mubr.bf16.mxu1 %v3065_v3  ;;  %8095 = vmatpush3.bf16.msra.mxu1 %v8906_v1  ;;  %v8914_v3 = vld [vmem:[%s11789_s4 + $0x198] sm:$0xff]  }
 0x1d0   : > { %8096 = vmatprep.subr.bf16.mxu1 %v8908_v35 }
 0x1d1   : > { %8085 = vmatpush3.bf16.msra.mxu0 %v8905_v62 }
 0x1d2   : > { %8118 = vmatprep.subr.bf16.mxu0 %v8907_v37 }
 0x1d3   : > { %8097 = vmatpush3.bf16.msra.mxu1 %v8908_v35 }
 0x1d4   : > { %8087 = vmatmul.mubr.bf16.vlgmr.msra.gmra.mxu0 %v3214_v36  ;;  %8098 = vmatprep.subr.bf16.mxu1 %v8910_v29 }
 0x1d5   : > { %8090 = vmatprep.mubr.bf16.mxu0 %v3215_v25  ;;  %8119 = vmatpush3.bf16.msra.mxu0 %v8907_v37  ;;  %v10799_v37 = vld [vmem:[%s11792_s7 + $0xf8] sm:$0xff]  }
 0x1d6   : > { %8120 = vmatprep.subr.bf16.mxu0 %v8909_v63  ;;  %8067 = vmatmul.mubr.bf16.gmra.mxu1 %v3066_v27  ;;  %v8915_v27 = vld [vmem:[%s11789_s4 + $0x1d8] sm:$0xff]   ;;  %11888 = vst [vmem:[#allocation35_spill] sm:$0xff] %v10799_v37 }
 0x1d7   : > { %8099 = vmatpush3.bf16.msra.mxu1 %v8910_v29  ;;  %8110 = vmatprep.mubr.bf16.mxu1 %v10446_v17  ;;  %v8916_v17 = vld [vmem:[%s11789_s4 + $0x190] sm:$0xff]  }
 0x1d8   : > { %8100 = vmatprep.subr.bf16.mxu1 %v8912_v60 }
 0x1d9   : > { %8121 = vmatpush3.bf16.msra.mxu0 %v8909_v63 }
 0x1da   : > { %8122 = vmatprep.subr.bf16.mxu0 %v8911_v9 }
 0x1db   : > { %8101 = vmatpush3.bf16.msra.mxu1 %v8912_v60 }
 0x1dc   : > { %8091 = vmatmul.mubr.bf16.gmra.mxu0 %v3216_v56  ;;  %8102 = vmatprep.subr.bf16.mxu1 %v8914_v3 }
 0x1dd   : > { %8123 = vmatpush3.bf16.msra.mxu0 %v8911_v9  ;;  %8134 = vmatprep.mubr.bf16.mxu0 %v10403_v39  ;;  %v8920_v39 = vld [vmem:[%s11789_s4 + $0x180] sm:$0xff]  }
 0x1de   : > { %8124 = vmatprep.subr.bf16.mxu0 %v8913_v28 }
 0x1df   : > { %8103 = vmatpush3.bf16.msra.mxu1 %v8914_v3 }
 0x1e0   : > { %8104 = vmatprep.subr.bf16.mxu1 %v8916_v17 }
 0x1e1   : > { %8125 = vmatpush3.bf16.msra.mxu0 %v8913_v28 }
 0x1e2   : > { %8126 = vmatprep.subr.bf16.mxu0 %v8915_v27 }
 0x1e3   : > { %8105 = vmatpush3.bf16.msra.mxu1 %v8916_v17 }
 0x1e4   : > { %8106 = vmatprep.subr.bf16.mxu1 %v8918_v55 }
 0x1e5   : > { %8127 = vmatpush3.bf16.msra.mxu0 %v8915_v27 }
 0x1e6   : > { %8128 = vmatprep.subr.bf16.mxu0 %v8917_v6 }
 0x1e7   : > { %8107 = vmatpush3.bf16.msra.mxu1 %v8918_v55 }
 0x1e8   : > { %8108 = vmatprep.subr.bf16.mxu1 %v8920_v39 }
 0x1e9   : > { %8129 = vmatpush3.bf16.msra.mxu0 %v8917_v6 }
 0x1ea   : > { %8130 = vmatprep.subr.bf16.mxu0 %v8919_v40 }
 0x1eb   : > { %8109 = vmatpush3.bf16.msra.mxu1 %v8920_v39 }
 0x1ec   : > { %8142 = vmatprep.subr.bf16.mxu1 %v8922_v8 }
 0x1ed   : > { %8131 = vmatpush3.bf16.msra.mxu0 %v8919_v40 }
 0x1ee   : > { %8132 = vmatprep.subr.bf16.mxu0 %v8921_v38  ;;  %8111 = vmatmul.mubr.bf16.vlgmr.msra.gmra.mxu1 %v10494_v14  ;;  %v8925_v14 = vld [vmem:[%s11789_s4 + $0x220] sm:$0xff]  }
 0x1ef   : > { %8114 = vmatprep.mubr.bf16.mxu1 %v10528_v44  ;;  %8143 = vmatpush3.bf16.msra.mxu1 %v8922_v8  ;;  %v3513_v44 = vld [vmem:[#allocation3 + $0x91] sm:$0xff] }
 0x1f0   : > { %8144 = vmatprep.subr.bf16.mxu1 %v8923_v34  ;;  %v3517_v19 = vpack.c.bf16 %v3513_v44, %v10508_v20  ;;  %v3663_v20 = vld [vmem:[#allocation3 + $0x92] sm:$0xff] }
 0x1f1   : > { %8133 = vmatpush3.bf16.msra.mxu0 %v8921_v38  ;;  %v3667_v52 = vpack.c.bf16 %v3663_v20, %v10662_v42 }
 0x1f2   : > { %8166 = vmatprep.subr.bf16.mxu0 %v8930_v47 }
 0x1f3   : > { %8145 = vmatpush3.bf16.msra.mxu1 %v8923_v34 }
 0x1f4   : > { %8135 = vmatmul.mubr.bf16.vlgmr.msra.gmra.mxu0 %v10453_v49  ;;  %8146 = vmatprep.subr.bf16.mxu1 %v8924_v58  ;;  %v8926_v49 = vld [vmem:[%s11789_s4 + $0x218] sm:$0xff]  }
 0x1f5   : > { %8138 = vmatprep.mubr.bf16.mxu0 %v10503_v11  ;;  %v8928_v11 = vld [vmem:[%s11789_s4 + $0x208] sm:$0xff]   ;;  %8167 = vmatpush3.bf16.msra.mxu0 %v8930_v47 }
 0x1f6   : > { %8115 = vmatmul.mubr.bf16.gmra.mxu1 %v3367_v57  ;;  %8168 = vmatprep.subr.bf16.mxu0 %v8932_v12 }
 0x1f7   : > { %8147 = vmatpush3.bf16.msra.mxu1 %v8924_v58  ;;  %8158 = vmatprep.mubr.bf16.mxu1 %v10553_v51  ;;  %v8929_v51 = vld [vmem:[%s11789_s4 + $0x200] sm:$0xff]  }
 0x1f8   : > { %8148 = vmatprep.subr.bf16.mxu1 %v8925_v14 }
 0x1f9   : > { %8169 = vmatpush3.bf16.msra.mxu0 %v8932_v12 }
 0x1fa   : > { %8170 = vmatprep.subr.bf16.mxu0 %v8934_v33 }
 0x1fb   : > { %8149 = vmatpush3.bf16.msra.mxu1 %v8925_v14 }
 0x1fc   : > { %8139 = vmatmul.mubr.bf16.gmra.mxu0 %v3517_v19  ;;  %8150 = vmatprep.subr.bf16.mxu1 %v8926_v49 }
 0x1fd   : > { %8171 = vmatpush3.bf16.msra.mxu0 %v8934_v33 }
 0x1fe   : > { %8172 = vmatprep.subr.bf16.mxu0 %v8936_v61 }
 0x1ff   : > { %8151 = vmatpush3.bf16.msra.mxu1 %v8926_v49 }
 0x200   : > { %8152 = vmatprep.subr.bf16.mxu1 %v8927_v31 }
 0x201   : > { %8173 = vmatpush3.bf16.msra.mxu0 %v8936_v61 }
 0x203   : > { %8153 = vmatpush3.bf16.msra.mxu1 %v8927_v31 }
 0x204   : > { %8154 = vmatprep.subr.bf16.mxu1 %v8928_v11 }
 0x207   : > { %8155 = vmatpush3.bf16.msra.mxu1 %v8928_v11 }
 0x208   : > { %8156 = vmatprep.subr.bf16.mxu1 %v8929_v51 }
 0x20b   : > { %8157 = vmatpush3.bf16.msra.mxu1 %v8929_v51 }
 0x20e   : > { %8159 = vmatmul.mubr.bf16.vlgmr.msra.gmra.mxu1 %v10559_v41  ;;  %v8931_v41 = vld [vmem:[%s11792_s7 + $0x38] sm:$0xff]  }
 0x20f   : > { %8162 = vmatprep.mubr.bf16.mxu1 %v10584_v48  ;;  %8190 = vmatprep.subr.bf16.mxu1 %v8931_v41  ;;  %v8938_v48 = vld [vmem:[%s11792_s7 + $0x58] sm:$0xff]  }
 0x210   : > { %8191 = vmatpush3.bf16.msra.mxu1 %v8931_v41  ;;  %8174 = vmatprep.subr.bf16.mxu0 %v8938_v48 }
 0x211   : > { %8192 = vmatprep.subr.bf16.mxu1 %v8933_v10  ;;  %8175 = vmatpush3.bf16.msra.mxu0 %v8938_v48 }
 0x212   : > { %8176 = vmatprep.subr.bf16.mxu0 %v8940_v18 }
 0x214   : > { %8193 = vmatpush3.bf16.msra.mxu1 %v8933_v10 }
 0x215   : > { %8194 = vmatprep.subr.bf16.mxu1 %v8935_v50  ;;  %8177 = vmatpush3.bf16.msra.mxu0 %v8940_v18 }
 0x216   : > { %8163 = vmatmul.mubr.bf16.gmra.mxu1 %v3667_v52  ;;  %8178 = vmatprep.subr.bf16.mxu0 %v8942_v24 }
 0x218   : > { %8195 = vmatpush3.bf16.msra.mxu1 %v8935_v50 }
 0x219   : > { %8196 = vmatprep.subr.bf16.mxu1 %v8937_v59  ;;  %8179 = vmatpush3.bf16.msra.mxu0 %v8942_v24 }
 0x21a   : > { %8180 = vmatprep.subr.bf16.mxu0 %v8944_v26 }
 0x21c   : > { %8197 = vmatpush3.bf16.msra.mxu1 %v8937_v59 }
 0x21d   : > { %8198 = vmatprep.subr.bf16.mxu1 %v8939_v23  ;;  %8181 = vmatpush3.bf16.msra.mxu0 %v8944_v26 }
 0x21e   : > { %8214 = vmatprep.subr.bf16.mxu0 %v10784_v7 }
 0x220   : > { %8199 = vmatpush3.bf16.msra.mxu1 %v8939_v23 }
 0x221   : > { %8200 = vmatprep.subr.bf16.mxu1 %v8941_v54 }
 0x224   : > { %8201 = vmatpush3.bf16.msra.mxu1 %v8941_v54 }
 0x225   : > { %8202 = vmatprep.subr.bf16.mxu1 %v8943_v46 }
 0x228   : > { %8203 = vmatpush3.bf16.msra.mxu1 %v8943_v46 }
 0x229   : > { %8204 = vmatprep.subr.bf16.mxu1 %v8945_v45 }
 0x22c   : > { %8205 = vmatpush3.bf16.msra.mxu1 %v8945_v45 }
 0x22d   : > { %8238 = vmatprep.subr.bf16.mxu1 %v10799_v37 }
 0x24c   : > { %v10768_v53 = vpop.f32.mrf.mxu1 }
 0x24e   : > { %v10776_v32 = vpop.f32.mrf.mxu1 }
 0x250   : > { %v10786_v30 = vpop.f32.mrf.mxu1 }
 0x252   : > { %v10792_v1 = vpop.f32.mrf.mxu1 }
 0x254   : > { %v7992_v43 = vpop.f32.mrf.mxu0 }
 0x255   : > { %v2733_v21 = vadd.f32 %v7992_v43, %v10768_v53 }
 0x256   : > { %v2724_v35 = vpop.f32.mrf.mxu0 }
 0x257   : > { %v2725_v7 = vadd.f32 %v2724_v35, %v10776_v32 }
 0x258   : > { %v7993_v36 = vpop.f32.mrf.mxu0 }
 0x259   : > { %v2736_v5 = vadd.f32 %v7993_v36, %v10786_v30 }
 0x25a   : > { %v2727_v25 = vpop.f32.mrf.mxu0 }
 0x25b   : > { %v2728_v0 = vadd.f32 %v2727_v25, %v10792_v1 }
 0x25c   : > { %v10794_v62 = vpop.f32.mrf.mxu1 }
 0x25e   : > { %v10802_v29 = vpop.f32.mrf.mxu1 }
 0x260   : > { %v10804_v63 = vpop.f32.mrf.mxu1 }
 0x262   : > { %v10806_v9 = vpop.f32.mrf.mxu1 }
 0x263   : > { %v7996_v60 = vpop.f32.mrf.mxu0 }
 0x265   : > { %v2740_v3 = vpop.f32.mrf.mxu0 }
 0x266   : > { %v2741_v35 = vadd.f32 %v2740_v3, %v10802_v29 }
 0x267   : > { %v10808_v28 = vpop.f32.mrf.mxu0 }
 0x269   : > { %v10810_v27 = vpop.f32.mrf.mxu0 }
 0x26d   : > { %v8016_v42 = vpop.f32.mrf.mxu1 }
 0x26e   : > { %v2899_v2 = vadd.f32 %v8016_v42, %v2733_v21  ;;  %v2749_v21 = vadd.f32 %v7996_v60, %v10794_v62  ;;  %v2744_v62 = vadd.f32 %v10810_v27, %v10806_v9 }
 0x26f   : > { %v2866_v56 = vpop.f32.mrf.mxu1 }
 0x270   : > { %v2897_v22 = vadd.f32 %v2866_v56, %v2725_v7 }
 0x271   : > { %v8017_v17 = vpop.f32.mrf.mxu1 }
 0x273   : > { %v2869_v6 = vpop.f32.mrf.mxu1 }
 0x274   : > { %v8040_v55 = vpop.f32.mrf.mxu0  ;;  %v2898_v53 = vadd.f32 %v2869_v6, %v2728_v0 }
 0x275   : > { %v3049_v16 = vadd.f32 %v8040_v55, %v2899_v2  ;;  %v10854_v55 = vld [vmem:[%s11790_s5] ss:$0 sm:$0xff] }
 0x276   : > { %v3016_v39 = vpop.f32.mrf.mxu0  ;;  %v8020_v40 = vpop.f32.mrf.mxu1 }
 0x278   : > { %v8041_v8 = vpop.f32.mrf.mxu0  ;;  %v2882_v38 = vpop.f32.mrf.mxu1 }
 0x27a   : > { %v3019_v34 = vpop.f32.mrf.mxu0  ;;  %v10812_v58 = vpop.f32.mrf.mxu1 }
 0x27b   : > { %v3048_v42 = vadd.f32 %v3019_v34, %v2898_v53  ;;  %v10862_v34 = vld [vmem:[%s11791_s6] ss:$0 sm:$0xff] }
 0x27c   : > { %v8044_v57 = vpop.f32.mrf.mxu0  ;;  %v10814_v14 = vpop.f32.mrf.mxu1 }
 0x27e   : > { %v3032_v49 = vpop.f32.mrf.mxu0 }
 0x280   : > { %v10816_v31 = vpop.f32.mrf.mxu0 }
 0x282   : > { %v10818_v51 = vpop.f32.mrf.mxu0 }
 0x28e   : > { %v8064_v44 = vpop.f32.mrf.mxu1 }
 0x290   : > { %v3166_v19 = vpop.f32.mrf.mxu1 }
 0x292   : > { %v8065_v11 = vpop.f32.mrf.mxu1 }
 0x294   : > { %v8088_v20 = vpop.f32.mrf.mxu0  ;;  %v3169_v52 = vpop.f32.mrf.mxu1 }
 0x295   : > { %v3198_v56 = vadd.f32 %v3169_v52, %v3048_v42 }
 0x296   : > { %v3316_v47 = vpop.f32.mrf.mxu0  ;;  %v10820_v12 = vpop.f32.mrf.mxu1 }
 0x298   : > { %v8089_v41 = vpop.f32.mrf.mxu0  ;;  %v3182_v10 = vpop.f32.mrf.mxu1 }
 0x29a   : > { %v3319_v33 = vpop.f32.mrf.mxu0  ;;  %v10822_v61 = vpop.f32.mrf.mxu1 }
 0x29b   : > { %11889 = vst [vmem:[#allocation38_spill] sm:$0xff] %v10822_v61 }
 0x29c   : > { %v10824_v50 = vpop.f32.mrf.mxu0  ;;  %v10826_v48 = vpop.f32.mrf.mxu1 }
 0x29d   : > { %11890 = vst [vmem:[#allocation36_spill] sm:$0xff] %v10826_v48  ;;  %v2900_v48 = vadd.f32 %v8017_v17, %v2736_v5  ;;  %v2903_v5 = vadd.f32 %v8020_v40, %v2749_v21 }
 0x29e   : > { %v10828_v18 = vpop.f32.mrf.mxu0 }
 0x29f   : > { %11891 = vst [vmem:[#allocation20_spill] sm:$0xff] %v10828_v18  ;;  %v3053_v60 = vadd.f32 %v8044_v57, %v2903_v5  ;;  %v11902_v5 = vld [vmem:[#allocation14_spill] sm:$0xff] }
 0x2a0   : > { %v10830_v24 = vpop.f32.mrf.mxu0 }
 0x2a1   : > { %11892 = vst [vmem:[#allocation25_spill] sm:$0xff] %v10830_v24  ;;  %v3199_v24 = vadd.f32 %v8064_v44, %v3049_v16  ;;  %v2901_v16 = vadd.f32 %v2882_v38, %v2741_v35  ;;  %v2902_v38 = vadd.f32 %v10814_v14, %v2744_v62  ;;  %v3203_v9 = vadd.f32 %v10820_v12, %v3053_v60  ;;  %v11903_v60 = vld [vmem:[#allocation11_spill] sm:$0xff] }
 0x2a2   : > { %v10832_v26 = vpop.f32.mrf.mxu0 }
 0x2a3   : > { %11893 = vst [vmem:[#allocation28_spill] sm:$0xff] %v10832_v26  ;;  %v3047_v26 = vadd.f32 %v3016_v39, %v2897_v22  ;;  %v3349_v43 = vadd.f32 %v8088_v20, %v3199_v24  ;;  %v2752_v22 = vadd.f32 %v10808_v28, %v10804_v63  ;;  %v3051_v29 = vadd.f32 %v3032_v49, %v2901_v16  ;;  %v11896_v20 = vld [vmem:[#allocation38_spill] sm:$0xff] }
 0x2a4   : > { %v3348_v63 = vadd.f32 %v3319_v33, %v3198_v56 }
 0x2a5   : > { %v3197_v32 = vadd.f32 %v3166_v19, %v3047_v26  ;;  %v2904_v3 = vadd.f32 %v10812_v58, %v2752_v22  ;;  %v3201_v27 = vadd.f32 %v3182_v10, %v3051_v29  ;;  %v3052_v19 = vadd.f32 %v10818_v51, %v2902_v38 }
 0x2a7   : > { %v3347_v30 = vadd.f32 %v3316_v47, %v3197_v32 }
 0x2aa   : > { %v11901_v32 = vld [vmem:[#allocation28_spill] sm:$0xff] }
 0x2ae   : > { %v8112_v59 = vpop.f32.mrf.mxu1 }
 0x2af   : > { %v3500_v7 = vadd.f32 %v8112_v59, %v3349_v43 }
 0x2b0   : > { %v3467_v23 = vpop.f32.mrf.mxu1 }
 0x2b1   : > { %v3498_v17 = vadd.f32 %v3467_v23, %v3347_v30  ;;  %v11898_v23 = vld [vmem:[#allocation36_spill] sm:$0xff] }
 0x2b2   : > { %v8113_v54 = vpop.f32.mrf.mxu1  ;;  %v3202_v24 = vadd.f32 %v11898_v23, %v3052_v19  ;;  %v11905_v19 = vld [vmem:[#allocation24_spill] sm:$0xff] }
 0x2b4   : > { %v8136_v46 = vpop.f32.mrf.mxu0  ;;  %v3470_v45 = vpop.f32.mrf.mxu1  ;;  %v3352_v21 = vadd.f32 %v11901_v32, %v3202_v24  ;;  %v11909_v24 = vld [vmem:[#allocation23_spill] sm:$0xff] }
 0x2b5   : > { %v3650_v0 = vadd.f32 %v8136_v46, %v3500_v7  ;;  %v3499_v44 = vadd.f32 %v3470_v45, %v3348_v63  ;;  %v11900_v46 = vld [vmem:[#allocation34_spill] sm:$0xff] }
 0x2b6   : > { %v3617_v37 = vpop.f32.mrf.mxu0  ;;  %v10834_v15 = vpop.f32.mrf.mxu1 }
 0x2b7   : > { %11894 = vst [vmem:[#allocation37_spill] sm:$0xff] %v10834_v15  ;;  %v3050_v15 = vadd.f32 %v8041_v8, %v2900_v48  ;;  %v3648_v28 = vadd.f32 %v3617_v37, %v3498_v17  ;;  %v3054_v8 = vadd.f32 %v10816_v31, %v2904_v3  ;;  %v3353_v31 = vadd.f32 %v10824_v50, %v3203_v9  ;;  %v11897_v48 = vld [vmem:[#allocation25_spill] sm:$0xff] }
 0x2b8   : > { %v8137_v4 = vpop.f32.mrf.mxu0  ;;  %v10838_v13 = vpop.f32.mrf.mxu1 }
 0x2b9   : > { %v3200_v2 = vadd.f32 %v8065_v11, %v3050_v15  ;;  %v11895_v11 = vld [vmem:[#allocation20_spill] sm:$0xff]  ;;  %v3204_v52 = vadd.f32 %v11896_v20, %v3054_v8 }
 0x2ba   : > { %v3620_v61 = vpop.f32.mrf.mxu0  ;;  %v10842_v18 = vpop.f32.mrf.mxu1  ;;  %v3351_v14 = vadd.f32 %v11895_v11, %v3201_v27  ;;  %v11906_v11 = vld [vmem:[#allocation15_spill] sm:$0xff] }
 0x2bb   : > { %v3350_v25 = vadd.f32 %v8089_v41, %v3200_v2  ;;  %v3649_v12 = vadd.f32 %v3620_v61, %v3499_v44  ;;  %v3354_v59 = vadd.f32 %v11897_v48, %v3204_v52 }
 0x2bc   : > { %v8140_v36 = vpop.f32.mrf.mxu0  ;;  %v3486_v1 = vpop.f32.mrf.mxu1  ;;  %v3502_v50 = vadd.f32 %v10838_v13, %v3351_v14 }
 0x2bd   : > { %v3501_v6 = vadd.f32 %v8113_v54, %v3350_v25  ;;  %v3505_v30 = vadd.f32 %v10842_v18, %v3354_v59  ;;  %v11908_v59 = vld [vmem:[#allocation26_spill] sm:$0xff] }
 0x2be   : > { %v3633_v39 = vpop.f32.mrf.mxu0  ;;  %v11899_v54 = vld [vmem:[#allocation37_spill] sm:$0xff] }
 0x2bf   : > { %v3651_v57 = vadd.f32 %v8137_v4, %v3501_v6  ;;  %v3504_v51 = vadd.f32 %v11899_v54, %v3353_v31  ;;  %v3652_v42 = vadd.f32 %v3633_v39, %v3502_v50 }
 0x2c0   : > { %v8141_v41 = vpop.f32.mrf.mxu0 }
 0x2c1   : > { %v3654_v35 = vadd.f32 %v8140_v36, %v3504_v51  ;;  %v3655_v56 = vadd.f32 %v8141_v41, %v3505_v30  ;;  %v11910_v51 = vld [vmem:[#allocation16_spill] sm:$0xff] }
 0x2c2   : > { %v3636_v7 = vpop.f32.mrf.mxu0 }
 0x2ce   : > { %v8160_v15 = vpop.f32.mrf.mxu1 }
 0x2cf   : > { %v3800_v40 = vadd.f32 %v8160_v15, %v3650_v0  ;;  %v3503_v0 = vadd.f32 %v3486_v1, %v3352_v21  ;;  %v3889_v15 = vld [vmem:[#allocation2 + $0x1] sm:$0xff]  ;;  %v11904_v1 = vld [vmem:[#allocation22_spill] sm:$0xff]  ;;  %v8949_v21 = vld [vmem:[%s11792_s7 + $0xf0] sm:$0xff]  }
 0x2d0   : > { %v3767_v58 = vpop.f32.mrf.mxu1 }
 0x2d1   : > { %v3815_v37 = vmul.f32 %v10854_v55, %v3800_v40  ;;  %v3798_v49 = vadd.f32 %v3767_v58, %v3648_v28  ;;  %v3653_v63 = vadd.f32 %v3636_v7, %v3503_v0 }
 0x2d2   : > { %v8161_v47 = vpop.f32.mrf.mxu1 }
 0x2d3   : > { %v3830_v10 = vadd.f32 %v10862_v34, %v3815_v37  ;;  %v3813_v33 = vmul.f32 %v10854_v55, %v3798_v49  ;;  %v3801_v4 = vadd.f32 %v8161_v47, %v3651_v57 }
 0x2d4   : > { %v3770_v26 = vpop.f32.mrf.mxu1 }
 0x2d5   : > { %v3838_v45 = vadd.f32 %v3830_v10, %v11900_v46  ;;  %v3828_v53 = vadd.f32 %v10862_v34, %v3813_v33  ;;  %v3816_v61 = vmul.f32 %v10854_v55, %v3801_v4  ;;  %v3799_v43 = vadd.f32 %v3770_v26, %v3649_v12  ;;  %v8948_v12 = vld [vmem:[%s11792_s7 + $0xb0] sm:$0xff]  }
 0x2d6   : > { %v8164_v2 = vpop.f32.mrf.mxu1  ;;  %v11907_v33 = vld [vmem:[#allocation17_spill] sm:$0xff] }
 0x2d7   : > { %v10880_v22 = vmax.f32 %v3838_v45, 0.0  ;;  %v3836_v13 = vadd.f32 %v3828_v53, %v11902_v5  ;;  %v3831_v16 = vadd.f32 %v10862_v34, %v3816_v61  ;;  %v3814_v25 = vmul.f32 %v10854_v55, %v3799_v43  ;;  %v4144_v45 = vld [vmem:[#allocation2 + $0x2] sm:$0xff] }
 0x2d8   : > { %v3804_v17 = vadd.f32 %v8164_v2, %v3654_v35  ;;  %v3783_v62 = vpop.f32.mrf.mxu1  ;;  %v11911_v2 = vld [vmem:[#allocation35_spill] sm:$0xff] }
 0x2d9   : > { %3855 = vst [vmem:[#allocation2 + $0x31] sm:$0xff] %v10880_v22  ;;  %v10886_v36 = vmax.f32 %v3836_v13, 0.0  ;;  %v3839_v18 = vadd.f32 %v3831_v16, %v11903_v60  ;;  %v3829_v29 = vadd.f32 %v10862_v34, %v3814_v25  ;;  %v3802_v3 = vadd.f32 %v3783_v62, %v3652_v42  ;;  %v8952_v42 = vld [vmem:[%s11792_s7 + $0xa0] sm:$0xff]   ;;  %v8951_v16 = vld [vmem:[%s11792_s7 + $0xe8] sm:$0xff]   ;;  %v8954_v25 = vld [vmem:[%s11792_s7 + $0x98] sm:$0xff]  }
 0x2da   : > { %v3819_v28 = vmul.f32 %v10854_v55, %v3804_v17  ;;  %v8165_v6 = vpop.f32.mrf.mxu1  ;;  %v8953_v62 = vld [vmem:[%s11792_s7 + $0xe0] sm:$0xff]  }
 0x2db   : > { %3853 = vst [vmem:[#allocation2 + $0x11] sm:$0xff] %v10886_v36  ;;  %v10892_v39 = vmax.f32 %v3839_v18, 0.0  ;;  %v3837_v40 = vadd.f32 %v3829_v29, %v11904_v1  ;;  %v3817_v8 = vmul.f32 %v10854_v55, %v3802_v3  ;;  %v3805_v38 = vadd.f32 %v8165_v6, %v3655_v56  ;;  %v8956_v18 = vld [vmem:[%s11792_s7 + $0x90] sm:$0xff]   ;;  %v8955_v29 = vld [vmem:[%s11792_s7 + $0xd8] sm:$0xff]   ;;  %v8958_v3 = vld [vmem:[%s11792_s7 + $0x88] sm:$0xff]  }
 0x2dc   : > { %v3834_v9 = vadd.f32 %v10862_v34, %v3819_v28  ;;  %v3786_v27 = vpop.f32.mrf.mxu1  ;;  %v3897_v58 = vpack.c.bf16 %v10886_v36, %v3889_v15  ;;  %v8957_v15 = vld [vmem:[%s11792_s7 + $0xd0] sm:$0xff]   ;;  %v8959_v28 = vld [vmem:[%s11792_s7 + $0xc8] sm:$0xff]   ;;  %v8962_v6 = vld [vmem:[%s11792_s7 + $0x138] sm:$0xff]  }
 0x2dd   : > { %3856 = vst [vmem:[#allocation2 + $0x41] sm:$0xff] %v10892_v39  ;;  %v10899_v57 = vmax.f32 %v3837_v40, 0.0  ;;  %v3832_v44 = vadd.f32 %v10862_v34, %v3817_v8  ;;  %v3820_v37 = vmul.f32 %v10854_v55, %v3805_v38  ;;  %v3803_v49 = vadd.f32 %v3786_v27, %v3653_v63  ;;  %v8960_v63 = vld [vmem:[%s11792_s7 + $0x80] sm:$0xff]  }
 0x2de   : > { %v3842_v31 = vadd.f32 %v3834_v9, %v11905_v19  ;;  %8182 = vmatprep.mubr.bf16.mxu0 %v3897_v58  ;;  %v8961_v8 = vld [vmem:[%s11792_s7 + $0xc0] sm:$0xff]  }
 0x2df   : > { %3854 = vst [vmem:[#allocation2 + $0x21] sm:$0xff] %v10899_v57  ;;  %v3840_v14 = vadd.f32 %v3832_v44, %v11906_v11  ;;  %v3835_v20 = vadd.f32 %v10862_v34, %v3820_v37  ;;  %v3818_v52 = vmul.f32 %v10854_v55, %v3803_v49  ;;  %v10910_v47 = vpack.c.bf16 %v10880_v22, %v10899_v57  ;;  %v8964_v44 = vld [vmem:[%s11792_s7 + $0x130] sm:$0xff]   ;;  %v8963_v37 = vld [vmem:[%s11792_s7 + $0x178] sm:$0xff]   ;;  %v8966_v49 = vld [vmem:[%s11792_s7 + $0x128] sm:$0xff]  }
 0x2e0   : > { %v10915_v41 = vmax.f32 %v3842_v31, 0.0  ;;  %v10940_v61 = vld [vmem:[#allocation2 + $0x30] sm:$0xff] }
 0x2e1   : > { %v10917_v10 = vmax.f32 %v3840_v14, 0.0  ;;  %v3843_v4 = vadd.f32 %v3835_v20, %v11907_v33  ;;  %v3833_v48 = vadd.f32 %v10862_v34, %v3818_v52  ;;  %8183 = vmatmul.mubr.bf16.vlgmr.msra.gmra.mxu0 %v10910_v47  ;;  %v8950_v34 = vld [vmem:[%s11792_s7 + $0xa8] sm:$0xff]   ;;  %v11012_v38 = vld [vmem:[#allocation2 + $0x32] sm:$0xff]  ;;  %v4452_v33 = vpack.c.bf16 %v10899_v57, %v10886_v36  ;;  %v8969_v57 = vld [vmem:[%s11792_s7 + $0x160] sm:$0xff]  }
 0x2e2   : > { %3859 = vst [vmem:[#allocation2 + $0x71] sm:$0xff] %v10915_v41  ;;  %v3862_v55 = vld [vmem:[#allocation2 + $0x10] sm:$0xff]  ;;  %8215 = vmatpush3.bf16.msra.mxu0 %v11908_v59 }
 0x2e3   : > { %3857 = vst [vmem:[#allocation2 + $0x51] sm:$0xff] %v10917_v10  ;;  %v10925_v23 = vmax.f32 %v3843_v4, 0.0  ;;  %v3841_v54 = vadd.f32 %v3833_v48, %v11909_v24  ;;  %v3869_v50 = vpack.c.bf16 %v3862_v55, %v11910_v51  ;;  %8216 = vmatprep.subr.bf16.mxu0 %v8948_v12  ;;  %v10931_v26 = vpack.c.bf16 %v10917_v10, %v10892_v39  ;;  %v10942_v43 = vld [vmem:[#allocation2 + $0x12] sm:$0xff]  ;;  %v8967_v4 = vld [vmem:[%s11792_s7 + $0x168] sm:$0xff]  }
 0x2e4   : > { %v4152_v30 = vpack.c.bf16 %v10942_v43, %v4144_v45  ;;  %v10962_v7 = vld [vmem:[#allocation2 + $0x40] sm:$0xff]  ;;  %v8965_v11 = vld [vmem:[%s11792_s7 + $0x170] sm:$0xff]  }
 0x2e5   : > { %3860 = vst [vmem:[#allocation2 + $0x81] sm:$0xff] %v10925_v23  ;;  %v10937_v46 = vmax.f32 %v3841_v54, 0.0  ;;  %8206 = vmatprep.mubr.bf16.mxu1 %v3869_v50  ;;  %8186 = vmatprep.mubr.bf16.mxu0 %v10931_v26  ;;  %v11017_v27 = vld [vmem:[#allocation2 + $0x42] sm:$0xff]  ;;  %v4303_v31 = vpack.c.bf16 %v10962_v7, %v10940_v61  ;;  %v8972_v24 = vld [vmem:[%s11792_s7 + $0x110] sm:$0xff]   ;;  %v8971_v54 = vld [vmem:[%s11792_s7 + $0x158] sm:$0xff]  }
 0x2e6   : > { %v3863_v53 = vld [vmem:[#allocation2 + $0x20] sm:$0xff]  ;;  %8217 = vmatpush3.bf16.msra.mxu0 %v8948_v12  ;;  %v8974_v50 = vld [vmem:[%s11792_s7 + $0x108] sm:$0xff]  }
 0x2e7   : > { %3858 = vst [vmem:[#allocation2 + $0x61] sm:$0xff] %v10937_v46  ;;  %v10946_v32 = vpack.c.bf16 %v10940_v61, %v3863_v53  ;;  %8218 = vmatprep.subr.bf16.mxu0 %v8950_v34  ;;  %v10953_v35 = vpack.c.bf16 %v10915_v41, %v10937_v46  ;;  %v4302_v60 = vpack.c.bf16 %v3863_v53, %v3862_v55  ;;  %v4146_v1 = vld [vmem:[#allocation2 + $0x22] sm:$0xff]  ;;  %v8970_v55 = vld [vmem:[%s11792_s7 + $0x118] sm:$0xff]  }
 0x2e8   : > { %v11015_v9 = vpack.c.bf16 %v11012_v38, %v4146_v1  ;;  %v8968_v12 = vld [vmem:[%s11792_s7 + $0x120] sm:$0xff]   ;;  %v4602_v59 = vpack.c.bf16 %v4146_v1, %v10942_v43  ;;  %v8975_v53 = vld [vmem:[%s11792_s7 + $0x148] sm:$0xff]   ;;  %v8978_v61 = vld [vmem:[%s11792_s7 + $0x1b8] sm:$0xff]  }
 0x2e9   : > { %8207 = vmatmul.mubr.bf16.vlgmr.msra.gmra.mxu1 %v10946_v32  ;;  %8187 = vmatmul.mubr.bf16.gmra.mxu0 %v10953_v35  ;;  %v10977_v0 = vld [vmem:[#allocation2 + $0x70] sm:$0xff]  ;;  %v8976_v45 = vld [vmem:[%s11792_s7 + $0x100] sm:$0xff]  }
 0x2ea   : > { %8239 = vmatpush3.bf16.msra.mxu1 %v11911_v2  ;;  %v10964_v5 = vld [vmem:[#allocation2 + $0x50] sm:$0xff]  ;;  %8219 = vmatpush3.bf16.msra.mxu0 %v8950_v34  ;;  %v8977_v43 = vld [vmem:[%s11792_s7 + $0x140] sm:$0xff]   ;;  %v8979_v2 = vld [vmem:[%s11792_s7 + $0x1f8] sm:$0xff]  }
 0x2eb   : > { %8240 = vmatprep.subr.bf16.mxu1 %v8949_v21  ;;  %v10968_v13 = vpack.c.bf16 %v10964_v5, %v10962_v7  ;;  %8230 = vmatprep.mubr.bf16.mxu0 %v4152_v30  ;;  %v11007_v40 = vld [vmem:[#allocation2 + $0x52] sm:$0xff]  ;;  %v4454_v30 = vpack.c.bf16 %v10937_v46, %v10917_v10  ;;  %v4455_v7 = vpack.c.bf16 %v10925_v23, %v10915_v41 }
 0x2ec   : > { %8220 = vmatprep.subr.bf16.mxu0 %v8952_v42  ;;  %v11021_v58 = vpack.c.bf16 %v11007_v40, %v11017_v27  ;;  %v11042_v20 = vld [vmem:[#allocation2 + $0x72] sm:$0xff]  ;;  %v11057_v48 = vld [vmem:[#allocation2 + $0x80] sm:$0xff] }
 0x2ed   : > { %8210 = vmatprep.mubr.bf16.mxu1 %v10968_v13  ;;  %v4305_v36 = vpack.c.bf16 %v11057_v48, %v10977_v0  ;;  %v8973_v34 = vld [vmem:[%s11792_s7 + $0x150] sm:$0xff]   ;;  %v8986_v41 = vld [vmem:[%s11792_s7 + $0x198] sm:$0xff]  }
 0x2ee   : > { %8241 = vmatpush3.bf16.msra.mxu1 %v8949_v21  ;;  %v3867_v56 = vld [vmem:[#allocation2 + $0x60] sm:$0xff]  ;;  %8221 = vmatpush3.bf16.msra.mxu0 %v8952_v42  ;;  %v4453_v21 = vpack.c.bf16 %v10892_v39, %v10880_v22  ;;  %v8980_v42 = vld [vmem:[%s11792_s7 + $0x1b0] sm:$0xff]   ;;  %v8982_v22 = vld [vmem:[%s11792_s7 + $0x1a8] sm:$0xff]   ;;  %v4603_v39 = vpack.c.bf16 %v11017_v27, %v11012_v38 }
 0x2ef   : > { %8242 = vmatprep.subr.bf16.mxu1 %v8951_v16  ;;  %v10980_v17 = vpack.c.bf16 %v10977_v0, %v3867_v56  ;;  %8222 = vmatprep.subr.bf16.mxu0 %v8954_v25  ;;  %v11034_v19 = vld [vmem:[#allocation2 + $0x62] sm:$0xff]  ;;  %v4304_v14 = vpack.c.bf16 %v3867_v56, %v10964_v5  ;;  %v8981_v10 = vld [vmem:[%s11792_s7 + $0x1f0] sm:$0xff]   ;;  %v9002_v38 = vld [vmem:[%s11795_s10 + $0x78] sm:$0xff]  }
 0x2f0   : > { %v11046_v52 = vpack.c.bf16 %v11042_v20, %v11034_v19  ;;  %v4604_v46 = vpack.c.bf16 %v11034_v19, %v11007_v40  ;;  %v8984_v5 = vld [vmem:[%s11792_s7 + $0x1a0] sm:$0xff]   ;;  %v9003_v27 = vld [vmem:[%s11795_s10 + $0x38] sm:$0xff]  }
 0x2f1   : > { %8211 = vmatmul.mubr.bf16.gmra.mxu1 %v10980_v17  ;;  %v8985_v0 = vld [vmem:[%s11792_s7 + $0x1e0] sm:$0xff]   ;;  %v9010_v19 = vld [vmem:[%s11795_s10 + $0x58] sm:$0xff]  }
 0x2f2   : > { %8243 = vmatpush3.bf16.msra.mxu1 %v8951_v16  ;;  %8254 = vmatprep.mubr.bf16.mxu1 %v4302_v60  ;;  %v8983_v16 = vld [vmem:[%s11792_s7 + $0x1e8] sm:$0xff]   ;;  %v9001_v40 = vld [vmem:[%s11792_s7 + $0x200] sm:$0xff]  }
 0x2f3   : > { %8244 = vmatprep.subr.bf16.mxu1 %v8953_v62  ;;  %8223 = vmatpush3.bf16.msra.mxu0 %v8954_v25  ;;  %v11120_v25 = vld [vmem:[#allocation2 + $0x82] sm:$0xff] }
 0x2f4   : > { %8224 = vmatprep.subr.bf16.mxu0 %v8956_v18  ;;  %v4605_v56 = vpack.c.bf16 %v11120_v25, %v11042_v20  ;;  %v8990_v60 = vld [vmem:[%s11792_s7 + $0x188] sm:$0xff]  }
 0x2f5   : > { %v9014_v20 = vld [vmem:[%s11795_s10 + $0x48] sm:$0xff]  }
 0x2f6   : > { %8245 = vmatpush3.bf16.msra.mxu1 %v8953_v62  ;;  %v8987_v62 = vld [vmem:[%s11792_s7 + $0x1d8] sm:$0xff]  }
 0x2f7   : > { %8246 = vmatprep.subr.bf16.mxu1 %v8955_v29  ;;  %8225 = vmatpush3.bf16.msra.mxu0 %v8956_v18  ;;  %v8989_v18 = vld [vmem:[%s11792_s7 + $0x1d0] sm:$0xff]  }
 0x2f8   : > { %8226 = vmatprep.subr.bf16.mxu0 %v8958_v3 }
 0x2fa   : > { %8247 = vmatpush3.bf16.msra.mxu1 %v8955_v29  ;;  %v8991_v29 = vld [vmem:[%s11792_s7 + $0x1c8] sm:$0xff]  }
 0x2fb   : > { %8248 = vmatprep.subr.bf16.mxu1 %v8957_v15  ;;  %8227 = vmatpush3.bf16.msra.mxu0 %v8958_v3  ;;  %v8994_v3 = vld [vmem:[%s11792_s7 + $0x238] sm:$0xff]  }
 0x2fc   : > { %8228 = vmatprep.subr.bf16.mxu0 %v8960_v63 }
 0x2fe   : > { %8249 = vmatpush3.bf16.msra.mxu1 %v8957_v15  ;;  %v8993_v15 = vld [vmem:[%s11792_s7 + $0x1c0] sm:$0xff]  }
 0x2ff   : > { %8250 = vmatprep.subr.bf16.mxu1 %v8959_v28  ;;  %8229 = vmatpush3.bf16.msra.mxu0 %v8960_v63  ;;  %v8995_v63 = vld [vmem:[%s11792_s7 + $0x230] sm:$0xff]  }
 0x300   : > { %8262 = vmatprep.subr.bf16.mxu0 %v8962_v6 }
 0x302   : > { %8251 = vmatpush3.bf16.msra.mxu1 %v8959_v28  ;;  %8231 = vmatmul.mubr.bf16.vlgmr.msra.gmra.mxu0 %v11015_v9  ;;  %v8996_v28 = vld [vmem:[%s11792_s7 + $0x228] sm:$0xff]  }
 0x303   : > { %8252 = vmatprep.subr.bf16.mxu1 %v8961_v8  ;;  %8234 = vmatprep.mubr.bf16.mxu0 %v11021_v58 }
 0x304   : > { %8263 = vmatpush3.bf16.msra.mxu0 %v8962_v6  ;;  %v4756_v6 = vpack.c.bf16 %v11910_v51, %v11057_v48  ;;  %v8999_v51 = vld [vmem:[%s11792_s7 + $0x210] sm:$0xff]   ;;  %v9015_v48 = vld [vmem:[%s11795_s10 + $0x8] sm:$0xff]  }
 0x305   : > { %8264 = vmatprep.subr.bf16.mxu0 %v8964_v44 }
 0x306   : > { %8253 = vmatpush3.bf16.msra.mxu1 %v8961_v8 }
 0x307   : > { %8286 = vmatprep.subr.bf16.mxu1 %v8963_v37 }
 0x308   : > { %8265 = vmatpush3.bf16.msra.mxu0 %v8964_v44  ;;  %v9006_v44 = vld [vmem:[%s11795_s10 + $0x68] sm:$0xff]  }
 0x309   : > { %8255 = vmatmul.mubr.bf16.vlgmr.msra.gmra.mxu1 %v4303_v31  ;;  %8266 = vmatprep.subr.bf16.mxu0 %v8966_v49  ;;  %v9009_v31 = vld [vmem:[%s11795_s10 + $0x20] sm:$0xff]  }
 0x30a   : > { %8258 = vmatprep.mubr.bf16.mxu1 %v4304_v14  ;;  %8287 = vmatpush3.bf16.msra.mxu1 %v8963_v37  ;;  %v9008_v37 = vld [vmem:[%s11795_s10 + $0x60] sm:$0xff]   ;;  %v9011_v14 = vld [vmem:[%s11795_s10 + $0x18] sm:$0xff]  }
 0x30b   : > { %8288 = vmatprep.subr.bf16.mxu1 %v8965_v11  ;;  %8235 = vmatmul.mubr.bf16.gmra.mxu0 %v11046_v52 }
 0x30c   : > { %8267 = vmatpush3.bf16.msra.mxu0 %v8966_v49  ;;  %8278 = vmatprep.mubr.bf16.mxu0 %v4452_v33  ;;  %v9007_v49 = vld [vmem:[%s11795_s10 + $0x28] sm:$0xff]   ;;  %v9016_v33 = vld [vmem:[%s11795_s10 + $0x40] sm:$0xff]  }
 0x30d   : > { %8268 = vmatprep.subr.bf16.mxu0 %v8968_v12 }
 0x30e   : > { %8289 = vmatpush3.bf16.msra.mxu1 %v8965_v11  ;;  %v9012_v11 = vld [vmem:[%s11795_s10 + $0x50] sm:$0xff]  }
 0x30f   : > { %8290 = vmatprep.subr.bf16.mxu1 %v8967_v4 }
 0x310   : > { %8269 = vmatpush3.bf16.msra.mxu0 %v8968_v12  ;;  %v9013_v12 = vld [vmem:[%s11795_s10 + $0x10] sm:$0xff]  }
 0x311   : > { %8259 = vmatmul.mubr.bf16.gmra.mxu1 %v4305_v36  ;;  %8270 = vmatprep.subr.bf16.mxu0 %v8970_v55 }
 0x312   : > { %8291 = vmatpush3.bf16.msra.mxu1 %v8967_v4  ;;  %8302 = vmatprep.mubr.bf16.mxu1 %v4602_v59 }
 0x313   : > { %8292 = vmatprep.subr.bf16.mxu1 %v8969_v57 }
 0x314   : > { %8271 = vmatpush3.bf16.msra.mxu0 %v8970_v55  ;;  %v11240_v55 = vld [vmem:[%s11795_s10 + $0xb8] sm:$0xff]  }
 0x315   : > { %8272 = vmatprep.subr.bf16.mxu0 %v8972_v24  ;;  %11912 = vst [vmem:[#allocation19_spill] sm:$0xff] %v11240_v55 }
 0x316   : > { %8293 = vmatpush3.bf16.msra.mxu1 %v8969_v57  ;;  %v9017_v57 = vld [vmem:[%s11795_s10] sm:$0xff]  }
 0x317   : > { %8294 = vmatprep.subr.bf16.mxu1 %v8971_v54 }
 0x318   : > { %8273 = vmatpush3.bf16.msra.mxu0 %v8972_v24 }
 0x319   : > { %8274 = vmatprep.subr.bf16.mxu0 %v8974_v50 }
 0x31a   : > { %8295 = vmatpush3.bf16.msra.mxu1 %v8971_v54 }
 0x31b   : > { %8296 = vmatprep.subr.bf16.mxu1 %v8973_v34 }
 0x31c   : > { %8275 = vmatpush3.bf16.msra.mxu0 %v8974_v50  ;;  %v11253_v50 = vld [vmem:[%s11795_s10 + $0xf8] sm:$0xff]  }
 0x31d   : > { %8276 = vmatprep.subr.bf16.mxu0 %v8976_v45  ;;  %11913 = vst [vmem:[#allocation18_spill] sm:$0xff] %v11253_v50 }
 0x31e   : > { %8297 = vmatpush3.bf16.msra.mxu1 %v8973_v34 }
 0x31f   : > { %8298 = vmatprep.subr.bf16.mxu1 %v8975_v53 }
 0x320   : > { %8277 = vmatpush3.bf16.msra.mxu0 %v8976_v45 }
 0x321   : > { %8310 = vmatprep.subr.bf16.mxu0 %v8978_v61 }
 0x322   : > { %8299 = vmatpush3.bf16.msra.mxu1 %v8975_v53 }
 0x323   : > { %8300 = vmatprep.subr.bf16.mxu1 %v8977_v43  ;;  %8279 = vmatmul.mubr.bf16.vlgmr.msra.gmra.mxu0 %v4453_v21 }
 0x324   : > { %8282 = vmatprep.mubr.bf16.mxu0 %v4454_v30  ;;  %8311 = vmatpush3.bf16.msra.mxu0 %v8978_v61 }
 0x325   : > { %8312 = vmatprep.subr.bf16.mxu0 %v8980_v42 }
 0x326   : > { %8301 = vmatpush3.bf16.msra.mxu1 %v8977_v43 }
 0x327   : > { %8334 = vmatprep.subr.bf16.mxu1 %v8979_v2 }
 0x328   : > { %8313 = vmatpush3.bf16.msra.mxu0 %v8980_v42 }
 0x329   : > { %8303 = vmatmul.mubr.bf16.vlgmr.msra.gmra.mxu1 %v4603_v39  ;;  %8314 = vmatprep.subr.bf16.mxu0 %v8982_v22 }
 0x32a   : > { %8306 = vmatprep.mubr.bf16.mxu1 %v4604_v46  ;;  %8335 = vmatpush3.bf16.msra.mxu1 %v8979_v2 }
 0x32b   : > { %8336 = vmatprep.subr.bf16.mxu1 %v8981_v10  ;;  %8283 = vmatmul.mubr.bf16.gmra.mxu0 %v4455_v7 }
 0x32c   : > { %8315 = vmatpush3.bf16.msra.mxu0 %v8982_v22  ;;  %8326 = vmatprep.mubr.bf16.mxu0 %v10946_v32  ;;  %v8988_v32 = vld [vmem:[%s11792_s7 + $0x190] sm:$0xff]  }
 0x32d   : > { %8316 = vmatprep.subr.bf16.mxu0 %v8984_v5 }
 0x32e   : > { %8337 = vmatpush3.bf16.msra.mxu1 %v8981_v10 }
 0x32f   : > { %8338 = vmatprep.subr.bf16.mxu1 %v8983_v16 }
 0x330   : > { %8317 = vmatpush3.bf16.msra.mxu0 %v8984_v5 }
 0x331   : > { %8307 = vmatmul.mubr.bf16.gmra.mxu1 %v4605_v56  ;;  %8318 = vmatprep.subr.bf16.mxu0 %v8986_v41 }
 0x332   : > { %8339 = vmatpush3.bf16.msra.mxu1 %v8983_v16  ;;  %8350 = vmatprep.mubr.bf16.mxu1 %v10910_v47  ;;  %v8992_v47 = vld [vmem:[%s11792_s7 + $0x180] sm:$0xff]  }
 0x333   : > { %8340 = vmatprep.subr.bf16.mxu1 %v8985_v0 }
 0x334   : > { %8319 = vmatpush3.bf16.msra.mxu0 %v8986_v41 }
 0x335   : > { %8320 = vmatprep.subr.bf16.mxu0 %v8988_v32 }
 0x336   : > { %8341 = vmatpush3.bf16.msra.mxu1 %v8985_v0 }
 0x337   : > { %8342 = vmatprep.subr.bf16.mxu1 %v8987_v62 }
 0x338   : > { %8321 = vmatpush3.bf16.msra.mxu0 %v8988_v32 }
 0x339   : > { %8322 = vmatprep.subr.bf16.mxu0 %v8990_v60 }
 0x33a   : > { %8343 = vmatpush3.bf16.msra.mxu1 %v8987_v62 }
 0x33b   : > { %8344 = vmatprep.subr.bf16.mxu1 %v8989_v18 }
 0x33c   : > { %8323 = vmatpush3.bf16.msra.mxu0 %v8990_v60 }
 0x33d   : > { %8324 = vmatprep.subr.bf16.mxu0 %v8992_v47 }
 0x33e   : > { %8345 = vmatpush3.bf16.msra.mxu1 %v8989_v18 }
 0x33f   : > { %8346 = vmatprep.subr.bf16.mxu1 %v8991_v29 }
 0x340   : > { %8325 = vmatpush3.bf16.msra.mxu0 %v8992_v47 }
 0x341   : > { %8358 = vmatprep.subr.bf16.mxu0 %v8994_v3 }
 0x342   : > { %8347 = vmatpush3.bf16.msra.mxu1 %v8991_v29 }
 0x343   : > { %8348 = vmatprep.subr.bf16.mxu1 %v8993_v15  ;;  %8327 = vmatmul.mubr.bf16.vlgmr.msra.gmra.mxu0 %v10968_v13  ;;  %v8997_v13 = vld [vmem:[%s11792_s7 + $0x220] sm:$0xff]  }
 0x344   : > { %8330 = vmatprep.mubr.bf16.mxu0 %v10980_v17  ;;  %8359 = vmatpush3.bf16.msra.mxu0 %v8994_v3  ;;  %v4902_v17 = vld [vmem:[#allocation2 + $0x91] sm:$0xff] }
 0x345   : > { %8360 = vmatprep.subr.bf16.mxu0 %v8995_v63  ;;  %v4906_v1 = vpack.c.bf16 %v4902_v17, %v10925_v23  ;;  %v5052_v23 = vld [vmem:[#allocation2 + $0x92] sm:$0xff] }
 0x346   : > { %8349 = vmatpush3.bf16.msra.mxu1 %v8993_v15  ;;  %v5056_v8 = vpack.c.bf16 %v5052_v23, %v11120_v25 }
 0x347   : > { %8382 = vmatprep.subr.bf16.mxu1 %v9002_v38 }
 0x348   : > { %8361 = vmatpush3.bf16.msra.mxu0 %v8995_v63 }
 0x349   : > { %8351 = vmatmul.mubr.bf16.vlgmr.msra.gmra.mxu1 %v10931_v26  ;;  %8362 = vmatprep.subr.bf16.mxu0 %v8996_v28  ;;  %v8998_v26 = vld [vmem:[%s11792_s7 + $0x218] sm:$0xff]  }
 0x34a   : > { %8354 = vmatprep.mubr.bf16.mxu1 %v10953_v35  ;;  %v9000_v35 = vld [vmem:[%s11792_s7 + $0x208] sm:$0xff]   ;;  %8383 = vmatpush3.bf16.msra.mxu1 %v9002_v38 }
 0x34b   : > { %8331 = vmatmul.mubr.bf16.gmra.mxu0 %v4756_v6 }
 0x34c   : > { %8363 = vmatpush3.bf16.msra.mxu0 %v8996_v28  ;;  %8374 = vmatprep.mubr.bf16.mxu0 %v11015_v9  ;;  %v9004_v9 = vld [vmem:[%s11795_s10 + $0x70] sm:$0xff]  }
 0x34d   : > { %8364 = vmatprep.subr.bf16.mxu0 %v8997_v13  ;;  %8384 = vmatprep.subr.bf16.mxu1 %v9004_v9 }
 0x34e   : > { %8385 = vmatpush3.bf16.msra.mxu1 %v9004_v9 }
 0x34f   : > { %8386 = vmatprep.subr.bf16.mxu1 %v9006_v44 }
 0x350   : > { %8365 = vmatpush3.bf16.msra.mxu0 %v8997_v13 }
 0x351   : > { %8355 = vmatmul.mubr.bf16.gmra.mxu1 %v4906_v1  ;;  %8366 = vmatprep.subr.bf16.mxu0 %v8998_v26 }
 0x352   : > { %8387 = vmatpush3.bf16.msra.mxu1 %v9006_v44 }
 0x353   : > { %8388 = vmatprep.subr.bf16.mxu1 %v9008_v37 }
 0x354   : > { %8367 = vmatpush3.bf16.msra.mxu0 %v8998_v26 }
 0x355   : > { %8368 = vmatprep.subr.bf16.mxu0 %v8999_v51 }
 0x356   : > { %8389 = vmatpush3.bf16.msra.mxu1 %v9008_v37 }
 0x357   : > { %8390 = vmatprep.subr.bf16.mxu1 %v9010_v19 }
 0x358   : > { %8369 = vmatpush3.bf16.msra.mxu0 %v8999_v51 }
 0x359   : > { %8370 = vmatprep.subr.bf16.mxu0 %v9000_v35 }
 0x35a   : > { %8391 = vmatpush3.bf16.msra.mxu1 %v9010_v19 }
 0x35b   : > { %8392 = vmatprep.subr.bf16.mxu1 %v9012_v11 }
 0x35c   : > { %8371 = vmatpush3.bf16.msra.mxu0 %v9000_v35 }
 0x35d   : > { %8372 = vmatprep.subr.bf16.mxu0 %v9001_v40 }
 0x35e   : > { %8393 = vmatpush3.bf16.msra.mxu1 %v9012_v11 }
 0x35f   : > { %8394 = vmatprep.subr.bf16.mxu1 %v9014_v20 }
 0x360   : > { %8373 = vmatpush3.bf16.msra.mxu0 %v9001_v40 }
 0x361   : > { %8406 = vmatprep.subr.bf16.mxu0 %v9003_v27 }
 0x362   : > { %8395 = vmatpush3.bf16.msra.mxu1 %v9014_v20 }
 0x363   : > { %8375 = vmatmul.mubr.bf16.vlgmr.msra.gmra.mxu0 %v11021_v58  ;;  %v9005_v58 = vld [vmem:[%s11795_s10 + $0x30] sm:$0xff]   ;;  %8396 = vmatprep.subr.bf16.mxu1 %v9016_v33 }
 0x364   : > { %8378 = vmatprep.mubr.bf16.mxu0 %v11046_v52  ;;  %8407 = vmatpush3.bf16.msra.mxu0 %v9003_v27 }
 0x365   : > { %8408 = vmatprep.subr.bf16.mxu0 %v9005_v58 }
 0x366   : > { %8397 = vmatpush3.bf16.msra.mxu1 %v9016_v33 }
 0x367   : > { %8430 = vmatprep.subr.bf16.mxu1 %v11240_v55 }
 0x368   : > { %8409 = vmatpush3.bf16.msra.mxu0 %v9005_v58 }
 0x369   : > { %8410 = vmatprep.subr.bf16.mxu0 %v9007_v49 }
 0x36b   : > { %8379 = vmatmul.mubr.bf16.gmra.mxu0 %v5056_v8 }
 0x36c   : > { %8411 = vmatpush3.bf16.msra.mxu0 %v9007_v49 }
 0x36d   : > { %8412 = vmatprep.subr.bf16.mxu0 %v9009_v31 }
 0x370   : > { %8413 = vmatpush3.bf16.msra.mxu0 %v9009_v31 }
 0x371   : > { %8414 = vmatprep.subr.bf16.mxu0 %v9011_v14 }
 0x374   : > { %8415 = vmatpush3.bf16.msra.mxu0 %v9011_v14 }
 0x375   : > { %8416 = vmatprep.subr.bf16.mxu0 %v9013_v12 }
 0x378   : > { %8417 = vmatpush3.bf16.msra.mxu0 %v9013_v12 }
 0x379   : > { %8418 = vmatprep.subr.bf16.mxu0 %v9015_v48 }
 0x37c   : > { %8419 = vmatpush3.bf16.msra.mxu0 %v9015_v48 }
 0x37d   : > { %8420 = vmatprep.subr.bf16.mxu0 %v9017_v57 }
 0x380   : > { %8421 = vmatpush3.bf16.msra.mxu0 %v9017_v57 }
 0x381   : > { %8454 = vmatprep.subr.bf16.mxu0 %v11253_v50 }
 0x3a1   : > { %v11224_v52 = vpop.f32.mrf.mxu0 }
 0x3a3   : > { %v11232_v4 = vpop.f32.mrf.mxu0 }
 0x3a5   : > { %v11242_v36 = vpop.f32.mrf.mxu0 }
 0x3a7   : > { %v11248_v24 = vpop.f32.mrf.mxu0 }
 0x3a9   : > { %v8208_v59 = vpop.f32.mrf.mxu1  ;;  %v11255_v34 = vpop.f32.mrf.mxu0 }
 0x3aa   : > { %v4122_v11 = vadd.f32 %v8208_v59, %v11224_v52 }
 0x3ab   : > { %v4113_v54 = vpop.f32.mrf.mxu1  ;;  %v11258_v53 = vpop.f32.mrf.mxu0 }
 0x3ac   : > { %v4114_v14 = vadd.f32 %v4113_v54, %v11232_v4 }
 0x3ad   : > { %v8209_v45 = vpop.f32.mrf.mxu1  ;;  %v11260_v43 = vpop.f32.mrf.mxu0 }
 0x3ae   : > { %v4125_v48 = vadd.f32 %v8209_v45, %v11242_v36 }
 0x3af   : > { %v4116_v61 = vpop.f32.mrf.mxu1  ;;  %v11262_v42 = vpop.f32.mrf.mxu0 }
 0x3b0   : > { %v4117_v55 = vadd.f32 %v4116_v61, %v11248_v24 }
 0x3b1   : > { %v8212_v21 = vpop.f32.mrf.mxu1 }
 0x3b3   : > { %v4129_v2 = vpop.f32.mrf.mxu1 }
 0x3b5   : > { %v11264_v39 = vpop.f32.mrf.mxu1 }
 0x3b6   : > { %v4141_v24 = vadd.f32 %v11264_v39, %v11260_v43 }
 0x3b7   : > { %v11266_v46 = vpop.f32.mrf.mxu1 }
 0x3c2   : > { %v8232_v30 = vpop.f32.mrf.mxu0 }
 0x3c3   : > { %v4288_v20 = vadd.f32 %v8232_v30, %v4122_v11  ;;  %v4130_v30 = vadd.f32 %v4129_v2, %v11258_v53 }
 0x3c4   : > { %v4255_v22 = vpop.f32.mrf.mxu0 }
 0x3c5   : > { %v4286_v50 = vadd.f32 %v4255_v22, %v4114_v14 }
 0x3c6   : > { %v8233_v10 = vpop.f32.mrf.mxu0 }
 0x3c8   : > { %v4258_v5 = vpop.f32.mrf.mxu0 }
 0x3c9   : > { %v8256_v7 = vpop.f32.mrf.mxu1  ;;  %v4287_v59 = vadd.f32 %v4258_v5, %v4117_v55  ;;  %v4133_v5 = vadd.f32 %v11266_v46, %v11262_v42 }
 0x3ca   : > { %v4438_v57 = vadd.f32 %v8256_v7, %v4288_v20 }
 0x3cb   : > { %v4405_v16 = vpop.f32.mrf.mxu1  ;;  %v8236_v25 = vpop.f32.mrf.mxu0 }
 0x3cd   : > { %v8257_v41 = vpop.f32.mrf.mxu1  ;;  %v4271_v56 = vpop.f32.mrf.mxu0 }
 0x3ce   : > { %v4290_v61 = vadd.f32 %v4271_v56, %v4130_v30 }
 0x3cf   : > { %v4408_v0 = vpop.f32.mrf.mxu1  ;;  %v11268_v32 = vpop.f32.mrf.mxu0 }
 0x3d0   : > { %v4293_v2 = vadd.f32 %v11268_v32, %v4141_v24  ;;  %v11312_v32 = vld [vmem:[%s11794_s9] ss:$0 sm:$0xff] }
 0x3d1   : > { %v8260_v62 = vpop.f32.mrf.mxu1  ;;  %v11270_v60 = vpop.f32.mrf.mxu0 }
 0x3d3   : > { %v4421_v47 = vpop.f32.mrf.mxu1 }
 0x3d4   : > { %v4440_v53 = vadd.f32 %v4421_v47, %v4290_v61 }
 0x3d5   : > { %v11272_v3 = vpop.f32.mrf.mxu1 }
 0x3d7   : > { %v11274_v63 = vpop.f32.mrf.mxu1 }
 0x3d8   : > { %11914 = vst [vmem:[#allocation27_spill] sm:$0xff] %v11274_v63 }
 0x3e3   : > { %v8280_v18 = vpop.f32.mrf.mxu0 }
 0x3e5   : > { %v4555_v29 = vpop.f32.mrf.mxu0 }
 0x3e7   : > { %v8281_v15 = vpop.f32.mrf.mxu0 }
 0x3e9   : > { %v8304_v28 = vpop.f32.mrf.mxu1  ;;  %v4558_v6 = vpop.f32.mrf.mxu0 }
 0x3eb   : > { %v4705_v13 = vpop.f32.mrf.mxu1  ;;  %v8284_v17 = vpop.f32.mrf.mxu0 }
 0x3ed   : > { %v8305_v26 = vpop.f32.mrf.mxu1  ;;  %v11276_v1 = vpop.f32.mrf.mxu0 }
 0x3ee   : > { %v4590_v46 = vadd.f32 %v11276_v1, %v4440_v53 }
 0x3ef   : > { %v4708_v51 = vpop.f32.mrf.mxu1  ;;  %v11278_v35 = vpop.f32.mrf.mxu0 }
 0x3f0   : > { %11915 = vst [vmem:[#allocation39_spill] sm:$0xff] %v11278_v35 }
 0x3f1   : > { %v8308_v40 = vpop.f32.mrf.mxu1  ;;  %v11280_v23 = vpop.f32.mrf.mxu0 }
 0x3f2   : > { %11916 = vst [vmem:[#allocation21_spill] sm:$0xff] %v11280_v23  ;;  %v4436_v23 = vadd.f32 %v4405_v16, %v4286_v50 }
 0x3f3   : > { %v11282_v38 = vpop.f32.mrf.mxu1 }
 0x3f4   : > { %11917 = vst [vmem:[#allocation29_spill] sm:$0xff] %v11282_v38  ;;  %v4138_v38 = vadd.f32 %v8212_v21, %v11255_v34  ;;  %v4586_v54 = vadd.f32 %v4555_v29, %v4436_v23  ;;  %v4443_v29 = vadd.f32 %v11272_v3, %v4293_v2 }
 0x3f5   : > { %v11284_v27 = vpop.f32.mrf.mxu1 }
 0x3f6   : > { %11918 = vst [vmem:[#allocation30_spill] sm:$0xff] %v11284_v27  ;;  %v4588_v27 = vadd.f32 %v8280_v18, %v4438_v57  ;;  %v4292_v11 = vadd.f32 %v8236_v25, %v4138_v38  ;;  %v4736_v36 = vadd.f32 %v4705_v13, %v4586_v54 }
 0x3f7   : > { %v11286_v44 = vpop.f32.mrf.mxu1 }
 0x3f8   : > { %11919 = vst [vmem:[#allocation32_spill] sm:$0xff] %v11286_v44  ;;  %v4289_v44 = vadd.f32 %v8233_v10, %v4125_v48  ;;  %v4738_v4 = vadd.f32 %v8304_v28, %v4588_v27  ;;  %v4442_v50 = vadd.f32 %v8260_v62, %v4292_v11 }
 0x3fa   : > { %v4439_v52 = vadd.f32 %v8257_v41, %v4289_v44  ;;  %v4592_v25 = vadd.f32 %v8284_v17, %v4442_v50  ;;  %v5269_v50 = vld [vmem:[#allocation3 + $0x1] sm:$0xff] }
 0x3fb   : > { %v11922_v23 = vld [vmem:[#allocation29_spill] sm:$0xff] }
 0x3fc   : > { %v4589_v45 = vadd.f32 %v8281_v15, %v4439_v52  ;;  %v4291_v15 = vadd.f32 %v11270_v60, %v4133_v5  ;;  %v4742_v42 = vadd.f32 %v8308_v40, %v4592_v25  ;;  %v4740_v3 = vadd.f32 %v11922_v23, %v4590_v46  ;;  %v11368_v23 = vld [vmem:[#allocation2] sm:$0xff] }
 0x3fe   : > { %v4739_v34 = vadd.f32 %v8305_v26, %v4589_v45  ;;  %v11921_v26 = vld [vmem:[#allocation27_spill] sm:$0xff] }
 0x403   : > { %v8328_v8 = vpop.f32.mrf.mxu0 }
 0x404   : > { %v4889_v22 = vadd.f32 %v8328_v8, %v4738_v4  ;;  %v11923_v8 = vld [vmem:[#allocation39_spill] sm:$0xff] }
 0x405   : > { %v4856_v9 = vpop.f32.mrf.mxu0  ;;  %v4593_v60 = vadd.f32 %v11923_v8, %v4443_v29  ;;  %v11928_v8 = vld [vmem:[#allocation19_spill] sm:$0xff] }
 0x406   : > { %v4887_v55 = vadd.f32 %v4856_v9, %v4736_v36 }
 0x407   : > { %v8329_v58 = vpop.f32.mrf.mxu0 }
 0x408   : > { %v4890_v56 = vadd.f32 %v8329_v58, %v4739_v34 }
 0x409   : > { %v8352_v37 = vpop.f32.mrf.mxu1  ;;  %v4859_v49 = vpop.f32.mrf.mxu0 }
 0x40a   : > { %v5039_v16 = vadd.f32 %v8352_v37, %v4889_v22  ;;  %v11924_v37 = vld [vmem:[#allocation30_spill] sm:$0xff] }
 0x40b   : > { %v5006_v19 = vpop.f32.mrf.mxu1  ;;  %v8332_v31 = vpop.f32.mrf.mxu0 }
 0x40c   : > { %v5037_v39 = vadd.f32 %v5006_v19, %v4887_v55  ;;  %v4893_v40 = vadd.f32 %v8332_v31, %v4742_v42  ;;  %v11925_v19 = vld [vmem:[#allocation21_spill] sm:$0xff] }
 0x40d   : > { %v8353_v12 = vpop.f32.mrf.mxu1  ;;  %v11290_v33 = vpop.f32.mrf.mxu0 }
 0x40e   : > { %11920 = vst [vmem:[#allocation31_spill] sm:$0xff] %v11290_v33  ;;  %v4437_v33 = vadd.f32 %v4408_v0, %v4287_v59  ;;  %v11304_v0 = vld [vmem:[%s11793_s8] ss:$0 sm:$0xff]  ;;  %v5040_v28 = vadd.f32 %v8353_v12, %v4890_v56  ;;  %v11927_v59 = vld [vmem:[#allocation32_spill] sm:$0xff] }
 0x40f   : > { %v5009_v35 = vpop.f32.mrf.mxu1  ;;  %v8333_v63 = vpop.f32.mrf.mxu0 }
 0x410   : > { %v4587_v21 = vadd.f32 %v4558_v6, %v4437_v33 }
 0x411   : > { %v8356_v7 = vpop.f32.mrf.mxu1  ;;  %v4875_v10 = vpop.f32.mrf.mxu0 }
 0x412   : > { %v4737_v43 = vadd.f32 %v4708_v51, %v4587_v21  ;;  %v4441_v51 = vadd.f32 %v11921_v26, %v4291_v15  ;;  %v5043_v20 = vadd.f32 %v8356_v7, %v4893_v40 }
 0x413   : > { %v5022_v62 = vpop.f32.mrf.mxu1 }
 0x414   : > { %v4888_v6 = vadd.f32 %v4859_v49, %v4737_v43  ;;  %v4743_v49 = vadd.f32 %v11924_v37, %v4593_v60  ;;  %v4591_v14 = vadd.f32 %v11925_v19, %v4441_v51  ;;  %v11929_v19 = vld [vmem:[#allocation18_spill] sm:$0xff] }
 0x415   : > { %v8357_v9 = vpop.f32.mrf.mxu1  ;;  %v11926_v12 = vld [vmem:[#allocation31_spill] sm:$0xff] }
 0x416   : > { %v5038_v1 = vadd.f32 %v5009_v35, %v4888_v6  ;;  %v4891_v33 = vadd.f32 %v11926_v12, %v4740_v3  ;;  %v4741_v4 = vadd.f32 %v11927_v59, %v4591_v14  ;;  %v4894_v30 = vadd.f32 %v8333_v63, %v4743_v49  ;;  %v9024_v49 = vld [vmem:[%s11795_s10 + $0xa0] sm:$0xff]  }
 0x417   : > { %v5025_v36 = vpop.f32.mrf.mxu1 }
 0x418   : > { %v5041_v54 = vadd.f32 %v5022_v62, %v4891_v33  ;;  %v5044_v61 = vadd.f32 %v8357_v9, %v4894_v30  ;;  %v4892_v34 = vadd.f32 %v4875_v10, %v4741_v4  ;;  %v9025_v4 = vld [vmem:[%s11795_s10 + $0xe0] sm:$0xff]   ;;  %v9028_v30 = vld [vmem:[%s11795_s10 + $0x90] sm:$0xff]  }
 0x41a   : > { %v5042_v53 = vadd.f32 %v5025_v36, %v4892_v34  ;;  %v9030_v36 = vld [vmem:[%s11795_s10 + $0x88] sm:$0xff]  }
 0x423   : > { %v8376_v41 = vpop.f32.mrf.mxu0 }
 0x424   : > { %v5189_v18 = vadd.f32 %v8376_v41, %v5039_v16 }
 0x425   : > { %v5156_v47 = vpop.f32.mrf.mxu0 }
 0x426   : > { %v5204_v13 = vmul.f32 %v11304_v0, %v5189_v18  ;;  %v5187_v17 = vadd.f32 %v5156_v47, %v5037_v39  ;;  %v9020_v47 = vld [vmem:[%s11795_s10 + $0xb0] sm:$0xff]  }
 0x427   : > { %v8377_v38 = vpop.f32.mrf.mxu0 }
 0x428   : > { %v5219_v27 = vadd.f32 %v11312_v32, %v5204_v13  ;;  %v5202_v58 = vmul.f32 %v11304_v0, %v5187_v17  ;;  %v5190_v44 = vadd.f32 %v8377_v38, %v5040_v28 }
 0x429   : > { %v5159_v48 = vpop.f32.mrf.mxu0 }
 0x42a   : > { %v11323_v57 = vmax.f32 %v5219_v27, 0.0  ;;  %v5217_v31 = vadd.f32 %v11312_v32, %v5202_v58  ;;  %v5205_v35 = vmul.f32 %v11304_v0, %v5190_v44  ;;  %v5188_v52 = vadd.f32 %v5159_v48, %v5038_v1  ;;  %v9021_v27 = vld [vmem:[%s11795_s10 + $0xf0] sm:$0xff]   ;;  %v5524_v44 = vld [vmem:[#allocation3 + $0x2] sm:$0xff] }
 0x42b   : > { %v8380_v11 = vpop.f32.mrf.mxu0  ;;  %v9023_v48 = vld [vmem:[%s11795_s10 + $0xe8] sm:$0xff]  }
 0x42c   : > { %5235 = vst [vmem:[#allocation3 + $0x31] sm:$0xff] %v11323_v57  ;;  %v11329_v45 = vmax.f32 %v5217_v31, 0.0  ;;  %v5220_v22 = vadd.f32 %v11312_v32, %v5205_v35  ;;  %v5203_v7 = vmul.f32 %v11304_v0, %v5188_v52  ;;  %v5193_v24 = vadd.f32 %v8380_v11, %v5043_v20  ;;  %v9026_v31 = vld [vmem:[%s11795_s10 + $0x98] sm:$0xff]  }
 0x42d   : > { %v5172_v21 = vpop.f32.mrf.mxu0  ;;  %v9027_v11 = vld [vmem:[%s11795_s10 + $0xd8] sm:$0xff]  }
 0x42e   : > { %5233 = vst [vmem:[#allocation3 + $0x11] sm:$0xff] %v11329_v45  ;;  %v11334_v16 = vmax.f32 %v5220_v22, 0.0  ;;  %v5218_v63 = vadd.f32 %v11312_v32, %v5203_v7  ;;  %v5208_v55 = vmul.f32 %v11304_v0, %v5193_v24  ;;  %v5191_v5 = vadd.f32 %v5172_v21, %v5041_v54  ;;  %v9029_v22 = vld [vmem:[%s11795_s10 + $0xd0] sm:$0xff]   ;;  %v9032_v7 = vld [vmem:[%s11795_s10 + $0x80] sm:$0xff]   ;;  %v9031_v24 = vld [vmem:[%s11795_s10 + $0xc8] sm:$0xff]  }
 0x42f   : > { %v8381_v2 = vpop.f32.mrf.mxu0  ;;  %v5277_v25 = vpack.c.bf16 %v11329_v45, %v5269_v50  ;;  %v9034_v50 = vld [vmem:[%s11795_s10 + $0x138] sm:$0xff]   ;;  %v9033_v21 = vld [vmem:[%s11795_s10 + $0xc0] sm:$0xff]  }
 0x430   : > { %5236 = vst [vmem:[#allocation3 + $0x41] sm:$0xff] %v11334_v16  ;;  %v11340_v41 = vmax.f32 %v5218_v63, 0.0  ;;  %v5223_v10 = vadd.f32 %v11312_v32, %v5208_v55  ;;  %v5206_v43 = vmul.f32 %v11304_v0, %v5191_v5  ;;  %v5194_v39 = vadd.f32 %v8381_v2, %v5044_v61  ;;  %v9036_v2 = vld [vmem:[%s11795_s10 + $0x130] sm:$0xff]  }
 0x431   : > { %v5175_v56 = vpop.f32.mrf.mxu0  ;;  %8398 = vmatprep.mubr.bf16.mxu1 %v5277_v25  ;;  %v5833_v62 = vpack.c.bf16 %v11334_v16, %v11323_v57  ;;  %v9035_v25 = vld [vmem:[%s11795_s10 + $0x178] sm:$0xff]  }
 0x432   : > { %5234 = vst [vmem:[#allocation3 + $0x21] sm:$0xff] %v11340_v41  ;;  %v11347_v18 = vmax.f32 %v5223_v10, 0.0  ;;  %v5221_v29 = vadd.f32 %v11312_v32, %v5206_v43  ;;  %v5209_v15 = vmul.f32 %v11304_v0, %v5194_v39  ;;  %v5192_v42 = vadd.f32 %v5175_v56, %v5042_v53  ;;  %v9038_v10 = vld [vmem:[%s11795_s10 + $0x128] sm:$0xff]   ;;  %v9037_v56 = vld [vmem:[%s11795_s10 + $0x170] sm:$0xff]  }
 0x433   : > { %v11353_v46 = vpack.c.bf16 %v11323_v57, %v11340_v41  ;;  %v11385_v1 = vld [vmem:[#allocation3 + $0x30] sm:$0xff] }
 0x434   : > { %5239 = vst [vmem:[#allocation3 + $0x71] sm:$0xff] %v11347_v18  ;;  %v11359_v28 = vmax.f32 %v5221_v29, 0.0  ;;  %v5224_v6 = vadd.f32 %v11312_v32, %v5209_v15  ;;  %v5207_v13 = vmul.f32 %v11304_v0, %v5192_v42  ;;  %v9022_v0 = vld [vmem:[%s11795_s10 + $0xa8] sm:$0xff]   ;;  %v11457_v63 = vld [vmem:[#allocation3 + $0x32] sm:$0xff] }
 0x435   : > { %v5242_v17 = vld [vmem:[#allocation3 + $0x10] sm:$0xff]  ;;  %8399 = vmatmul.mubr.bf16.vlgmr.msra.gmra.mxu1 %v11353_v46 }
 0x436   : > { %5237 = vst [vmem:[#allocation3 + $0x51] sm:$0xff] %v11359_v28  ;;  %v11365_v26 = vmax.f32 %v5224_v6, 0.0  ;;  %v5222_v51 = vadd.f32 %v11312_v32, %v5207_v13  ;;  %v5249_v3 = vpack.c.bf16 %v5242_v17, %v11368_v23  ;;  %8431 = vmatpush3.bf16.msra.mxu1 %v11928_v8  ;;  %v11374_v60 = vpack.c.bf16 %v11359_v28, %v11334_v16  ;;  %v11398_v37 = vld [vmem:[#allocation3 + $0x12] sm:$0xff]  ;;  %v9039_v13 = vld [vmem:[%s11795_s10 + $0x168] sm:$0xff]  }
 0x437   : > { %8432 = vmatprep.subr.bf16.mxu1 %v9020_v47  ;;  %v11405_v14 = vld [vmem:[#allocation3 + $0x40] sm:$0xff]  ;;  %v5532_v12 = vpack.c.bf16 %v11398_v37, %v5524_v44  ;;  %v5832_v6 = vpack.c.bf16 %v11340_v41, %v11329_v45  ;;  %v9044_v8 = vld [vmem:[%s11795_s10 + $0x110] sm:$0xff]   ;;  %v9047_v44 = vld [vmem:[%s11795_s10 + $0x148] sm:$0xff]  }
 0x438   : > { %5240 = vst [vmem:[#allocation3 + $0x81] sm:$0xff] %v11365_v26  ;;  %v11380_v40 = vmax.f32 %v5222_v51, 0.0  ;;  %8422 = vmatprep.mubr.bf16.mxu0 %v5249_v3  ;;  %8402 = vmatprep.mubr.bf16.mxu1 %v11374_v60  ;;  %v5835_v32 = vpack.c.bf16 %v11365_v26, %v11347_v18  ;;  %v11462_v5 = vld [vmem:[#allocation3 + $0x42] sm:$0xff]  ;;  %v5683_v39 = vpack.c.bf16 %v11405_v14, %v11385_v1  ;;  %v9042_v51 = vld [vmem:[%s11795_s10 + $0x118] sm:$0xff]   ;;  %v9053_v57 = vld [vmem:[%s11795_s10 + $0x1f0] sm:$0xff]  }
 0x439   : > { %v5243_v38 = vld [vmem:[#allocation3 + $0x20] sm:$0xff] }
 0x43a   : > { %5238 = vst [vmem:[#allocation3 + $0x61] sm:$0xff] %v11380_v40  ;;  %v11389_v9 = vpack.c.bf16 %v11385_v1, %v5243_v38  ;;  %8433 = vmatpush3.bf16.msra.mxu1 %v9020_v47  ;;  %v11396_v58 = vpack.c.bf16 %v11347_v18, %v11380_v40  ;;  %v5682_v54 = vpack.c.bf16 %v5243_v38, %v5242_v17  ;;  %v5526_v61 = vld [vmem:[#allocation3 + $0x22] sm:$0xff]  ;;  %v9045_v1 = vld [vmem:[%s11795_s10 + $0x150] sm:$0xff]  }
 0x43b   : > { %8434 = vmatprep.subr.bf16.mxu1 %v9022_v0  ;;  %v11422_v52 = vld [vmem:[#allocation3 + $0x70] sm:$0xff]  ;;  %v11460_v55 = vpack.c.bf16 %v11457_v63, %v5526_v61  ;;  %v9040_v47 = vld [vmem:[%s11795_s10 + $0x120] sm:$0xff]   ;;  %v5982_v3 = vpack.c.bf16 %v5526_v61, %v11398_v37  ;;  %v9046_v38 = vld [vmem:[%s11795_s10 + $0x108] sm:$0xff]  }
 0x43c   : > { %8423 = vmatmul.mubr.bf16.vlgmr.msra.gmra.mxu0 %v11389_v9  ;;  %v11487_v15 = vld [vmem:[#allocation3 + $0x72] sm:$0xff]  ;;  %v9041_v41 = vld [vmem:[%s11795_s10 + $0x160] sm:$0xff]  }
 0x43d   : > { %8455 = vmatpush3.bf16.msra.mxu0 %v11929_v19  ;;  %v11407_v20 = vld [vmem:[#allocation3 + $0x50] sm:$0xff]  ;;  %8403 = vmatmul.mubr.bf16.gmra.mxu1 %v11396_v58  ;;  %v9050_v37 = vld [vmem:[%s11795_s10 + $0x1b8] sm:$0xff]   ;;  %v9057_v18 = vld [vmem:[%s11795_s10 + $0x1e0] sm:$0xff]  }
 0x43e   : > { %8456 = vmatprep.subr.bf16.mxu0 %v9021_v27  ;;  %v11413_v33 = vpack.c.bf16 %v11407_v20, %v11405_v14  ;;  %8435 = vmatpush3.bf16.msra.mxu1 %v9022_v0  ;;  %v11452_v34 = vld [vmem:[#allocation3 + $0x52] sm:$0xff]  ;;  %v5834_v14 = vpack.c.bf16 %v11380_v40, %v11359_v28  ;;  %v5983_v28 = vpack.c.bf16 %v11462_v5, %v11457_v63  ;;  %v9055_v40 = vld [vmem:[%s11795_s10 + $0x1e8] sm:$0xff]  }
 0x43f   : > { %8446 = vmatprep.mubr.bf16.mxu1 %v5532_v12  ;;  %8436 = vmatprep.subr.bf16.mxu1 %v9024_v49  ;;  %v11466_v53 = vpack.c.bf16 %v11452_v34, %v11462_v5  ;;  %v11502_v17 = vld [vmem:[#allocation3 + $0x80] sm:$0xff]  ;;  %v9043_v0 = vld [vmem:[%s11795_s10 + $0x158] sm:$0xff]   ;;  %v9052_v19 = vld [vmem:[%s11795_s10 + $0x1b0] sm:$0xff]  }
 0x440   : > { %8426 = vmatprep.mubr.bf16.mxu0 %v11413_v33  ;;  %v5685_v45 = vpack.c.bf16 %v11502_v17, %v11422_v52  ;;  %v9054_v12 = vld [vmem:[%s11795_s10 + $0x1a8] sm:$0xff]  }
 0x441   : > { %8457 = vmatpush3.bf16.msra.mxu0 %v9021_v27  ;;  %v5247_v35 = vld [vmem:[#allocation3 + $0x60] sm:$0xff] }
 0x442   : > { %8458 = vmatprep.subr.bf16.mxu0 %v9023_v48  ;;  %v11425_v59 = vpack.c.bf16 %v11422_v52, %v5247_v35  ;;  %8437 = vmatpush3.bf16.msra.mxu1 %v9024_v49  ;;  %v11479_v43 = vld [vmem:[#allocation3 + $0x62] sm:$0xff]  ;;  %v5684_v29 = vpack.c.bf16 %v5247_v35, %v11407_v20  ;;  %v9051_v20 = vld [vmem:[%s11795_s10 + $0x1f8] sm:$0xff]  }
 0x443   : > { %8438 = vmatprep.subr.bf16.mxu1 %v9026_v31  ;;  %v11491_v42 = vpack.c.bf16 %v11487_v15, %v11479_v43  ;;  %v9048_v27 = vld [vmem:[%s11795_s10 + $0x100] sm:$0xff]   ;;  %v5984_v16 = vpack.c.bf16 %v11479_v43, %v11452_v34  ;;  %v9062_v52 = vld [vmem:[%s11795_s10 + $0x188] sm:$0xff]  }
 0x444   : > { %8427 = vmatmul.mubr.bf16.gmra.mxu0 %v11425_v59  ;;  %v9049_v49 = vld [vmem:[%s11795_s10 + $0x140] sm:$0xff]  }
 0x445   : > { %8459 = vmatpush3.bf16.msra.mxu0 %v9023_v48  ;;  %8470 = vmatprep.mubr.bf16.mxu0 %v5682_v54  ;;  %v11567_v48 = vld [vmem:[#allocation3 + $0x82] sm:$0xff] }
 0x446   : > { %8460 = vmatprep.subr.bf16.mxu0 %v9025_v4  ;;  %8439 = vmatpush3.bf16.msra.mxu1 %v9026_v31  ;;  %v9058_v31 = vld [vmem:[%s11795_s10 + $0x198] sm:$0xff]   ;;  %v5985_v35 = vpack.c.bf16 %v11567_v48, %v11487_v15  ;;  %v9063_v54 = vld [vmem:[%s11795_s10 + $0x1c8] sm:$0xff]  }
 0x447   : > { %8440 = vmatprep.subr.bf16.mxu1 %v9028_v30 }
 0x449   : > { %8461 = vmatpush3.bf16.msra.mxu0 %v9025_v4  ;;  %v9061_v4 = vld [vmem:[%s11795_s10 + $0x1d0] sm:$0xff]  }
 0x44a   : > { %8462 = vmatprep.subr.bf16.mxu0 %v9027_v11  ;;  %8441 = vmatpush3.bf16.msra.mxu1 %v9028_v30  ;;  %v9066_v30 = vld [vmem:[%s11795_s10 + $0x238] sm:$0xff]  }
 0x44b   : > { %8442 = vmatprep.subr.bf16.mxu1 %v9030_v36 }
 0x44d   : > { %8463 = vmatpush3.bf16.msra.mxu0 %v9027_v11  ;;  %v9065_v11 = vld [vmem:[%s11795_s10 + $0x1c0] sm:$0xff]  }
 0x44e   : > { %8464 = vmatprep.subr.bf16.mxu0 %v9029_v22  ;;  %8443 = vmatpush3.bf16.msra.mxu1 %v9030_v36  ;;  %v9067_v36 = vld [vmem:[%s11795_s10 + $0x230] sm:$0xff]  }
 0x44f   : > { %8444 = vmatprep.subr.bf16.mxu1 %v9032_v7 }
 0x451   : > { %8465 = vmatpush3.bf16.msra.mxu0 %v9029_v22  ;;  %v9068_v22 = vld [vmem:[%s11795_s10 + $0x228] sm:$0xff]  }
 0x452   : > { %8466 = vmatprep.subr.bf16.mxu0 %v9031_v24  ;;  %8445 = vmatpush3.bf16.msra.mxu1 %v9032_v7  ;;  %v6135_v7 = vpack.c.bf16 %v11368_v23, %v11502_v17  ;;  %v9071_v23 = vld [vmem:[%s11795_s10 + $0x210] sm:$0xff]  }
 0x453   : > { %8478 = vmatprep.subr.bf16.mxu1 %v9034_v50 }
 0x455   : > { %8467 = vmatpush3.bf16.msra.mxu0 %v9031_v24  ;;  %8447 = vmatmul.mubr.bf16.vlgmr.msra.gmra.mxu1 %v11460_v55 }
 0x456   : > { %8468 = vmatprep.subr.bf16.mxu0 %v9033_v21  ;;  %8450 = vmatprep.mubr.bf16.mxu1 %v11466_v53 }
 0x457   : > { %8479 = vmatpush3.bf16.msra.mxu1 %v9034_v50  ;;  %v9073_v50 = vld [vmem:[%s11795_s10 + $0x200] sm:$0xff]  }
 0x458   : > { %8480 = vmatprep.subr.bf16.mxu1 %v9036_v2 }
 0x459   : > { %8469 = vmatpush3.bf16.msra.mxu0 %v9033_v21 }
 0x45a   : > { %8502 = vmatprep.subr.bf16.mxu0 %v9035_v25 }
 0x45b   : > { %8481 = vmatpush3.bf16.msra.mxu1 %v9036_v2 }
 0x45c   : > { %8471 = vmatmul.mubr.bf16.vlgmr.msra.gmra.mxu0 %v5683_v39  ;;  %8482 = vmatprep.subr.bf16.mxu1 %v9038_v10 }
 0x45d   : > { %8474 = vmatprep.mubr.bf16.mxu0 %v5684_v29  ;;  %8503 = vmatpush3.bf16.msra.mxu0 %v9035_v25 }
 0x45e   : > { %8504 = vmatprep.subr.bf16.mxu0 %v9037_v56  ;;  %8451 = vmatmul.mubr.bf16.gmra.mxu1 %v11491_v42 }
 0x45f   : > { %8483 = vmatpush3.bf16.msra.mxu1 %v9038_v10  ;;  %8494 = vmatprep.mubr.bf16.mxu1 %v5832_v6 }
 0x460   : > { %8484 = vmatprep.subr.bf16.mxu1 %v9040_v47 }
 0x461   : > { %8505 = vmatpush3.bf16.msra.mxu0 %v9037_v56 }
 0x462   : > { %8506 = vmatprep.subr.bf16.mxu0 %v9039_v13 }
 0x463   : > { %8485 = vmatpush3.bf16.msra.mxu1 %v9040_v47 }
 0x464   : > { %8475 = vmatmul.mubr.bf16.gmra.mxu0 %v5685_v45  ;;  %8486 = vmatprep.subr.bf16.mxu1 %v9042_v51 }
 0x465   : > { %8507 = vmatpush3.bf16.msra.mxu0 %v9039_v13  ;;  %8518 = vmatprep.mubr.bf16.mxu0 %v5982_v3 }
 0x466   : > { %8508 = vmatprep.subr.bf16.mxu0 %v9041_v41 }
 0x467   : > { %8487 = vmatpush3.bf16.msra.mxu1 %v9042_v51 }
 0x468   : > { %8488 = vmatprep.subr.bf16.mxu1 %v9044_v8 }
 0x469   : > { %8509 = vmatpush3.bf16.msra.mxu0 %v9041_v41 }
 0x46a   : > { %8510 = vmatprep.subr.bf16.mxu0 %v9043_v0 }
 0x46b   : > { %8489 = vmatpush3.bf16.msra.mxu1 %v9044_v8 }
 0x46c   : > { %8490 = vmatprep.subr.bf16.mxu1 %v9046_v38 }
 0x46d   : > { %8511 = vmatpush3.bf16.msra.mxu0 %v9043_v0 }
 0x46e   : > { %8512 = vmatprep.subr.bf16.mxu0 %v9045_v1 }
 0x46f   : > { %8491 = vmatpush3.bf16.msra.mxu1 %v9046_v38 }
 0x470   : > { %8492 = vmatprep.subr.bf16.mxu1 %v9048_v27 }
 0x471   : > { %8513 = vmatpush3.bf16.msra.mxu0 %v9045_v1 }
 0x472   : > { %8514 = vmatprep.subr.bf16.mxu0 %v9047_v44 }
 0x473   : > { %8493 = vmatpush3.bf16.msra.mxu1 %v9048_v27 }
 0x474   : > { %8526 = vmatprep.subr.bf16.mxu1 %v9050_v37 }
 0x475   : > { %8515 = vmatpush3.bf16.msra.mxu0 %v9047_v44 }
 0x476   : > { %8516 = vmatprep.subr.bf16.mxu0 %v9049_v49  ;;  %8495 = vmatmul.mubr.bf16.vlgmr.msra.gmra.mxu1 %v5833_v62  ;;  %v9056_v62 = vld [vmem:[%s11795_s10 + $0x1a0] sm:$0xff]  }
 0x477   : > { %8498 = vmatprep.mubr.bf16.mxu1 %v5834_v14  ;;  %8527 = vmatpush3.bf16.msra.mxu1 %v9050_v37 }
 0x478   : > { %8528 = vmatprep.subr.bf16.mxu1 %v9052_v19 }
 0x479   : > { %8517 = vmatpush3.bf16.msra.mxu0 %v9049_v49 }
 0x47a   : > { %8550 = vmatprep.subr.bf16.mxu0 %v9051_v20 }
 0x47b   : > { %8529 = vmatpush3.bf16.msra.mxu1 %v9052_v19 }
 0x47c   : > { %8519 = vmatmul.mubr.bf16.vlgmr.msra.gmra.mxu0 %v5983_v28  ;;  %8530 = vmatprep.subr.bf16.mxu1 %v9054_v12 }
 0x47d   : > { %8522 = vmatprep.mubr.bf16.mxu0 %v5984_v16  ;;  %8551 = vmatpush3.bf16.msra.mxu0 %v9051_v20 }
 0x47e   : > { %8552 = vmatprep.subr.bf16.mxu0 %v9053_v57  ;;  %8499 = vmatmul.mubr.bf16.gmra.mxu1 %v5835_v32  ;;  %v9060_v32 = vld [vmem:[%s11795_s10 + $0x190] sm:$0xff]  }
 0x47f   : > { %8531 = vmatpush3.bf16.msra.mxu1 %v9054_v12  ;;  %8542 = vmatprep.mubr.bf16.mxu1 %v11389_v9  ;;  %v9059_v9 = vld [vmem:[%s11795_s10 + $0x1d8] sm:$0xff]  }
 0x480   : > { %8532 = vmatprep.subr.bf16.mxu1 %v9056_v62 }
 0x481   : > { %8553 = vmatpush3.bf16.msra.mxu0 %v9053_v57 }
 0x482   : > { %8554 = vmatprep.subr.bf16.mxu0 %v9055_v40 }
 0x483   : > { %8533 = vmatpush3.bf16.msra.mxu1 %v9056_v62 }
 0x484   : > { %8523 = vmatmul.mubr.bf16.gmra.mxu0 %v5985_v35  ;;  %8534 = vmatprep.subr.bf16.mxu1 %v9058_v31 }
 0x485   : > { %8555 = vmatpush3.bf16.msra.mxu0 %v9055_v40  ;;  %8566 = vmatprep.mubr.bf16.mxu0 %v11353_v46  ;;  %v9064_v46 = vld [vmem:[%s11795_s10 + $0x180] sm:$0xff]  }
 0x486   : > { %8556 = vmatprep.subr.bf16.mxu0 %v9057_v18 }
 0x487   : > { %8535 = vmatpush3.bf16.msra.mxu1 %v9058_v31 }
 0x488   : > { %8536 = vmatprep.subr.bf16.mxu1 %v9060_v32 }
 0x489   : > { %8557 = vmatpush3.bf16.msra.mxu0 %v9057_v18 }
 0x48a   : > { %8558 = vmatprep.subr.bf16.mxu0 %v9059_v9 }
 0x48b   : > { %8537 = vmatpush3.bf16.msra.mxu1 %v9060_v32 }
 0x48c   : > { %8538 = vmatprep.subr.bf16.mxu1 %v9062_v52 }
 0x48d   : > { %8559 = vmatpush3.bf16.msra.mxu0 %v9059_v9 }
 0x48e   : > { %8560 = vmatprep.subr.bf16.mxu0 %v9061_v4 }
 0x48f   : > { %8539 = vmatpush3.bf16.msra.mxu1 %v9062_v52 }
 0x490   : > { %8540 = vmatprep.subr.bf16.mxu1 %v9064_v46 }
 0x491   : > { %8561 = vmatpush3.bf16.msra.mxu0 %v9061_v4 }
 0x492   : > { %8562 = vmatprep.subr.bf16.mxu0 %v9063_v54 }
 0x493   : > { %8541 = vmatpush3.bf16.msra.mxu1 %v9064_v46 }
 0x494   : > { %8574 = vmatprep.subr.bf16.mxu1 %v9066_v30 }
 0x495   : > { %8563 = vmatpush3.bf16.msra.mxu0 %v9063_v54 }
 0x496   : > { %8564 = vmatprep.subr.bf16.mxu0 %v9065_v11  ;;  %8543 = vmatmul.mubr.bf16.vlgmr.msra.gmra.mxu1 %v11413_v33  ;;  %v9069_v33 = vld [vmem:[%s11795_s10 + $0x220] sm:$0xff]  }
 0x497   : > { %8546 = vmatprep.mubr.bf16.mxu1 %v11425_v59  ;;  %8575 = vmatpush3.bf16.msra.mxu1 %v9066_v30  ;;  %v6281_v59 = vld [vmem:[#allocation3 + $0x91] sm:$0xff] }
 0x498   : > { %8576 = vmatprep.subr.bf16.mxu1 %v9067_v36  ;;  %v6285_v24 = vpack.c.bf16 %v6281_v59, %v11365_v26  ;;  %v6431_v26 = vld [vmem:[#allocation3 + $0x92] sm:$0xff] }
 0x499   : > { %8565 = vmatpush3.bf16.msra.mxu0 %v9065_v11  ;;  %v6435_v61 = vpack.c.bf16 %v6431_v26, %v11567_v48 }
 0x49b   : > { %8577 = vmatpush3.bf16.msra.mxu1 %v9067_v36 }
 0x49c   : > { %8567 = vmatmul.mubr.bf16.vlgmr.msra.gmra.mxu0 %v11374_v60  ;;  %8578 = vmatprep.subr.bf16.mxu1 %v9068_v22  ;;  %v9070_v60 = vld [vmem:[%s11795_s10 + $0x218] sm:$0xff]  }
 0x49d   : > { %8570 = vmatprep.mubr.bf16.mxu0 %v11396_v58  ;;  %v9072_v58 = vld [vmem:[%s11795_s10 + $0x208] sm:$0xff]  }
 0x49e   : > { %8547 = vmatmul.mubr.bf16.gmra.mxu1 %v6135_v7 }
 0x49f   : > { %8579 = vmatpush3.bf16.msra.mxu1 %v9068_v22  ;;  %8590 = vmatprep.mubr.bf16.mxu1 %v11460_v55 }
 0x4a0   : > { %8580 = vmatprep.subr.bf16.mxu1 %v9069_v33 }
 0x4a3   : > { %8581 = vmatpush3.bf16.msra.mxu1 %v9069_v33 }
 0x4a4   : > { %8571 = vmatmul.mubr.bf16.gmra.mxu0 %v6285_v24  ;;  %8582 = vmatprep.subr.bf16.mxu1 %v9070_v60 }
 0x4a7   : > { %8583 = vmatpush3.bf16.msra.mxu1 %v9070_v60 }
 0x4a8   : > { %8584 = vmatprep.subr.bf16.mxu1 %v9071_v23 }
 0x4ab   : > { %8585 = vmatpush3.bf16.msra.mxu1 %v9071_v23 }
 0x4ac   : > { %8586 = vmatprep.subr.bf16.mxu1 %v9072_v58 }
 0x4af   : > { %8587 = vmatpush3.bf16.msra.mxu1 %v9072_v58 }
 0x4b0   : > { %8588 = vmatprep.subr.bf16.mxu1 %v9073_v50 }
 0x4b3   : > { %8589 = vmatpush3.bf16.msra.mxu1 %v9073_v50 }
 0x4b6   : > { %8591 = vmatmul.mubr.bf16.vlgmr.msra.gmra.mxu1 %v11466_v53 }
 0x4b7   : > { %8594 = vmatprep.mubr.bf16.mxu1 %v11491_v42 }
 0x4be   : > { %8595 = vmatmul.mubr.bf16.gmra.mxu1 %v6435_v61 }
 0x4f5   : > { %v8400_v34 = vpop.f32.mrf.mxu1 }
 0x4f7   : > { %v5380_v21 = vpop.f32.mrf.mxu1 }
 0x4f9   : > { %v8401_v63 = vpop.f32.mrf.mxu1 }
 0x4fb   : > { %v5383_v5 = vpop.f32.mrf.mxu1 }
 0x4fc   : > { %v8424_v55 = vpop.f32.mrf.mxu0 }
 0x4fd   : > { %v11635_v25 = vpop.f32.mrf.mxu1  ;;  %v5502_v33 = vadd.f32 %v8424_v55, %v8400_v34 }
 0x4fe   : > { %v5493_v2 = vpop.f32.mrf.mxu0 }
 0x4ff   : > { %v11637_v43 = vpop.f32.mrf.mxu1  ;;  %v5494_v59 = vadd.f32 %v5493_v2, %v5380_v21 }
 0x500   : > { %v8425_v10 = vpop.f32.mrf.mxu0 }
 0x501   : > { %v11639_v56 = vpop.f32.mrf.mxu1  ;;  %v5505_v58 = vadd.f32 %v8425_v10, %v8401_v63 }
 0x502   : > { %v5496_v39 = vpop.f32.mrf.mxu0 }
 0x503   : > { %v11641_v29 = vpop.f32.mrf.mxu1  ;;  %v5497_v61 = vadd.f32 %v5496_v39, %v5383_v5 }
 0x504   : > { %v8428_v53 = vpop.f32.mrf.mxu0 }
 0x505   : > { %v5518_v34 = vadd.f32 %v8428_v53, %v11635_v25 }
 0x506   : > { %v5509_v42 = vpop.f32.mrf.mxu0 }
 0x507   : > { %v5510_v21 = vadd.f32 %v5509_v42, %v11637_v43 }
 0x508   : > { %v11643_v6 = vpop.f32.mrf.mxu0 }
 0x509   : > { %v5521_v5 = vadd.f32 %v11643_v6, %v11639_v56  ;;  %v11685_v56 = vld [vmem:[%s11796_s11] ss:$0 sm:$0xff] }
 0x50a   : > { %v11645_v17 = vpop.f32.mrf.mxu0 }
 0x50b   : > { %v5513_v25 = vadd.f32 %v11645_v17, %v11641_v29 }
 0x515   : > { %v8448_v15 = vpop.f32.mrf.mxu1 }
 0x516   : > { %v5668_v60 = vadd.f32 %v8448_v15, %v5502_v33 }
 0x517   : > { %v5635_v47 = vpop.f32.mrf.mxu1 }
 0x518   : > { %v5666_v26 = vadd.f32 %v5635_v47, %v5494_v59 }
 0x519   : > { %v8449_v13 = vpop.f32.mrf.mxu1 }
 0x51b   : > { %v5638_v45 = vpop.f32.mrf.mxu1 }
 0x51c   : > { %v8472_v51 = vpop.f32.mrf.mxu0 }
 0x51d   : > { %v5818_v50 = vadd.f32 %v8472_v51, %v5668_v60 }
 0x51e   : > { %v5785_v41 = vpop.f32.mrf.mxu0  ;;  %v8452_v3 = vpop.f32.mrf.mxu1 }
 0x51f   : > { %v5672_v39 = vadd.f32 %v8452_v3, %v5518_v34 }
 0x520   : > { %v8473_v8 = vpop.f32.mrf.mxu0  ;;  %v5651_v0 = vpop.f32.mrf.mxu1 }
 0x521   : > { %v5670_v47 = vadd.f32 %v5651_v0, %v5510_v21 }
 0x522   : > { %v5788_v38 = vpop.f32.mrf.mxu0  ;;  %v11647_v1 = vpop.f32.mrf.mxu1 }
 0x523   : > { %v5673_v42 = vadd.f32 %v11647_v1, %v5521_v5  ;;  %v11694_v1 = vld [vmem:[%s11797_s12] ss:$0 sm:$0xff] }
 0x524   : > { %v8476_v27 = vpop.f32.mrf.mxu0  ;;  %v11649_v44 = vpop.f32.mrf.mxu1 }
 0x525   : > { %v5822_v43 = vadd.f32 %v8476_v27, %v5672_v39 }
 0x526   : > { %v5801_v49 = vpop.f32.mrf.mxu0 }
 0x527   : > { %v5820_v53 = vadd.f32 %v5801_v49, %v5670_v47 }
 0x528   : > { %v11651_v14 = vpop.f32.mrf.mxu0 }
 0x52a   : > { %v11653_v12 = vpop.f32.mrf.mxu0 }
 0x52b   : > { %11930 = vst [vmem:[#allocation12_spill] sm:$0xff] %v11653_v12  ;;  %v5667_v12 = vadd.f32 %v5638_v45, %v5497_v61 }
 0x52d   : > { %v5817_v55 = vadd.f32 %v5788_v38, %v5667_v12  ;;  %v5671_v12 = vadd.f32 %v11649_v44, %v5513_v25 }
 0x536   : > { %v8496_v37 = vpop.f32.mrf.mxu1 }
 0x538   : > { %v5935_v19 = vpop.f32.mrf.mxu1 }
 0x53a   : > { %v8497_v20 = vpop.f32.mrf.mxu1 }
 0x53c   : > { %v8520_v28 = vpop.f32.mrf.mxu0  ;;  %v5938_v57 = vpop.f32.mrf.mxu1 }
 0x53e   : > { %v6085_v16 = vpop.f32.mrf.mxu0  ;;  %v11655_v62 = vpop.f32.mrf.mxu1 }
 0x53f   : > { %11931 = vst [vmem:[#allocation33_spill] sm:$0xff] %v11655_v62 }
 0x540   : > { %v8521_v40 = vpop.f32.mrf.mxu0  ;;  %v5951_v48 = vpop.f32.mrf.mxu1 }
 0x541   : > { %v5970_v27 = vadd.f32 %v5951_v48, %v5820_v53 }
 0x542   : > { %v6088_v31 = vpop.f32.mrf.mxu0  ;;  %v11657_v35 = vpop.f32.mrf.mxu1 }
 0x543   : > { %11932 = vst [vmem:[#allocation13_spill] sm:$0xff] %v11657_v35  ;;  %v5968_v35 = vadd.f32 %v8496_v37, %v5818_v50 }
 0x544   : > { %v11659_v18 = vpop.f32.mrf.mxu0  ;;  %v11661_v32 = vpop.f32.mrf.mxu1 }
 0x545   : > { %11933 = vst [vmem:[#allocation20_spill] sm:$0xff] %v11659_v18  ;;  %11934 = vst [vmem:[#allocation38_spill] sm:$0xff] %v11661_v32  ;;  %v5816_v32 = vadd.f32 %v5785_v41, %v5666_v26  ;;  %v6118_v62 = vadd.f32 %v8520_v28, %v5968_v35  ;;  %v5967_v41 = vadd.f32 %v5938_v57, %v5817_v55  ;;  %v9078_v26 = vld [vmem:[#allocation2 + $0x31] sm:$0xff] }
 0x546   : > { %v11663_v52 = vpop.f32.mrf.mxu0  ;;  %v11939_v29 = vld [vmem:[#allocation33_spill] sm:$0xff] }
 0x547   : > { %11935 = vst [vmem:[#allocation25_spill] sm:$0xff] %v11663_v52  ;;  %v6117_v6 = vadd.f32 %v6088_v31, %v5967_v41  ;;  %v5972_v17 = vadd.f32 %v11939_v29, %v5822_v43  ;;  %v9079_v41 = vld [vmem:[#allocation2 + $0x11] sm:$0xff] }
 0x548   : > { %v11665_v46 = vpop.f32.mrf.mxu0 }
 0x549   : > { %11936 = vst [vmem:[#allocation36_spill] sm:$0xff] %v11665_v46  ;;  %v5669_v46 = vadd.f32 %v8449_v13, %v5505_v58 }
 0x54a   : > { %v11667_v30 = vpop.f32.mrf.mxu0 }
 0x54b   : > { %11937 = vst [vmem:[#allocation37_spill] sm:$0xff] %v11667_v30  ;;  %v5819_v18 = vadd.f32 %v8473_v8, %v5669_v46 }
 0x54c   : > { %v11941_v31 = vld [vmem:[#allocation20_spill] sm:$0xff]  ;;  %v11945_v33 = vld [vmem:[#allocation38_spill] sm:$0xff] }
 0x54d   : > { %v5969_v63 = vadd.f32 %v8497_v20, %v5819_v18  ;;  %v5823_v20 = vadd.f32 %v11651_v14, %v5673_v42  ;;  %v6122_v44 = vadd.f32 %v11941_v31, %v5972_v17  ;;  %v9083_v31 = vld [vmem:[#allocation2 + $0x51] sm:$0xff] }
 0x54e   : > { %v11942_v35 = vld [vmem:[#allocation25_spill] sm:$0xff] }
 0x54f   : > { %v6119_v51 = vadd.f32 %v8521_v40, %v5969_v63  ;;  %v11940_v40 = vld [vmem:[#allocation12_spill] sm:$0xff]  ;;  %v6120_v18 = vadd.f32 %v11942_v35, %v5970_v27 }
 0x550   : > { %v5821_v14 = vadd.f32 %v11940_v40, %v5671_v12  ;;  %v9082_v40 = vld [vmem:[#allocation2 + $0x71] sm:$0xff] }
 0x552   : > { %v5971_v59 = vadd.f32 %v11945_v33, %v5821_v14  ;;  %v11947_v55 = vld [vmem:[#allocation37_spill] sm:$0xff] }
 0x556   : > { %v8544_v9 = vpop.f32.mrf.mxu1 }
 0x557   : > { %v6268_v10 = vadd.f32 %v8544_v9, %v6118_v62 }
 0x558   : > { %v6235_v4 = vpop.f32.mrf.mxu1 }
 0x55a   : > { %v8545_v54 = vpop.f32.mrf.mxu1 }
 0x55b   : > { %v6269_v0 = vadd.f32 %v8545_v54, %v6119_v51 }
 0x55c   : > { %v8568_v11 = vpop.f32.mrf.mxu0  ;;  %v6238_v36 = vpop.f32.mrf.mxu1 }
 0x55d   : > { %v6418_v45 = vadd.f32 %v8568_v11, %v6268_v10  ;;  %v6267_v57 = vadd.f32 %v6238_v36, %v6117_v6 }
 0x55e   : > { %v6385_v22 = vpop.f32.mrf.mxu0  ;;  %v11669_v7 = vpop.f32.mrf.mxu1 }
 0x55f   : > { %11938 = vst [vmem:[#allocation34_spill] sm:$0xff] %v11669_v7  ;;  %v5966_v7 = vadd.f32 %v5935_v19, %v5816_v32  ;;  %v11943_v32 = vld [vmem:[#allocation13_spill] sm:$0xff] }
 0x560   : > { %v8569_v24 = vpop.f32.mrf.mxu0  ;;  %v11671_v23 = vpop.f32.mrf.mxu1  ;;  %v5973_v48 = vadd.f32 %v11943_v32, %v5823_v20  ;;  %v9081_v20 = vld [vmem:[#allocation2 + $0x21] sm:$0xff] }
 0x561   : > { %v6116_v2 = vadd.f32 %v6085_v16, %v5966_v7  ;;  %v6419_v28 = vadd.f32 %v8569_v24, %v6269_v0  ;;  %v6270_v58 = vadd.f32 %v11671_v23, %v6120_v18 }
 0x562   : > { %v6388_v52 = vpop.f32.mrf.mxu0  ;;  %v11673_v30 = vpop.f32.mrf.mxu1 }
 0x563   : > { %v6266_v8 = vadd.f32 %v6235_v4, %v6116_v2  ;;  %v6417_v4 = vadd.f32 %v6388_v52, %v6267_v57  ;;  %v6121_v2 = vadd.f32 %v11947_v55, %v5971_v59 }
 0x564   : > { %v8572_v15 = vpop.f32.mrf.mxu0  ;;  %v6254_v13 = vpop.f32.mrf.mxu1 }
 0x565   : > { %v6416_v3 = vadd.f32 %v6385_v22, %v6266_v8  ;;  %v11944_v22 = vld [vmem:[#allocation36_spill] sm:$0xff]  ;;  %v6271_v43 = vadd.f32 %v6254_v13, %v6121_v2 }
 0x566   : > { %v6401_v37 = vpop.f32.mrf.mxu0  ;;  %v6123_v7 = vadd.f32 %v11944_v22, %v5973_v48  ;;  %v11946_v60 = vld [vmem:[#allocation34_spill] sm:$0xff] }
 0x567   : > { %v6272_v24 = vadd.f32 %v11946_v60, %v6122_v44  ;;  %v6420_v10 = vadd.f32 %v6401_v37, %v6270_v58 }
 0x568   : > { %v8573_v46 = vpop.f32.mrf.mxu0  ;;  %v6273_v5 = vadd.f32 %v11673_v30, %v6123_v7  ;;  %v9080_v30 = vld [vmem:[#allocation2 + $0x41] sm:$0xff] }
 0x569   : > { %v6422_v63 = vadd.f32 %v8572_v15, %v6272_v24 }
 0x56a   : > { %v6404_v47 = vpop.f32.mrf.mxu0  ;;  %v6423_v25 = vadd.f32 %v8573_v46, %v6273_v5 }
 0x56b   : > { %v6421_v0 = vadd.f32 %v6404_v47, %v6271_v43 }
 0x576   : > { %v8592_v38 = vpop.f32.mrf.mxu1 }
 0x577   : > { %v6568_v19 = vadd.f32 %v8592_v38, %v6418_v45 }
 0x578   : > { %v6535_v49 = vpop.f32.mrf.mxu1 }
 0x579   : > { %v6583_v16 = vmul.f32 %v11685_v56, %v6568_v19  ;;  %v6566_v62 = vadd.f32 %v6535_v49, %v6416_v3 }
 0x57a   : > { %v8593_v9 = vpop.f32.mrf.mxu1 }
 0x57b   : > { %v6598_v54 = vadd.f32 %v11694_v1, %v6583_v16  ;;  %v6581_v11 = vmul.f32 %v11685_v56, %v6566_v62  ;;  %v6569_v36 = vadd.f32 %v8593_v9, %v6419_v28  ;;  %v9084_v9 = vld [vmem:[#allocation2 + $0x81] sm:$0xff] }
 0x57c   : > { %v6538_v50 = vpop.f32.mrf.mxu1 }
 0x57d   : > { %v6606_v61 = vadd.f32 %v9078_v26, %v6598_v54  ;;  %v6596_v52 = vadd.f32 %v11694_v1, %v6581_v11  ;;  %v6584_v34 = vmul.f32 %v11685_v56, %v6569_v36  ;;  %v6567_v21 = vadd.f32 %v6538_v50, %v6417_v4  ;;  %v9085_v11 = vld [vmem:[#allocation2 + $0x61] sm:$0xff] }
 0x57e   : > { %v8596_v39 = vpop.f32.mrf.mxu1 }
 0x57f   : > { %v6614_v51 = vmax.f32 %v6606_v61, 0.0  ;;  %v6604_v45 = vadd.f32 %v9079_v41, %v6596_v52  ;;  %v6599_v23 = vadd.f32 %v11694_v1, %v6584_v34  ;;  %v6582_v8 = vmul.f32 %v11685_v56, %v6567_v21 }
 0x580   : > { %v6572_v53 = vadd.f32 %v8596_v39, %v6422_v63  ;;  %v6551_v42 = vpop.f32.mrf.mxu1 }
 0x581   : > { %6622 = vst [vmem:[%s11715_s24 + $0x10] sm:$0xff] %v6614_v51  ;;  %v6612_v15 = vmax.f32 %v6604_v45, 0.0  ;;  %v6607_v38 = vadd.f32 %v9080_v30, %v6599_v23  ;;  %v6597_v6 = vadd.f32 %v11694_v1, %v6582_v8  ;;  %v6570_v3 = vadd.f32 %v6551_v42, %v6420_v10 }
 0x582   : > { %v6587_v37 = vmul.f32 %v11685_v56, %v6572_v53  ;;  %v8597_v19 = vpop.f32.mrf.mxu1 }
 0x583   : > { %6620 = vst [vmem:[%s11715_s24] sm:$0xff] %v6612_v15  ;;  %v6615_v13 = vmax.f32 %v6607_v38, 0.0  ;;  %v6605_v12 = vadd.f32 %v9081_v20, %v6597_v6  ;;  %v6585_v29 = vmul.f32 %v11685_v56, %v6570_v3  ;;  %v6573_v17 = vadd.f32 %v8597_v19, %v6423_v25 }
 0x584   : > { %v6602_v27 = vadd.f32 %v11694_v1, %v6587_v37  ;;  %v6554_v49 = vpop.f32.mrf.mxu1 }
 0x585   : > { %6623 = vst [vmem:[%s11715_s24 + $0x18] sm:$0xff] %v6615_v13  ;;  %v6613_v28 = vmax.f32 %v6605_v12, 0.0  ;;  %v6600_v57 = vadd.f32 %v11694_v1, %v6585_v29  ;;  %v6588_v16 = vmul.f32 %v11685_v56, %v6573_v17  ;;  %v6571_v62 = vadd.f32 %v6554_v49, %v6421_v0 }
 0x586   : > { %v6610_v14 = vadd.f32 %v9082_v40, %v6602_v27 }
 0x587   : > { %6621 = vst [vmem:[%s11715_s24 + $0x8] sm:$0xff] %v6613_v28  ;;  %v6608_v44 = vadd.f32 %v9083_v31, %v6600_v57  ;;  %v6603_v35 = vadd.f32 %v11694_v1, %v6588_v16  ;;  %v6586_v18 = vmul.f32 %v11685_v56, %v6571_v62 }
 0x588   : > { %v6618_v32 = vmax.f32 %v6610_v14, 0.0 }
 0x589   : > { %v6616_v48 = vmax.f32 %v6608_v44, 0.0  ;;  %v6611_v4 = vadd.f32 %v9084_v9, %v6603_v35  ;;  %v6601_v46 = vadd.f32 %v11694_v1, %v6586_v18 }
 0x58a   : > { %6626 = vst [vmem:[%s11715_s24 + $0x30] sm:$0xff] %v6618_v32 }
 0x58b   : > { %6624 = vst [vmem:[%s11715_s24 + $0x20] sm:$0xff] %v6616_v48  ;;  %v6619_v54 = vmax.f32 %v6611_v4, 0.0  ;;  %v6609_v36 = vadd.f32 %v9085_v11, %v6601_v46 }
 0x58d   : > { %6627 = vst [vmem:[%s11715_s24 + $0x38] sm:$0xff] %v6619_v54  ;;  %v6617_v56 = vmax.f32 %v6609_v36, 0.0 }
 0x58f   : > { %6625 = vst [vmem:[%s11715_s24 + $0x28] sm:$0xff] %v6617_v56 }
 0x590   : > { %9099 = shalt.err (!%p9096_p3)
}
 0x591   : > { %s9100_s27 = scalar_lea.hbm %s11737_s14, 1024  ;;  %s9104_s15 = scalar_lea.hbm %s11798_s13, 2048 }
 0x592   : > { %p9101_p4 = scmp.ne.s32.totalorder %s11737_s14, %s9100_s27  ;;  %p9105_p9 = scmp.lt.s32.totalorder %s11737_s14, %s11798_s13 }
 0x593   : > { %p9106_p10 = scmp.lt.s32.totalorder %s9104_s15, %s9100_s27 }
 0x594   : > { %p9102_p7 = pnand %p9101_p4, %p9261_p5 }
 0x595   : > { %p9107_p11 = por %p9106_p10, %p9105_p9 }
 0x596   : > { %p9103_p8 = pneg %p9102_p7 }
 0x598   : > { %p9108_p12 = pnand %p9107_p11, %p9103_p8 }
 0x59a   : > { %9111 = shalt.err (!%p9108_p12)
}
 0x59b   : > { %s9151_s19 = smov 128   ;;  %s9152_s23 = smov 8  }
 0x59c   : > { %8599 = dma.vmem_to_hbm [thread:$0]  (%p9261_p5), %s11739_s16, 1024, %s11737_s14, %s11745_s29, %s9151_s19, %s9151_s19, %s9152_s23  }
 0x59d PF: > { %p8605_p13 = scmp.ge.s32.totalorder %s9146_s28, 2  ;;  %s6657_s30 = sand.u32 1, %s9134_s25  }
 0x59e   : > { %s6658_s27 = scalar_lea.sflag [#allocation5], %s6657_s30 }
 0x59f   : > { %p8602_p0 = pnand %p8605_p13, %p9265_p6 }
 0x5a1   : > { %p8603_p1 = pneg %p8602_p0 }
 0x5a3   : > { %9129 = dma.done.wait (%p8603_p1), %s6658_s27, 1024  }
 0x5a4   : > { %9131 = vsyncadd (%p8603_p1), %s6658_s27, 4294966272  ;;  %s11949_s28 = sld [smem:[#allocation8_spill]]  ;;  %s11952_s25 = smov %s9138_s26 }
 0x5a5   : > { %s11950_s22 = sld [smem:[#allocation7_spill]] }
 0x5a6   : > { %s11951_s27 = sld [smem:[#allocation9_spill]] }
 0x5aa   : > { %p23_p2 = scmp.ge.s32.totalorder %s11949_s28, 4  }
 0x5ab   : > { %s11953_s26 = smov %s11950_s22 }
 0x5ac   :  { %25 = sbr.rel (!%p23_p2) target bundleno = 3 (0x3), region = 144 }
 0x5b1   :  { %6663 = vsyncpa [#allocation5], 1 }
 0x5b2   :  { %6665 = vsyncpa [#allocation5 + $0x1], 1 }

</bundles_post_ra>
